<compile_context>
chip_gen: v6e
topology: v6e:2x2x1
jax: 0.10.0
libtpu: 0.0.40
codegen_flags: <defaults>
</compile_context>

<pallas_src>
import functools
import math

import jax
import jax.numpy as jnp
from jax.experimental import pallas as pl
from jax.experimental.pallas import tpu as pltpu


_VMEM_LIMIT = 48 * 1024 * 1024  # fits v7x's 64 MiB VMEM with headroom


# ----------------------------------------------------------------------------
# small padding / tiling helpers (all static shape math)
# ----------------------------------------------------------------------------
def _round_up(x, m):
    return ((x + m - 1) // m) * m


def _pad2(a, rows, cols):
    r, c = a.shape
    if r == rows and c == cols:
        return a
    return jnp.pad(a, ((0, rows - r), (0, cols - c)))


def _choose_m_tiling(m, tile_m):
    """Returns (padded_M, block_M).  block_M is a multiple of 8; if M is large
    we tile with `tile_m` rows per grid step so BlockSpec can double-buffer."""
    if m >= tile_m:
        return _round_up(m, tile_m), tile_m
    mp = _round_up(m, 8)
    return mp, mp


def _dilations(depth, dgr):
    # Resnet1D(reverse_dilation=True)
    return [dgr ** d for d in range(depth)][::-1]


# ----------------------------------------------------------------------------
# Pallas kernel 1: tiled matmul + bias (+ optional ReLU-in / ReLU-out /
# residual add).  bf16 operands, f32 accumulation; the Conv1d hot path.
# ----------------------------------------------------------------------------
def _mm_kernel(*refs, relu_in, relu_out, has_residual):
    if has_residual:
        x_ref, w_ref, b_ref, r_ref, o_ref = refs
    else:
        x_ref, w_ref, b_ref, o_ref = refs
    x = x_ref[...]                                   # bf16 tile (TM, Kp)
    if relu_in:
        x = jnp.maximum(x, 0)                        # exact for bf16
    acc = jnp.dot(x, w_ref[...], preferred_element_type=jnp.float32)
    acc = acc + b_ref[...]                           # f32
    if relu_out:
        acc = jnp.maximum(acc, 0.0)
    if has_residual:
        acc = acc + r_ref[...]
    o_ref[...] = acc


def matmul_bias(x, w, b, residual=None, relu_in=False, relu_out=False,
                tile_m=256):
    """x:(M,K) f32, w:(K,N) f32, b:(N,) f32 -> (M,N) f32.  Pads K,N to 128
    multiples (lane-dense), tiles over M, casts MXU operands to bf16."""
    M, K = x.shape
    K2, N = w.shape
    assert K == K2
    Kp, Np = _round_up(K, 128), _round_up(N, 128)
    Mp, TM = _choose_m_tiling(M, tile_m)

    xp = _pad2(x, Mp, Kp).astype(jnp.bfloat16)
    wp = _pad2(w, Kp, Np).astype(jnp.bfloat16)
    bp = _pad2(b.reshape(1, N), 1, Np)

    args = [xp, wp, bp]
    in_specs = [pl.BlockSpec((TM, Kp), lambda i: (i, 0)),
                pl.BlockSpec((Kp, Np), lambda i: (0, 0)),
                pl.BlockSpec((1, Np), lambda i: (0, 0))]
    if residual is not None:
        args.append(_pad2(residual, Mp, Np))
        in_specs.append(pl.BlockSpec((TM, Np), lambda i: (i, 0)))

    out = pl.pallas_call(
        functools.partial(_mm_kernel, relu_in=relu_in, relu_out=relu_out,
                          has_residual=residual is not None),
        grid=(Mp // TM,),
        out_shape=jax.ShapeDtypeStruct((Mp, Np), jnp.float32),
        in_specs=in_specs,
        out_specs=pl.BlockSpec((TM, Np), lambda i: (i, 0)),
        compiler_params=pltpu.CompilerParams(
            dimension_semantics=("parallel",),
            vmem_limit_bytes=_VMEM_LIMIT),
    )(*args)
    return out[:M, :N]


# ----------------------------------------------------------------------------
# Pallas kernel 2: fused residual block
#   out = conv2_1x1( relu( conv1_dilated( relu(x) ) ) ) + x
# The intermediate activation stays in registers/VMEM (no HBM round trip).
# ----------------------------------------------------------------------------
def _resblock_kernel(p_ref, w1_ref, b1_ref, w2_ref, b2_ref, r_ref, o_ref):
    a = jnp.maximum(p_ref[...], 0)                                   # bf16
    h = jnp.dot(a, w1_ref[...], preferred_element_type=jnp.float32)  # f32
    h = h + b1_ref[...]
    hb = jnp.maximum(h, 0.0).astype(jnp.bfloat16)
    out = jnp.dot(hb, w2_ref[...], preferred_element_type=jnp.float32)
    o_ref[...] = out + b2_ref[...] + r_ref[...]


def res_block(x, p, dilation, tile_m=256):
    B, T, C = x.shape
    patches, T_out = im2col(x, 3, 1, dilation, dilation)   # (B*T, 3*C)
    assert T_out == T
    M = B * T
    K1 = 3 * C
    w1 = jnp.transpose(p["conv1"]["w"], (2, 1, 0)).reshape(K1, C)
    w2 = jnp.transpose(p["conv2"]["w"], (2, 1, 0)).reshape(C, C)

    Kp, Cp = _round_up(K1, 128), _round_up(C, 128)
    Mp, TM = _choose_m_tiling(M, tile_m)

    p_pad = _pad2(patches, Mp, Kp).astype(jnp.bfloat16)
    w1p = _pad2(w1, Kp, Cp).astype(jnp.bfloat16)
    w2p = _pad2(w2, Cp, Cp).astype(jnp.bfloat16)
    b1p = _pad2(p["conv1"]["b"].reshape(1, C), 1, Cp)
    b2p = _pad2(p["conv2"]["b"].reshape(1, C), 1, Cp)
    rp = _pad2(x.reshape(M, C), Mp, Cp)

    out = pl.pallas_call(
        _resblock_kernel,
        grid=(Mp // TM,),
        out_shape=jax.ShapeDtypeStruct((Mp, Cp), jnp.float32),
        in_specs=[pl.BlockSpec((TM, Kp), lambda i: (i, 0)),
                  pl.BlockSpec((Kp, Cp), lambda i: (0, 0)),
                  pl.BlockSpec((1, Cp), lambda i: (0, 0)),
                  pl.BlockSpec((Cp, Cp), lambda i: (0, 0)),
                  pl.BlockSpec((1, Cp), lambda i: (0, 0)),
                  pl.BlockSpec((TM, Cp), lambda i: (i, 0))],
        out_specs=pl.BlockSpec((TM, Cp), lambda i: (i, 0)),
        compiler_params=pltpu.CompilerParams(
            dimension_semantics=("parallel",),
            vmem_limit_bytes=_VMEM_LIMIT),
    )(p_pad, w1p, b1p, w2p, b2p, rp)
    return out[:M, :C].reshape(B, T, C)


# ----------------------------------------------------------------------------
# Pallas kernel 3: vector quantizer ('orig' Quantizer), tiled over M.
#   d = ||z||^2 + ||e||^2 - 2 z e^T ; idx = argmin ; z_q = E[idx]
#   loss = (1 + beta) * mse(z_q, z) ; perplexity from the code histogram.
# Distance math stays f32 (argmin / tie semantics).
# ----------------------------------------------------------------------------
def _vq_kernel(z_ref, e_ref, esq_ref, zq_ref, loss_ref, ppl_ref,
               hist_ref, mse_ref, *, beta, m_real, v_real, c_real):
    i = pl.program_id(0)
    nsteps = pl.num_programs(0)

    @pl.when(i == 0)
    def _init():
        hist_ref[...] = jnp.zeros_like(hist_ref)
        mse_ref[...] = jnp.zeros_like(mse_ref)

    z = z_ref[...]                                     # (TM, Cp) f32
    e = e_ref[...]                                     # (Vp, Cp) f32
    TM = z.shape[0]
    Vp = e.shape[0]

    z_sq = jnp.sum(z * z, axis=1, keepdims=True)                       # (TM,1)
    cross = jax.lax.dot_general(z, e, (((1,), (1,)), ((), ())),
                                preferred_element_type=jnp.float32)    # (TM,Vp)
    d = z_sq + esq_ref[...] - 2.0 * cross

    col = jax.lax.broadcasted_iota(jnp.int32, (TM, Vp), 1)
    d = jnp.where(col < v_real, d, jnp.inf)            # mask padded codes
    d_min = jnp.min(d, axis=1, keepdims=True)
    # first index achieving the minimum (torch argmin semantics)
    idx = jnp.min(jnp.where(d == d_min, col, Vp), axis=1, keepdims=True)
    onehot = (col == idx).astype(jnp.float32)                          # (TM,Vp)

    zq = jnp.dot(onehot, e, preferred_element_type=jnp.float32)        # (TM,Cp)
    zq_ref[...] = zq

    # statistics: mask padded rows of this tile
    row = jax.lax.broadcasted_iota(jnp.int32, (TM, 1), 0) + i * TM
    valid = (row < m_real).astype(jnp.float32)                         # (TM,1)
    diff = zq - z
    mse_ref[...] += jnp.sum(jnp.sum(diff * diff, axis=1, keepdims=True) * valid,
                            axis=0, keepdims=True)                     # (1,1)
    hist_ref[...] += jnp.sum(onehot * valid, axis=0, keepdims=True)    # (1,Vp)

    @pl.when(i == nsteps - 1)
    def _finalize():
        mse = mse_ref[...] / (m_real * c_real)
        loss_ref[...] = (1.0 + beta) * mse
        e_mean = hist_ref[...] / m_real
        ent = jnp.sum(e_mean * jnp.log(e_mean + 1e-10), axis=1, keepdims=True)
        ppl_ref[...] = jnp.exp(-ent)


def vq_quantize(z_flat, codebook, beta, tile_m=512):
    M, C = z_flat.shape
    V, C2 = codebook.shape
    assert C == C2
    Cp, Vp = _round_up(C, 128), _round_up(V, 128)
    Mp, TM = _choose_m_tiling(M, tile_m)

    zp = _pad2(z_flat, Mp, Cp)
    ep = _pad2(codebook, Vp, Cp)
    # ||e||^2 as a lane-dense row, computed once outside (tiny, reused per tile)
    esq = _pad2(jnp.sum(codebook * codebook, axis=1).reshape(1, V), 1, Vp)

    zq, loss, ppl = pl.pallas_call(
        functools.partial(_vq_kernel, beta=beta, m_real=M, v_real=V, c_real=C),
        grid=(Mp // TM,),
        out_shape=(jax.ShapeDtypeStruct((Mp, Cp), jnp.float32),
                   jax.ShapeDtypeStruct((1, 1), jnp.float32),
                   jax.ShapeDtypeStruct((1, 1), jnp.float32)),
        in_specs=[pl.BlockSpec((TM, Cp), lambda i: (i, 0)),
                  pl.BlockSpec((Vp, Cp), lambda i: (0, 0)),
                  pl.BlockSpec((1, Vp), lambda i: (0, 0))],
        out_specs=(pl.BlockSpec((TM, Cp), lambda i: (i, 0)),
                   pl.BlockSpec((1, 1), lambda i: (0, 0)),
                   pl.BlockSpec((1, 1), lambda i: (0, 0))),
        scratch_shapes=[pltpu.VMEM((1, Vp), jnp.float32),
                        pltpu.VMEM((1, 1), jnp.float32)],
        compiler_params=pltpu.CompilerParams(
            dimension_semantics=("arbitrary",),   # sequential loss/hist accum
            vmem_limit_bytes=_VMEM_LIMIT),
    )(zp, ep, esq)
    return zq[:M, :C], loss[0, 0], ppl[0, 0]


# ----------------------------------------------------------------------------
# Conv1d (PyTorch semantics) = im2col (static-shape glue) + Pallas matmul.
# ----------------------------------------------------------------------------
def im2col(x, K, stride, padding, dilation):
    B, T, C = x.shape
    x_pad = jnp.pad(x, ((0, 0), (padding, padding), (0, 0)))
    Tp = T + 2 * padding
    T_out = (Tp - dilation * (K - 1) - 1) // stride + 1
    cols = []
    for k in range(K):
        start = k * dilation
        end = start + stride * (T_out - 1) + 1
        cols.append(x_pad[:, start:end:stride, :])
    patches = jnp.stack(cols, axis=2).reshape(B * T_out, K * C)
    return patches, T_out


def conv1d(x, p, stride=1, padding=0, dilation=1,
           relu_in=False, relu_out=False, residual=None):
    # x: (B, T, Cin) ; p["w"]: (Cout, Cin, K) torch layout ; p["b"]: (Cout,)
    w, b = p["w"], p["b"]
    B, T, Cin = x.shape
    Cout, Cin2, K = w.shape
    assert Cin == Cin2
    patches, T_out = im2col(x, K, stride, padding, dilation)
    w_flat = jnp.transpose(w, (2, 1, 0)).reshape(K * Cin, Cout)
    res = residual.reshape(B * T_out, Cout) if residual is not None else None
    out = matmul_bias(patches, w_flat, b, residual=res,
                      relu_in=relu_in, relu_out=relu_out)
    return out.reshape(B, T_out, Cout)


# ----------------------------------------------------------------------------
# Parameter init (deterministic, PyTorch-like uniform fan-in bounds).
# NOTE: params contain ONLY arrays (dilations are static config, not leaves).
# ----------------------------------------------------------------------------
def conv_params(key, cin, cout, k):
    k1, k2 = jax.random.split(key)
    bound = 1.0 / math.sqrt(cin * k)
    return {"w": jax.random.uniform(k1, (cout, cin, k), jnp.float32, -bound, bound),
            "b": jax.random.uniform(k2, (cout,), jnp.float32, -bound, bound)}


def init_params(key, in_dim, width, out_emb, down_t, depth, nb_code, code_dim):
    keys = iter(jax.random.split(key, 512))
    nk = lambda: next(keys)

    def resnet_params():
        return [{"conv1": conv_params(nk(), width, width, 3),
                 "conv2": conv_params(nk(), width, width, 1)}
                for _ in range(depth)]

    enc = {"in": conv_params(nk(), in_dim, width, 3),
           "down": [{"down": conv_params(nk(), width, width, 4),
                     "res": resnet_params()} for _ in range(down_t)],
           "out": conv_params(nk(), width, out_emb, 3)}

    dec = {"in": conv_params(nk(), out_emb, width, 3),
           "up": [{"res": resnet_params(),
                   "conv": conv_params(nk(), width, width, 3)}
                  for _ in range(down_t)],
           "out1": conv_params(nk(), width, width, 3),
           "out2": conv_params(nk(), width, in_dim, 3)}

    codebook = jax.random.uniform(nk(), (nb_code, code_dim), jnp.float32,
                                  -1.0 / nb_code, 1.0 / nb_code)
    return {"enc": enc, "dec": dec, "codebook": codebook}


# ----------------------------------------------------------------------------
# Forward pass (HumanVQVAE.forward, type='full').  Channel-last throughout;
# equivalent to torch's permute-to-NCL preprocess/postprocess.
# ----------------------------------------------------------------------------
def encoder_fwd(x, enc, stride_t, dgr):
    x = conv1d(x, enc["in"], stride=1, padding=1, relu_out=True)
    for blk in enc["down"]:
        x = conv1d(x, blk["down"], stride=stride_t, padding=stride_t // 2)
        for rp, dil in zip(blk["res"], _dilations(len(blk["res"]), dgr)):
            x = res_block(x, rp, dil)
    x = conv1d(x, enc["out"], stride=1, padding=1)
    return x


def decoder_fwd(x, dec, stride_t, dgr):
    x = conv1d(x, dec["in"], stride=1, padding=1, relu_out=True)
    for blk in dec["up"]:
        for rp, dil in zip(blk["res"], _dilations(len(blk["res"]), dgr)):
            x = res_block(x, rp, dil)
        # TODO(synk): fuse the nearest-neighbour upsample into the following
        # conv's im2col gather to avoid materializing the 2x activation.
        x = jnp.repeat(x, 2, axis=1)     # nn.Upsample(scale_factor=2, 'nearest')
        x = conv1d(x, blk["conv"], stride=1, padding=1)
    x = conv1d(x, dec["out1"], stride=1, padding=1, relu_out=True)
    x = conv1d(x, dec["out2"], stride=1, padding=1)
    return x


def human_vqvae_forward(x, params, *, stride_t, dgr, beta):
    z = encoder_fwd(x, params["enc"], stride_t, dgr)      # (N, T', code_dim)
    N, Tq, C = z.shape
    z_flat = z.reshape(N * Tq, C)
    zq_flat, loss, perplexity = vq_quantize(z_flat, params["codebook"], beta)
    # TODO(synk): straight-through estimator (z + (z_q - z).detach()) only
    # affects gradients; forward values equal z_q, which is what we use.
    zq = zq_flat.reshape(N, Tq, C)
    x_dec = decoder_fwd(zq, params["dec"], stride_t, dgr)  # (N, T, F)
    return x_dec, loss, perplexity


if __name__ == "__main__":
    # args-equivalent config: dataname='kit' -> 251 features, quantizer='orig'
    DATANAME = "kit"
    IN_DIM = 251 if DATANAME == "kit" else 263
    NB_CODE, CODE_DIM, WIDTH = 128, 128, 128    # small but 128-lane aligned
    DOWN_T, STRIDE_T, DEPTH, DGR = 2, 2, 2, 3
    B, T = 2, 16

    key = jax.random.PRNGKey(0)
    kp, kx = jax.random.split(key)
    params = init_params(kp, IN_DIM, WIDTH, CODE_DIM, DOWN_T, DEPTH,
                         NB_CODE, CODE_DIM)
    x = jax.random.normal(kx, (B, T, IN_DIM), jnp.float32)

    fwd = jax.jit(functools.partial(human_vqvae_forward,
                                    stride_t=STRIDE_T, dgr=DGR, beta=1.0))
    x_out, loss, ppl = fwd(x, params)
    jax.block_until_ready((x_out, loss, ppl))

    assert x_out.shape == (B, T, IN_DIM), x_out.shape
    assert loss.shape == () and ppl.shape == ()
    assert bool(jnp.isfinite(loss)) and bool(jnp.isfinite(ppl))
    print("KERNEL_OK")
</pallas_src>

<mosaic_0001>
module attributes {stable_mosaic.version = 11 : i64} {
  func.func @_mm_kernel(%arg0: i32, %arg1: memref<32x768xbf16, #tpu.memory_space<vmem>>, %arg2: memref<768x128xbf16, #tpu.memory_space<vmem>>, %arg3: memref<1x128xf32, #tpu.memory_space<vmem>>, %arg4: memref<32x128xf32, #tpu.memory_space<vmem>>) attributes {dimension_semantics = [#tpu.dimension_semantics<parallel>], iteration_bounds = array<i64: 1>, scalar_prefetch = 0 : i64, scratch_operands = 0 : i64, tpu.core_type = #tpu.core_type<tc>, window_params = [{transform_indices = @transform_0, window_bounds = array<i64: 32, 768>}, {pipeline_mode = #tpu.pipeline_mode<synchronous>, transform_indices = @transform_1, window_bounds = array<i64: 768, 128>}, {pipeline_mode = #tpu.pipeline_mode<synchronous>, transform_indices = @transform_2, window_bounds = array<i64: 1, 128>}, {transform_indices = @transform_3, window_bounds = array<i64: 32, 128>}]} {
    %c0 = arith.constant 0 : index
    %c0_0 = arith.constant 0 : index
    %0 = vector.load %arg1[%c0, %c0_0] : memref<32x768xbf16, #tpu.memory_space<vmem>>, vector<32x768xbf16>
    %c0_1 = arith.constant 0 : index
    %c0_2 = arith.constant 0 : index
    %1 = vector.load %arg2[%c0_1, %c0_2] : memref<768x128xbf16, #tpu.memory_space<vmem>>, vector<768x128xbf16>
    %cst = arith.constant dense<0.000000e+00> : vector<32x128xf32>
    %2 = tpu.matmul %0, %1, %cst {dimension_numbers = #tpu.dot_dimension_numbers<[1], [0], [0], [1], [0, 0, 1, 1], [], []>} : vector<32x768xbf16>, vector<768x128xbf16>, vector<32x128xf32> -> vector<32x128xf32>
    %c0_3 = arith.constant 0 : index
    %c0_4 = arith.constant 0 : index
    %3 = vector.load %arg3[%c0_3, %c0_4] : memref<1x128xf32, #tpu.memory_space<vmem>>, vector<1x128xf32>
    %4 = vector.broadcast %3 : vector<1x128xf32> to vector<32x128xf32>
    %5 = arith.addf %2, %4 : vector<32x128xf32>
    %cst_5 = arith.constant 0.000000e+00 : f32
    %6 = vector.broadcast %cst_5 : f32 to vector<32x128xf32>
    %7 = arith.maximumf %5, %6 : vector<32x128xf32>
    %c0_6 = arith.constant 0 : index
    %c0_7 = arith.constant 0 : index
    %8 = vector.load %arg4[%c0_6, %c0_7] : memref<32x128xf32, #tpu.memory_space<vmem>>, vector<32x128xf32>
    tpu.vector_store %arg4[%c0_6, %c0_7], %7 {strides = array<i32>} : memref<32x128xf32, #tpu.memory_space<vmem>>, vector<32x128xf32>,
    return
  }
  func.func @transform_0(%arg0: i32) -> (i32, i32) {
    %c0_i32 = arith.constant 0 : i32
    %c0_i32_0 = arith.constant 0 : i32
    return %arg0, %c0_i32 : i32, i32
  }
  func.func @transform_1(%arg0: i32) -> (i32, i32) {
    %c0_i32 = arith.constant 0 : i32
    %c0_i32_0 = arith.constant 0 : i32
    %c0_i32_1 = arith.constant 0 : i32
    return %c0_i32, %c0_i32_0 : i32, i32
  }
  func.func @transform_2(%arg0: i32) -> (i32, i32) {
    %c0_i32 = arith.constant 0 : i32
    %c0_i32_0 = arith.constant 0 : i32
    %c0_i32_1 = arith.constant 0 : i32
    return %c0_i32, %c0_i32_0 : i32, i32
  }
  func.func @transform_3(%arg0: i32) -> (i32, i32) {
    %c0_i32 = arith.constant 0 : i32
    %c0_i32_0 = arith.constant 0 : i32
    return %arg0, %c0_i32 : i32, i32
  }
}

module attributes {stable_mosaic.version = 11 : i64} {
  func.func @_mm_kernel(%arg0: i32, %arg1: memref<16x512xbf16, #tpu.memory_space<vmem>>, %arg2: memref<512x128xbf16, #tpu.memory_space<vmem>>, %arg3: memref<1x128xf32, #tpu.memory_space<vmem>>, %arg4: memref<16x128xf32, #tpu.memory_space<vmem>>) attributes {dimension_semantics = [#tpu.dimension_semantics<parallel>], iteration_bounds = array<i64: 1>, scalar_prefetch = 0 : i64, scratch_operands = 0 : i64, tpu.core_type = #tpu.core_type<tc>, window_params = [{transform_indices = @transform_0, window_bounds = array<i64: 16, 512>}, {pipeline_mode = #tpu.pipeline_mode<synchronous>, transform_indices = @transform_1, window_bounds = array<i64: 512, 128>}, {pipeline_mode = #tpu.pipeline_mode<synchronous>, transform_indices = @transform_2, window_bounds = array<i64: 1, 128>}, {transform_indices = @transform_3, window_bounds = array<i64: 16, 128>}]} {
    %c0 = arith.constant 0 : index
    %c0_0 = arith.constant 0 : index
    %0 = vector.load %arg1[%c0, %c0_0] : memref<16x512xbf16, #tpu.memory_space<vmem>>, vector<16x512xbf16>
    %c0_1 = arith.constant 0 : index
    %c0_2 = arith.constant 0 : index
    %1 = vector.load %arg2[%c0_1, %c0_2] : memref<512x128xbf16, #tpu.memory_space<vmem>>, vector<512x128xbf16>
    %cst = arith.constant dense<0.000000e+00> : vector<16x128xf32>
    %2 = tpu.matmul %0, %1, %cst {dimension_numbers = #tpu.dot_dimension_numbers<[1], [0], [0], [1], [0, 0, 1, 1], [], []>} : vector<16x512xbf16>, vector<512x128xbf16>, vector<16x128xf32> -> vector<16x128xf32>
    %c0_3 = arith.constant 0 : index
    %c0_4 = arith.constant 0 : index
    %3 = vector.load %arg3[%c0_3, %c0_4] : memref<1x128xf32, #tpu.memory_space<vmem>>, vector<1x128xf32>
    %4 = vector.broadcast %3 : vector<1x128xf32> to vector<16x128xf32>
    %5 = arith.addf %2, %4 : vector<16x128xf32>
    %c0_5 = arith.constant 0 : index
    %c0_6 = arith.constant 0 : index
    %6 = vector.load %arg4[%c0_5, %c0_6] : memref<16x128xf32, #tpu.memory_space<vmem>>, vector<16x128xf32>
    tpu.vector_store %arg4[%c0_5, %c0_6], %5 {strides = array<i32>} : memref<16x128xf32, #tpu.memory_space<vmem>>, vector<16x128xf32>,
    return
  }
  func.func @transform_0(%arg0: i32) -> (i32, i32) {
    %c0_i32 = arith.constant 0 : i32
    %c0_i32_0 = arith.constant 0 : i32
    return %arg0, %c0_i32 : i32, i32
  }
  func.func @transform_1(%arg0: i32) -> (i32, i32) {
    %c0_i32 = arith.constant 0 : i32
    %c0_i32_0 = arith.constant 0 : i32
    %c0_i32_1 = arith.constant 0 : i32
    return %c0_i32, %c0_i32_0 : i32, i32
  }
  func.func @transform_2(%arg0: i32) -> (i32, i32) {
    %c0_i32 = arith.constant 0 : i32
    %c0_i32_0 = arith.constant 0 : i32
    %c0_i32_1 = arith.constant 0 : i32
    return %c0_i32, %c0_i32_0 : i32, i32
  }
  func.func @transform_3(%arg0: i32) -> (i32, i32) {
    %c0_i32 = arith.constant 0 : i32
    %c0_i32_0 = arith.constant 0 : i32
    return %arg0, %c0_i32 : i32, i32
  }
}

module attributes {stable_mosaic.version = 11 : i64} {
  func.func @_resblock_kernel(%arg0: i32, %arg1: memref<16x384xbf16, #tpu.memory_space<vmem>>, %arg2: memref<384x128xbf16, #tpu.memory_space<vmem>>, %arg3: memref<1x128xf32, #tpu.memory_space<vmem>>, %arg4: memref<128x128xbf16, #tpu.memory_space<vmem>>, %arg5: memref<1x128xf32, #tpu.memory_space<vmem>>, %arg6: memref<16x128xf32, #tpu.memory_space<vmem>>, %arg7: memref<16x128xf32, #tpu.memory_space<vmem>>) attributes {dimension_semantics = [#tpu.dimension_semantics<parallel>], iteration_bounds = array<i64: 1>, scalar_prefetch = 0 : i64, scratch_operands = 0 : i64, tpu.core_type = #tpu.core_type<tc>, window_params = [{transform_indices = @transform_0, window_bounds = array<i64: 16, 384>}, {pipeline_mode = #tpu.pipeline_mode<synchronous>, transform_indices = @transform_1, window_bounds = array<i64: 384, 128>}, {pipeline_mode = #tpu.pipeline_mode<synchronous>, transform_indices = @transform_2, window_bounds = array<i64: 1, 128>}, {pipeline_mode = #tpu.pipeline_mode<synchronous>, transform_indices = @transform_3, window_bounds = array<i64: 128, 128>}, {pipeline_mode = #tpu.pipeline_mode<synchronous>, transform_indices = @transform_4, window_bounds = array<i64: 1, 128>}, {transform_indices = @transform_5, window_bounds = array<i64: 16, 128>}, {transform_indices = @transform_6, window_bounds = array<i64: 16, 128>}]} {
    %c0 = arith.constant 0 : index
    %c0_0 = arith.constant 0 : index
    %0 = vector.load %arg1[%c0, %c0_0] : memref<16x384xbf16, #tpu.memory_space<vmem>>, vector<16x384xbf16>
    %cst = arith.constant 0.000000e+00 : bf16
    %1 = vector.broadcast %cst : bf16 to vector<16x384xbf16>
    %2 = arith.maximumf %0, %1 : vector<16x384xbf16>
    %c0_1 = arith.constant 0 : index
    %c0_2 = arith.constant 0 : index
    %3 = vector.load %arg2[%c0_1, %c0_2] : memref<384x128xbf16, #tpu.memory_space<vmem>>, vector<384x128xbf16>
    %cst_3 = arith.constant dense<0.000000e+00> : vector<16x128xf32>
    %4 = tpu.matmul %2, %3, %cst_3 {dimension_numbers = #tpu.dot_dimension_numbers<[1], [0], [0], [1], [0, 0, 1, 1], [], []>} : vector<16x384xbf16>, vector<384x128xbf16>, vector<16x128xf32> -> vector<16x128xf32>
    %c0_4 = arith.constant 0 : index
    %c0_5 = arith.constant 0 : index
    %5 = vector.load %arg3[%c0_4, %c0_5] : memref<1x128xf32, #tpu.memory_space<vmem>>, vector<1x128xf32>
    %6 = vector.broadcast %5 : vector<1x128xf32> to vector<16x128xf32>
    %7 = arith.addf %4, %6 : vector<16x128xf32>
    %cst_6 = arith.constant 0.000000e+00 : f32
    %8 = vector.broadcast %cst_6 : f32 to vector<16x128xf32>
    %9 = arith.maximumf %7, %8 : vector<16x128xf32>
    %10 = arith.truncf %9 : vector<16x128xf32> to vector<16x128xbf16>
    %c0_7 = arith.constant 0 : index
    %c0_8 = arith.constant 0 : index
    %11 = vector.load %arg4[%c0_7, %c0_8] : memref<128x128xbf16, #tpu.memory_space<vmem>>, vector<128x128xbf16>
    %cst_9 = arith.constant dense<0.000000e+00> : vector<16x128xf32>
    %12 = tpu.matmul %10, %11, %cst_9 {dimension_numbers = #tpu.dot_dimension_numbers<[1], [0], [0], [1], [0, 0, 1, 1], [], []>} : vector<16x128xbf16>, vector<128x128xbf16>, vector<16x128xf32> -> vector<16x128xf32>
    %c0_10 = arith.constant 0 : index
    %c0_11 = arith.constant 0 : index
    %13 = vector.load %arg5[%c0_10, %c0_11] : memref<1x128xf32, #tpu.memory_space<vmem>>, vector<1x128xf32>
    %14 = vector.broadcast %13 : vector<1x128xf32> to vector<16x128xf32>
    %15 = arith.addf %12, %14 : vector<16x128xf32>
    %c0_12 = arith.constant 0 : index
    %c0_13 = arith.constant 0 : index
    %16 = vector.load %arg6[%c0_12, %c0_13] : memref<16x128xf32, #tpu.memory_space<vmem>>, vector<16x128xf32>
    %17 = arith.addf %15, %16 : vector<16x128xf32>
    %c0_14 = arith.constant 0 : index
    %c0_15 = arith.constant 0 : index
    %18 = vector.load %arg7[%c0_14, %c0_15] : memref<16x128xf32, #tpu.memory_space<vmem>>, vector<16x128xf32>
    tpu.vector_store %arg7[%c0_14, %c0_15], %17 {strides = array<i32>} : memref<16x128xf32, #tpu.memory_space<vmem>>, vector<16x128xf32>,
    return
  }
  func.func @transform_0(%arg0: i32) -> (i32, i32) {
    %c0_i32 = arith.constant 0 : i32
    %c0_i32_0 = arith.constant 0 : i32
    return %arg0, %c0_i32 : i32, i32
  }
  func.func @transform_1(%arg0: i32) -> (i32, i32) {
    %c0_i32 = arith.constant 0 : i32
    %c0_i32_0 = arith.constant 0 : i32
    %c0_i32_1 = arith.constant 0 : i32
    return %c0_i32, %c0_i32_0 : i32, i32
  }
  func.func @transform_2(%arg0: i32) -> (i32, i32) {
    %c0_i32 = arith.constant 0 : i32
    %c0_i32_0 = arith.constant 0 : i32
    %c0_i32_1 = arith.constant 0 : i32
    return %c0_i32, %c0_i32_0 : i32, i32
  }
  func.func @transform_3(%arg0: i32) -> (i32, i32) {
    %c0_i32 = arith.constant 0 : i32
    %c0_i32_0 = arith.constant 0 : i32
    %c0_i32_1 = arith.constant 0 : i32
    return %c0_i32, %c0_i32_0 : i32, i32
  }
  func.func @transform_4(%arg0: i32) -> (i32, i32) {
    %c0_i32 = arith.constant 0 : i32
    %c0_i32_0 = arith.constant 0 : i32
    %c0_i32_1 = arith.constant 0 : i32
    return %c0_i32, %c0_i32_0 : i32, i32
  }
  func.func @transform_5(%arg0: i32) -> (i32, i32) {
    %c0_i32 = arith.constant 0 : i32
    %c0_i32_0 = arith.constant 0 : i32
    return %arg0, %c0_i32 : i32, i32
  }
  func.func @transform_6(%arg0: i32) -> (i32, i32) {
    %c0_i32 = arith.constant 0 : i32
    %c0_i32_0 = arith.constant 0 : i32
    return %arg0, %c0_i32 : i32, i32
  }
}

module attributes {stable_mosaic.version = 11 : i64} {
  func.func @_mm_kernel(%arg0: i32, %arg1: memref<8x512xbf16, #tpu.memory_space<vmem>>, %arg2: memref<512x128xbf16, #tpu.memory_space<vmem>>, %arg3: memref<1x128xf32, #tpu.memory_space<vmem>>, %arg4: memref<8x128xf32, #tpu.memory_space<vmem>>) attributes {dimension_semantics = [#tpu.dimension_semantics<parallel>], iteration_bounds = array<i64: 1>, scalar_prefetch = 0 : i64, scratch_operands = 0 : i64, tpu.core_type = #tpu.core_type<tc>, window_params = [{transform_indices = @transform_0, window_bounds = array<i64: 8, 512>}, {pipeline_mode = #tpu.pipeline_mode<synchronous>, transform_indices = @transform_1, window_bounds = array<i64: 512, 128>}, {pipeline_mode = #tpu.pipeline_mode<synchronous>, transform_indices = @transform_2, window_bounds = array<i64: 1, 128>}, {transform_indices = @transform_3, window_bounds = array<i64: 8, 128>}]} {
    %c0 = arith.constant 0 : index
    %c0_0 = arith.constant 0 : index
    %0 = vector.load %arg1[%c0, %c0_0] : memref<8x512xbf16, #tpu.memory_space<vmem>>, vector<8x512xbf16>
    %c0_1 = arith.constant 0 : index
    %c0_2 = arith.constant 0 : index
    %1 = vector.load %arg2[%c0_1, %c0_2] : memref<512x128xbf16, #tpu.memory_space<vmem>>, vector<512x128xbf16>
    %cst = arith.constant dense<0.000000e+00> : vector<8x128xf32>
    %2 = tpu.matmul %0, %1, %cst {dimension_numbers = #tpu.dot_dimension_numbers<[1], [0], [0], [1], [0, 0, 1, 1], [], []>} : vector<8x512xbf16>, vector<512x128xbf16>, vector<8x128xf32> -> vector<8x128xf32>
    %c0_3 = arith.constant 0 : index
    %c0_4 = arith.constant 0 : index
    %3 = vector.load %arg3[%c0_3, %c0_4] : memref<1x128xf32, #tpu.memory_space<vmem>>, vector<1x128xf32>
    %4 = vector.broadcast %3 : vector<1x128xf32> to vector<8x128xf32>
    %5 = arith.addf %2, %4 : vector<8x128xf32>
    %c0_5 = arith.constant 0 : index
    %c0_6 = arith.constant 0 : index
    %6 = vector.load %arg4[%c0_5, %c0_6] : memref<8x128xf32, #tpu.memory_space<vmem>>, vector<8x128xf32>
    tpu.vector_store %arg4[%c0_5, %c0_6], %5 {strides = array<i32>} : memref<8x128xf32, #tpu.memory_space<vmem>>, vector<8x128xf32>,
    return
  }
  func.func @transform_0(%arg0: i32) -> (i32, i32) {
    %c0_i32 = arith.constant 0 : i32
    %c0_i32_0 = arith.constant 0 : i32
    return %arg0, %c0_i32 : i32, i32
  }
  func.func @transform_1(%arg0: i32) -> (i32, i32) {
    %c0_i32 = arith.constant 0 : i32
    %c0_i32_0 = arith.constant 0 : i32
    %c0_i32_1 = arith.constant 0 : i32
    return %c0_i32, %c0_i32_0 : i32, i32
  }
  func.func @transform_2(%arg0: i32) -> (i32, i32) {
    %c0_i32 = arith.constant 0 : i32
    %c0_i32_0 = arith.constant 0 : i32
    %c0_i32_1 = arith.constant 0 : i32
    return %c0_i32, %c0_i32_0 : i32, i32
  }
  func.func @transform_3(%arg0: i32) -> (i32, i32) {
    %c0_i32 = arith.constant 0 : i32
    %c0_i32_0 = arith.constant 0 : i32
    return %arg0, %c0_i32 : i32, i32
  }
}

module attributes {stable_mosaic.version = 11 : i64} {
  func.func @_resblock_kernel(%arg0: i32, %arg1: memref<8x384xbf16, #tpu.memory_space<vmem>>, %arg2: memref<384x128xbf16, #tpu.memory_space<vmem>>, %arg3: memref<1x128xf32, #tpu.memory_space<vmem>>, %arg4: memref<128x128xbf16, #tpu.memory_space<vmem>>, %arg5: memref<1x128xf32, #tpu.memory_space<vmem>>, %arg6: memref<8x128xf32, #tpu.memory_space<vmem>>, %arg7: memref<8x128xf32, #tpu.memory_space<vmem>>) attributes {dimension_semantics = [#tpu.dimension_semantics<parallel>], iteration_bounds = array<i64: 1>, scalar_prefetch = 0 : i64, scratch_operands = 0 : i64, tpu.core_type = #tpu.core_type<tc>, window_params = [{transform_indices = @transform_0, window_bounds = array<i64: 8, 384>}, {pipeline_mode = #tpu.pipeline_mode<synchronous>, transform_indices = @transform_1, window_bounds = array<i64: 384, 128>}, {pipeline_mode = #tpu.pipeline_mode<synchronous>, transform_indices = @transform_2, window_bounds = array<i64: 1, 128>}, {pipeline_mode = #tpu.pipeline_mode<synchronous>, transform_indices = @transform_3, window_bounds = array<i64: 128, 128>}, {pipeline_mode = #tpu.pipeline_mode<synchronous>, transform_indices = @transform_4, window_bounds = array<i64: 1, 128>}, {transform_indices = @transform_5, window_bounds = array<i64: 8, 128>}, {transform_indices = @transform_6, window_bounds = array<i64: 8, 128>}]} {
    %c0 = arith.constant 0 : index
    %c0_0 = arith.constant 0 : index
    %0 = vector.load %arg1[%c0, %c0_0] : memref<8x384xbf16, #tpu.memory_space<vmem>>, vector<8x384xbf16>
    %cst = arith.constant 0.000000e+00 : bf16
    %1 = vector.broadcast %cst : bf16 to vector<8x384xbf16>
    %2 = arith.maximumf %0, %1 : vector<8x384xbf16>
    %c0_1 = arith.constant 0 : index
    %c0_2 = arith.constant 0 : index
    %3 = vector.load %arg2[%c0_1, %c0_2] : memref<384x128xbf16, #tpu.memory_space<vmem>>, vector<384x128xbf16>
    %cst_3 = arith.constant dense<0.000000e+00> : vector<8x128xf32>
    %4 = tpu.matmul %2, %3, %cst_3 {dimension_numbers = #tpu.dot_dimension_numbers<[1], [0], [0], [1], [0, 0, 1, 1], [], []>} : vector<8x384xbf16>, vector<384x128xbf16>, vector<8x128xf32> -> vector<8x128xf32>
    %c0_4 = arith.constant 0 : index
    %c0_5 = arith.constant 0 : index
    %5 = vector.load %arg3[%c0_4, %c0_5] : memref<1x128xf32, #tpu.memory_space<vmem>>, vector<1x128xf32>
    %6 = vector.broadcast %5 : vector<1x128xf32> to vector<8x128xf32>
    %7 = arith.addf %4, %6 : vector<8x128xf32>
    %cst_6 = arith.constant 0.000000e+00 : f32
    %8 = vector.broadcast %cst_6 : f32 to vector<8x128xf32>
    %9 = arith.maximumf %7, %8 : vector<8x128xf32>
    %10 = arith.truncf %9 : vector<8x128xf32> to vector<8x128xbf16>
    %c0_7 = arith.constant 0 : index
    %c0_8 = arith.constant 0 : index
    %11 = vector.load %arg4[%c0_7, %c0_8] : memref<128x128xbf16, #tpu.memory_space<vmem>>, vector<128x128xbf16>
    %cst_9 = arith.constant dense<0.000000e+00> : vector<8x128xf32>
    %12 = tpu.matmul %10, %11, %cst_9 {dimension_numbers = #tpu.dot_dimension_numbers<[1], [0], [0], [1], [0, 0, 1, 1], [], []>} : vector<8x128xbf16>, vector<128x128xbf16>, vector<8x128xf32> -> vector<8x128xf32>
    %c0_10 = arith.constant 0 : index
    %c0_11 = arith.constant 0 : index
    %13 = vector.load %arg5[%c0_10, %c0_11] : memref<1x128xf32, #tpu.memory_space<vmem>>, vector<1x128xf32>
    %14 = vector.broadcast %13 : vector<1x128xf32> to vector<8x128xf32>
    %15 = arith.addf %12, %14 : vector<8x128xf32>
    %c0_12 = arith.constant 0 : index
    %c0_13 = arith.constant 0 : index
    %16 = vector.load %arg6[%c0_12, %c0_13] : memref<8x128xf32, #tpu.memory_space<vmem>>, vector<8x128xf32>
    %17 = arith.addf %15, %16 : vector<8x128xf32>
    %c0_14 = arith.constant 0 : index
    %c0_15 = arith.constant 0 : index
    %18 = vector.load %arg7[%c0_14, %c0_15] : memref<8x128xf32, #tpu.memory_space<vmem>>, vector<8x128xf32>
    tpu.vector_store %arg7[%c0_14, %c0_15], %17 {strides = array<i32>} : memref<8x128xf32, #tpu.memory_space<vmem>>, vector<8x128xf32>,
    return
  }
  func.func @transform_0(%arg0: i32) -> (i32, i32) {
    %c0_i32 = arith.constant 0 : i32
    %c0_i32_0 = arith.constant 0 : i32
    return %arg0, %c0_i32 : i32, i32
  }
  func.func @transform_1(%arg0: i32) -> (i32, i32) {
    %c0_i32 = arith.constant 0 : i32
    %c0_i32_0 = arith.constant 0 : i32
    %c0_i32_1 = arith.constant 0 : i32
    return %c0_i32, %c0_i32_0 : i32, i32
  }
  func.func @transform_2(%arg0: i32) -> (i32, i32) {
    %c0_i32 = arith.constant 0 : i32
    %c0_i32_0 = arith.constant 0 : i32
    %c0_i32_1 = arith.constant 0 : i32
    return %c0_i32, %c0_i32_0 : i32, i32
  }
  func.func @transform_3(%arg0: i32) -> (i32, i32) {
    %c0_i32 = arith.constant 0 : i32
    %c0_i32_0 = arith.constant 0 : i32
    %c0_i32_1 = arith.constant 0 : i32
    return %c0_i32, %c0_i32_0 : i32, i32
  }
  func.func @transform_4(%arg0: i32) -> (i32, i32) {
    %c0_i32 = arith.constant 0 : i32
    %c0_i32_0 = arith.constant 0 : i32
    %c0_i32_1 = arith.constant 0 : i32
    return %c0_i32, %c0_i32_0 : i32, i32
  }
  func.func @transform_5(%arg0: i32) -> (i32, i32) {
    %c0_i32 = arith.constant 0 : i32
    %c0_i32_0 = arith.constant 0 : i32
    return %arg0, %c0_i32 : i32, i32
  }
  func.func @transform_6(%arg0: i32) -> (i32, i32) {
    %c0_i32 = arith.constant 0 : i32
    %c0_i32_0 = arith.constant 0 : i32
    return %arg0, %c0_i32 : i32, i32
  }
}

module attributes {stable_mosaic.version = 11 : i64} {
  func.func @_mm_kernel(%arg0: i32, %arg1: memref<8x384xbf16, #tpu.memory_space<vmem>>, %arg2: memref<384x128xbf16, #tpu.memory_space<vmem>>, %arg3: memref<1x128xf32, #tpu.memory_space<vmem>>, %arg4: memref<8x128xf32, #tpu.memory_space<vmem>>) attributes {dimension_semantics = [#tpu.dimension_semantics<parallel>], iteration_bounds = array<i64: 1>, scalar_prefetch = 0 : i64, scratch_operands = 0 : i64, tpu.core_type = #tpu.core_type<tc>, window_params = [{transform_indices = @transform_0, window_bounds = array<i64: 8, 384>}, {pipeline_mode = #tpu.pipeline_mode<synchronous>, transform_indices = @transform_1, window_bounds = array<i64: 384, 128>}, {pipeline_mode = #tpu.pipeline_mode<synchronous>, transform_indices = @transform_2, window_bounds = array<i64: 1, 128>}, {transform_indices = @transform_3, window_bounds = array<i64: 8, 128>}]} {
    %c0 = arith.constant 0 : index
    %c0_0 = arith.constant 0 : index
    %0 = vector.load %arg1[%c0, %c0_0] : memref<8x384xbf16, #tpu.memory_space<vmem>>, vector<8x384xbf16>
    %c0_1 = arith.constant 0 : index
    %c0_2 = arith.constant 0 : index
    %1 = vector.load %arg2[%c0_1, %c0_2] : memref<384x128xbf16, #tpu.memory_space<vmem>>, vector<384x128xbf16>
    %cst = arith.constant dense<0.000000e+00> : vector<8x128xf32>
    %2 = tpu.matmul %0, %1, %cst {dimension_numbers = #tpu.dot_dimension_numbers<[1], [0], [0], [1], [0, 0, 1, 1], [], []>} : vector<8x384xbf16>, vector<384x128xbf16>, vector<8x128xf32> -> vector<8x128xf32>
    %c0_3 = arith.constant 0 : index
    %c0_4 = arith.constant 0 : index
    %3 = vector.load %arg3[%c0_3, %c0_4] : memref<1x128xf32, #tpu.memory_space<vmem>>, vector<1x128xf32>
    %4 = vector.broadcast %3 : vector<1x128xf32> to vector<8x128xf32>
    %5 = arith.addf %2, %4 : vector<8x128xf32>
    %c0_5 = arith.constant 0 : index
    %c0_6 = arith.constant 0 : index
    %6 = vector.load %arg4[%c0_5, %c0_6] : memref<8x128xf32, #tpu.memory_space<vmem>>, vector<8x128xf32>
    tpu.vector_store %arg4[%c0_5, %c0_6], %5 {strides = array<i32>} : memref<8x128xf32, #tpu.memory_space<vmem>>, vector<8x128xf32>,
    return
  }
  func.func @transform_0(%arg0: i32) -> (i32, i32) {
    %c0_i32 = arith.constant 0 : i32
    %c0_i32_0 = arith.constant 0 : i32
    return %arg0, %c0_i32 : i32, i32
  }
  func.func @transform_1(%arg0: i32) -> (i32, i32) {
    %c0_i32 = arith.constant 0 : i32
    %c0_i32_0 = arith.constant 0 : i32
    %c0_i32_1 = arith.constant 0 : i32
    return %c0_i32, %c0_i32_0 : i32, i32
  }
  func.func @transform_2(%arg0: i32) -> (i32, i32) {
    %c0_i32 = arith.constant 0 : i32
    %c0_i32_0 = arith.constant 0 : i32
    %c0_i32_1 = arith.constant 0 : i32
    return %c0_i32, %c0_i32_0 : i32, i32
  }
  func.func @transform_3(%arg0: i32) -> (i32, i32) {
    %c0_i32 = arith.constant 0 : i32
    %c0_i32_0 = arith.constant 0 : i32
    return %arg0, %c0_i32 : i32, i32
  }
}

module attributes {stable_mosaic.version = 11 : i64} {
  func.func @_vq_kernel(%arg0: i32, %arg1: memref<8x128xf32, #tpu.memory_space<vmem>>, %arg2: memref<128x128xf32, #tpu.memory_space<vmem>>, %arg3: memref<1x128xf32, #tpu.memory_space<vmem>>, %arg4: memref<8x128xf32, #tpu.memory_space<vmem>>, %arg5: memref<1x1xf32, #tpu.memory_space<vmem>>, %arg6: memref<1x1xf32, #tpu.memory_space<vmem>>, %arg7: memref<1x128xf32, #tpu.memory_space<vmem>>, %arg8: memref<1x1xf32, #tpu.memory_space<vmem>>) attributes {dimension_semantics = [#tpu.dimension_semantics<arbitrary>], iteration_bounds = array<i64: 1>, scalar_prefetch = 0 : i64, scratch_operands = 2 : i64, tpu.core_type = #tpu.core_type<tc>, window_params = [{transform_indices = @transform_0, window_bounds = array<i64: 8, 128>}, {pipeline_mode = #tpu.pipeline_mode<synchronous>, transform_indices = @transform_1, window_bounds = array<i64: 128, 128>}, {pipeline_mode = #tpu.pipeline_mode<synchronous>, transform_indices = @transform_2, window_bounds = array<i64: 1, 128>}, {transform_indices = @transform_3, window_bounds = array<i64: 8, 128>}, {pipeline_mode = #tpu.pipeline_mode<synchronous>, transform_indices = @transform_4, window_bounds = array<i64: 1, 1>}, {pipeline_mode = #tpu.pipeline_mode<synchronous>, transform_indices = @transform_5, window_bounds = array<i64: 1, 1>}]} {
    %c0_i32 = arith.constant 0 : i32
    %0 = arith.cmpi eq, %arg0, %c0_i32 : i32
    %1 = arith.extui %0 : i1 to i32
    %c0_i32_0 = arith.constant 0 : i32
    %2 = arith.cmpi ne, %1, %c0_i32_0 : i32
    scf.if %2 {
      %cst_29 = arith.constant 0.000000e+00 : f32
      %63 = vector.broadcast %cst_29 : f32 to vector<1x128xf32>
      %c0_30 = arith.constant 0 : index
      %c0_31 = arith.constant 0 : index
      %64 = vector.load %arg7[%c0_30, %c0_31] : memref<1x128xf32, #tpu.memory_space<vmem>>, vector<1x128xf32>
      tpu.vector_store %arg7[%c0_30, %c0_31], %63 {strides = array<i32>} : memref<1x128xf32, #tpu.memory_space<vmem>>, vector<1x128xf32>,
      %cst_32 = arith.constant 0.000000e+00 : f32
      %65 = vector.broadcast %cst_32 : f32 to vector<1x1xf32>
      %c0_33 = arith.constant 0 : index
      %c0_34 = arith.constant 0 : index
      %66 = vector.load %arg8[%c0_33, %c0_34] : memref<1x1xf32, #tpu.memory_space<vmem>>, vector<1x1xf32>
      tpu.vector_store %arg8[%c0_33, %c0_34], %65 {strides = array<i32>} : memref<1x1xf32, #tpu.memory_space<vmem>>, vector<1x1xf32>,
    } else {
    }
    %c0 = arith.constant 0 : index
    %c0_1 = arith.constant 0 : index
    %3 = vector.load %arg1[%c0, %c0_1] : memref<8x128xf32, #tpu.memory_space<vmem>>, vector<8x128xf32>
    %c0_2 = arith.constant 0 : index
    %c0_3 = arith.constant 0 : index
    %4 = vector.load %arg2[%c0_2, %c0_3] : memref<128x128xf32, #tpu.memory_space<vmem>>, vector<128x128xf32>
    %5 = arith.mulf %3, %3 : vector<8x128xf32>
    %cst = arith.constant dense<0.000000e+00> : vector<8xf32>
    %6 = vector.multi_reduction <add>, %5, %cst [1] : vector<8x128xf32> to vector<8xf32>
    %7 = vector.shape_cast %6 : vector<8xf32> to vector<8x1xf32>
    %cst_4 = arith.constant dense<0.000000e+00> : vector<8x128xf32>
    %8 = tpu.matmul %3, %4, %cst_4 {dimension_numbers = #tpu.dot_dimension_numbers<[1], [1], [0], [0], [0, 0, 1, 0], [], []>} : vector<8x128xf32>, vector<128x128xf32>, vector<8x128xf32> -> vector<8x128xf32>
    %c0_5 = arith.constant 0 : index
    %c0_6 = arith.constant 0 : index
    %9 = vector.load %arg3[%c0_5, %c0_6] : memref<1x128xf32, #tpu.memory_space<vmem>>, vector<1x128xf32>
    %10 = vector.broadcast %7 : vector<8x1xf32> to vector<8x128xf32>
    %11 = vector.broadcast %9 : vector<1x128xf32> to vector<8x128xf32>
    %12 = arith.addf %10, %11 : vector<8x128xf32>
    %cst_7 = arith.constant 2.000000e+00 : f32
    %13 = vector.broadcast %cst_7 : f32 to vector<8x128xf32>
    %14 = arith.mulf %13, %8 : vector<8x128xf32>
    %15 = arith.subf %12, %14 : vector<8x128xf32>
    %16 = tpu.iota {dimensions = array<i32: 1>} : vector<8x128xi32>
    %c128_i32 = arith.constant 128 : i32
    %17 = vector.broadcast %c128_i32 : i32 to vector<8x128xi32>
    %18 = arith.cmpi slt, %16, %17 : vector<8x128xi32>
    %cst_8 = arith.constant 0x7F800000 : f32
    %19 = vector.broadcast %cst_8 : f32 to vector<8x128xf32>
    %20 = arith.select %18, %15, %19 : vector<8x128xi1>, vector<8x128xf32>
    %cst_9 = arith.constant dense<0x7F800000> : vector<8xf32>
    %21 = vector.multi_reduction <minimumf>, %20, %cst_9 [1] : vector<8x128xf32> to vector<8xf32>
    %22 = vector.shape_cast %21 : vector<8xf32> to vector<8x1xf32>
    %23 = vector.broadcast %22 : vector<8x1xf32> to vector<8x128xf32>
    %24 = arith.cmpf oeq, %20, %23 : vector<8x128xf32>
    %c128_i32_10 = arith.constant 128 : i32
    %25 = vector.broadcast %c128_i32_10 : i32 to vector<8x128xi32>
    %26 = arith.select %24, %16, %25 : vector<8x128xi1>, vector<8x128xi32>
    %cst_11 = arith.constant dense<2147483647> : vector<8xi32>
    %27 = vector.multi_reduction <minsi>, %26, %cst_11 [1] : vector<8x128xi32> to vector<8xi32>
    %28 = vector.shape_cast %27 : vector<8xi32> to vector<8x1xi32>
    %29 = vector.broadcast %28 : vector<8x1xi32> to vector<8x128xi32>
    %30 = arith.cmpi eq, %16, %29 : vector<8x128xi32>
    %31 = arith.extui %30 : vector<8x128xi1> to vector<8x128xi32>
    %32 = arith.sitofp %31 : vector<8x128xi32> to vector<8x128xf32>
    %cst_12 = arith.constant dense<0.000000e+00> : vector<8x128xf32>
    %33 = tpu.matmul %32, %4, %cst_12 {dimension_numbers = #tpu.dot_dimension_numbers<[1], [0], [0], [1], [0, 0, 1, 1], [], []>} : vector<8x128xf32>, vector<128x128xf32>, vector<8x128xf32> -> vector<8x128xf32>
    %c0_13 = arith.constant 0 : index
    %c0_14 = arith.constant 0 : index
    %34 = vector.load %arg4[%c0_13, %c0_14] : memref<8x128xf32, #tpu.memory_space<vmem>>, vector<8x128xf32>
    tpu.vector_store %arg4[%c0_13, %c0_14], %33 {strides = array<i32>} : memref<8x128xf32, #tpu.memory_space<vmem>>, vector<8x128xf32>,
    %35 = tpu.iota {dimensions = array<i32: 0>} : vector<8x1xi32>
    %c8_i32 = arith.constant 8 : i32
    %36 = arith.muli %arg0, %c8_i32 : i32
    %37 = vector.broadcast %36 : i32 to vector<8x1xi32>
    %38 = arith.addi %35, %37 : vector<8x1xi32>
    %c8_i32_15 = arith.constant 8 : i32
    %39 = vector.broadcast %c8_i32_15 : i32 to vector<8x1xi32>
    %40 = arith.cmpi slt, %38, %39 : vector<8x1xi32>
    %41 = arith.extui %40 : vector<8x1xi1> to vector<8x1xi32>
    %42 = arith.sitofp %41 : vector<8x1xi32> to vector<8x1xf32>
    %43 = arith.subf %33, %3 : vector<8x128xf32>
    %c0_16 = arith.constant 0 : index
    %c0_17 = arith.constant 0 : index
    %44 = vector.load %arg8[%c0_16, %c0_17] : memref<1x1xf32, #tpu.memory_space<vmem>>, vector<1x1xf32>
    %45 = arith.mulf %43, %43 : vector<8x128xf32>
    %cst_18 = arith.constant dense<0.000000e+00> : vector<8xf32>
    %46 = vector.multi_reduction <add>, %45, %cst_18 [1] : vector<8x128xf32> to vector<8xf32>
    %47 = vector.shape_cast %46 : vector<8xf32> to vector<8x1xf32>
    %48 = arith.mulf %47, %42 : vector<8x1xf32>
    %cst_19 = arith.constant dense<0.000000e+00> : vector<1xf32>
    %49 = vector.multi_reduction <add>, %48, %cst_19 [0] : vector<8x1xf32> to vector<1xf32>
    %50 = vector.shape_cast %49 : vector<1xf32> to vector<1x1xf32>
    %51 = arith.addf %44, %50 : vector<1x1xf32>
    %c0_20 = arith.constant 0 : index
    %c0_21 = arith.constant 0 : index
    %52 = vector.load %arg8[%c0_20, %c0_21] : memref<1x1xf32, #tpu.memory_space<vmem>>, vector<1x1xf32>
    tpu.vector_store %arg8[%c0_20, %c0_21], %51 {strides = array<i32>} : memref<1x1xf32, #tpu.memory_space<vmem>>, vector<1x1xf32>,
    %c0_22 = arith.constant 0 : index
    %c0_23 = arith.constant 0 : index
    %53 = vector.load %arg7[%c0_22, %c0_23] : memref<1x128xf32, #tpu.memory_space<vmem>>, vector<1x128xf32>
    %54 = vector.broadcast %42 : vector<8x1xf32> to vector<8x128xf32>
    %55 = arith.mulf %32, %54 : vector<8x128xf32>
    %cst_24 = arith.constant dense<0.000000e+00> : vector<128xf32>
    %56 = vector.multi_reduction <add>, %55, %cst_24 [0] : vector<8x128xf32> to vector<128xf32>
    %57 = vector.shape_cast %56 : vector<128xf32> to vector<1x128xf32>
    %58 = arith.addf %53, %57 : vector<1x128xf32>
    %c0_25 = arith.constant 0 : index
    %c0_26 = arith.constant 0 : index
    %59 = vector.load %arg7[%c0_25, %c0_26] : memref<1x128xf32, #tpu.memory_space<vmem>>, vector<1x128xf32>
    tpu.vector_store %arg7[%c0_25, %c0_26], %58 {strides = array<i32>} : memref<1x128xf32, #tpu.memory_space<vmem>>, vector<1x128xf32>,
    %c0_i32_27 = arith.constant 0 : i32
    %60 = arith.cmpi eq, %arg0, %c0_i32_27 : i32
    %61 = arith.extui %60 : i1 to i32
    %c0_i32_28 = arith.constant 0 : i32
    %62 = arith.cmpi ne, %61, %c0_i32_28 : i32
    scf.if %62 {
      %c0_29 = arith.constant 0 : index
      %c0_30 = arith.constant 0 : index
      %63 = vector.load %arg8[%c0_29, %c0_30] : memref<1x1xf32, #tpu.memory_space<vmem>>, vector<1x1xf32>
      %cst_31 = arith.constant 1.024000e+03 : f32
      %64 = vector.broadcast %cst_31 : f32 to vector<1x1xf32>
      %65 = arith.divf %63, %64 : vector<1x1xf32>
      %cst_32 = arith.constant 2.000000e+00 : f32
      %66 = vector.broadcast %cst_32 : f32 to vector<1x1xf32>
      %67 = arith.mulf %66, %65 : vector<1x1xf32>
      %c0_33 = arith.constant 0 : index
      %c0_34 = arith.constant 0 : index
      %68 = vector.load %arg5[%c0_33, %c0_34] : memref<1x1xf32, #tpu.memory_space<vmem>>, vector<1x1xf32>
      tpu.vector_store %arg5[%c0_33, %c0_34], %67 {strides = array<i32>} : memref<1x1xf32, #tpu.memory_space<vmem>>, vector<1x1xf32>,
      %c0_35 = arith.constant 0 : index
      %c0_36 = arith.constant 0 : index
      %69 = vector.load %arg7[%c0_35, %c0_36] : memref<1x128xf32, #tpu.memory_space<vmem>>, vector<1x128xf32>
      %cst_37 = arith.constant 8.000000e+00 : f32
      %70 = vector.broadcast %cst_37 : f32 to vector<1x128xf32>
      %71 = arith.divf %69, %70 : vector<1x128xf32>
      %cst_38 = arith.constant 1.000000e-10 : f32
      %72 = vector.broadcast %cst_38 : f32 to vector<1x128xf32>
      %73 = arith.addf %71, %72 : vector<1x128xf32>
      %74 = math.log %73 : vector<1x128xf32>
      %75 = arith.mulf %71, %74 : vector<1x128xf32>
      %cst_39 = arith.constant dense<0.000000e+00> : vector<1xf32>
      %76 = vector.multi_reduction <add>, %75, %cst_39 [1] : vector<1x128xf32> to vector<1xf32>
      %77 = vector.shape_cast %76 : vector<1xf32> to vector<1x1xf32>
      %cst_40 = arith.constant 0.000000e+00 : f32
      %78 = vector.broadcast %cst_40 : f32 to vector<1x1xf32>
      %79 = arith.subf %78, %77 : vector<1x1xf32>
      %80 = math.exp %79 : vector<1x1xf32>
      %c0_41 = arith.constant 0 : index
      %c0_42 = arith.constant 0 : index
      %81 = vector.load %arg6[%c0_41, %c0_42] : memref<1x1xf32, #tpu.memory_space<vmem>>, vector<1x1xf32>
      tpu.vector_store %arg6[%c0_41, %c0_42], %80 {strides = array<i32>} : memref<1x1xf32, #tpu.memory_space<vmem>>, vector<1x1xf32>,
    } else {
    }
    return
  }
  func.func @transform_0(%arg0: i32) -> (i32, i32) {
    %c0_i32 = arith.constant 0 : i32
    %c0_i32_0 = arith.constant 0 : i32
    return %arg0, %c0_i32 : i32, i32
  }
  func.func @transform_1(%arg0: i32) -> (i32, i32) {
    %c0_i32 = arith.constant 0 : i32
    %c0_i32_0 = arith.constant 0 : i32
    %c0_i32_1 = arith.constant 0 : i32
    return %c0_i32, %c0_i32_0 : i32, i32
  }
  func.func @transform_2(%arg0: i32) -> (i32, i32) {
    %c0_i32 = arith.constant 0 : i32
    %c0_i32_0 = arith.constant 0 : i32
    %c0_i32_1 = arith.constant 0 : i32
    return %c0_i32, %c0_i32_0 : i32, i32
  }
  func.func @transform_3(%arg0: i32) -> (i32, i32) {
    %c0_i32 = arith.constant 0 : i32
    %c0_i32_0 = arith.constant 0 : i32
    return %arg0, %c0_i32 : i32, i32
  }
  func.func @transform_4(%arg0: i32) -> (i32, i32) {
    %c0_i32 = arith.constant 0 : i32
    %c0_i32_0 = arith.constant 0 : i32
    %c0_i32_1 = arith.constant 0 : i32
    return %c0_i32, %c0_i32_0 : i32, i32
  }
  func.func @transform_5(%arg0: i32) -> (i32, i32) {
    %c0_i32 = arith.constant 0 : i32
    %c0_i32_0 = arith.constant 0 : i32
    %c0_i32_1 = arith.constant 0 : i32
    return %c0_i32, %c0_i32_0 : i32, i32
  }
}

module attributes {stable_mosaic.version = 11 : i64} {
  func.func @_mm_kernel(%arg0: i32, %arg1: memref<8x384xbf16, #tpu.memory_space<vmem>>, %arg2: memref<384x128xbf16, #tpu.memory_space<vmem>>, %arg3: memref<1x128xf32, #tpu.memory_space<vmem>>, %arg4: memref<8x128xf32, #tpu.memory_space<vmem>>) attributes {dimension_semantics = [#tpu.dimension_semantics<parallel>], iteration_bounds = array<i64: 1>, scalar_prefetch = 0 : i64, scratch_operands = 0 : i64, tpu.core_type = #tpu.core_type<tc>, window_params = [{transform_indices = @transform_0, window_bounds = array<i64: 8, 384>}, {pipeline_mode = #tpu.pipeline_mode<synchronous>, transform_indices = @transform_1, window_bounds = array<i64: 384, 128>}, {pipeline_mode = #tpu.pipeline_mode<synchronous>, transform_indices = @transform_2, window_bounds = array<i64: 1, 128>}, {transform_indices = @transform_3, window_bounds = array<i64: 8, 128>}]} {
    %c0 = arith.constant 0 : index
    %c0_0 = arith.constant 0 : index
    %0 = vector.load %arg1[%c0, %c0_0] : memref<8x384xbf16, #tpu.memory_space<vmem>>, vector<8x384xbf16>
    %c0_1 = arith.constant 0 : index
    %c0_2 = arith.constant 0 : index
    %1 = vector.load %arg2[%c0_1, %c0_2] : memref<384x128xbf16, #tpu.memory_space<vmem>>, vector<384x128xbf16>
    %cst = arith.constant dense<0.000000e+00> : vector<8x128xf32>
    %2 = tpu.matmul %0, %1, %cst {dimension_numbers = #tpu.dot_dimension_numbers<[1], [0], [0], [1], [0, 0, 1, 1], [], []>} : vector<8x384xbf16>, vector<384x128xbf16>, vector<8x128xf32> -> vector<8x128xf32>
    %c0_3 = arith.constant 0 : index
    %c0_4 = arith.constant 0 : index
    %3 = vector.load %arg3[%c0_3, %c0_4] : memref<1x128xf32, #tpu.memory_space<vmem>>, vector<1x128xf32>
    %4 = vector.broadcast %3 : vector<1x128xf32> to vector<8x128xf32>
    %5 = arith.addf %2, %4 : vector<8x128xf32>
    %cst_5 = arith.constant 0.000000e+00 : f32
    %6 = vector.broadcast %cst_5 : f32 to vector<8x128xf32>
    %7 = arith.maximumf %5, %6 : vector<8x128xf32>
    %c0_6 = arith.constant 0 : index
    %c0_7 = arith.constant 0 : index
    %8 = vector.load %arg4[%c0_6, %c0_7] : memref<8x128xf32, #tpu.memory_space<vmem>>, vector<8x128xf32>
    tpu.vector_store %arg4[%c0_6, %c0_7], %7 {strides = array<i32>} : memref<8x128xf32, #tpu.memory_space<vmem>>, vector<8x128xf32>,
    return
  }
  func.func @transform_0(%arg0: i32) -> (i32, i32) {
    %c0_i32 = arith.constant 0 : i32
    %c0_i32_0 = arith.constant 0 : i32
    return %arg0, %c0_i32 : i32, i32
  }
  func.func @transform_1(%arg0: i32) -> (i32, i32) {
    %c0_i32 = arith.constant 0 : i32
    %c0_i32_0 = arith.constant 0 : i32
    %c0_i32_1 = arith.constant 0 : i32
    return %c0_i32, %c0_i32_0 : i32, i32
  }
  func.func @transform_2(%arg0: i32) -> (i32, i32) {
    %c0_i32 = arith.constant 0 : i32
    %c0_i32_0 = arith.constant 0 : i32
    %c0_i32_1 = arith.constant 0 : i32
    return %c0_i32, %c0_i32_0 : i32, i32
  }
  func.func @transform_3(%arg0: i32) -> (i32, i32) {
    %c0_i32 = arith.constant 0 : i32
    %c0_i32_0 = arith.constant 0 : i32
    return %arg0, %c0_i32 : i32, i32
  }
}

module attributes {stable_mosaic.version = 11 : i64} {
  func.func @_mm_kernel(%arg0: i32, %arg1: memref<16x384xbf16, #tpu.memory_space<vmem>>, %arg2: memref<384x128xbf16, #tpu.memory_space<vmem>>, %arg3: memref<1x128xf32, #tpu.memory_space<vmem>>, %arg4: memref<16x128xf32, #tpu.memory_space<vmem>>) attributes {dimension_semantics = [#tpu.dimension_semantics<parallel>], iteration_bounds = array<i64: 1>, scalar_prefetch = 0 : i64, scratch_operands = 0 : i64, tpu.core_type = #tpu.core_type<tc>, window_params = [{transform_indices = @transform_0, window_bounds = array<i64: 16, 384>}, {pipeline_mode = #tpu.pipeline_mode<synchronous>, transform_indices = @transform_1, window_bounds = array<i64: 384, 128>}, {pipeline_mode = #tpu.pipeline_mode<synchronous>, transform_indices = @transform_2, window_bounds = array<i64: 1, 128>}, {transform_indices = @transform_3, window_bounds = array<i64: 16, 128>}]} {
    %c0 = arith.constant 0 : index
    %c0_0 = arith.constant 0 : index
    %0 = vector.load %arg1[%c0, %c0_0] : memref<16x384xbf16, #tpu.memory_space<vmem>>, vector<16x384xbf16>
    %c0_1 = arith.constant 0 : index
    %c0_2 = arith.constant 0 : index
    %1 = vector.load %arg2[%c0_1, %c0_2] : memref<384x128xbf16, #tpu.memory_space<vmem>>, vector<384x128xbf16>
    %cst = arith.constant dense<0.000000e+00> : vector<16x128xf32>
    %2 = tpu.matmul %0, %1, %cst {dimension_numbers = #tpu.dot_dimension_numbers<[1], [0], [0], [1], [0, 0, 1, 1], [], []>} : vector<16x384xbf16>, vector<384x128xbf16>, vector<16x128xf32> -> vector<16x128xf32>
    %c0_3 = arith.constant 0 : index
    %c0_4 = arith.constant 0 : index
    %3 = vector.load %arg3[%c0_3, %c0_4] : memref<1x128xf32, #tpu.memory_space<vmem>>, vector<1x128xf32>
    %4 = vector.broadcast %3 : vector<1x128xf32> to vector<16x128xf32>
    %5 = arith.addf %2, %4 : vector<16x128xf32>
    %c0_5 = arith.constant 0 : index
    %c0_6 = arith.constant 0 : index
    %6 = vector.load %arg4[%c0_5, %c0_6] : memref<16x128xf32, #tpu.memory_space<vmem>>, vector<16x128xf32>
    tpu.vector_store %arg4[%c0_5, %c0_6], %5 {strides = array<i32>} : memref<16x128xf32, #tpu.memory_space<vmem>>, vector<16x128xf32>,
    return
  }
  func.func @transform_0(%arg0: i32) -> (i32, i32) {
    %c0_i32 = arith.constant 0 : i32
    %c0_i32_0 = arith.constant 0 : i32
    return %arg0, %c0_i32 : i32, i32
  }
  func.func @transform_1(%arg0: i32) -> (i32, i32) {
    %c0_i32 = arith.constant 0 : i32
    %c0_i32_0 = arith.constant 0 : i32
    %c0_i32_1 = arith.constant 0 : i32
    return %c0_i32, %c0_i32_0 : i32, i32
  }
  func.func @transform_2(%arg0: i32) -> (i32, i32) {
    %c0_i32 = arith.constant 0 : i32
    %c0_i32_0 = arith.constant 0 : i32
    %c0_i32_1 = arith.constant 0 : i32
    return %c0_i32, %c0_i32_0 : i32, i32
  }
  func.func @transform_3(%arg0: i32) -> (i32, i32) {
    %c0_i32 = arith.constant 0 : i32
    %c0_i32_0 = arith.constant 0 : i32
    return %arg0, %c0_i32 : i32, i32
  }
}

module attributes {stable_mosaic.version = 11 : i64} {
  func.func @_mm_kernel(%arg0: i32, %arg1: memref<32x384xbf16, #tpu.memory_space<vmem>>, %arg2: memref<384x128xbf16, #tpu.memory_space<vmem>>, %arg3: memref<1x128xf32, #tpu.memory_space<vmem>>, %arg4: memref<32x128xf32, #tpu.memory_space<vmem>>) attributes {dimension_semantics = [#tpu.dimension_semantics<parallel>], iteration_bounds = array<i64: 1>, scalar_prefetch = 0 : i64, scratch_operands = 0 : i64, tpu.core_type = #tpu.core_type<tc>, window_params = [{transform_indices = @transform_0, window_bounds = array<i64: 32, 384>}, {pipeline_mode = #tpu.pipeline_mode<synchronous>, transform_indices = @transform_1, window_bounds = array<i64: 384, 128>}, {pipeline_mode = #tpu.pipeline_mode<synchronous>, transform_indices = @transform_2, window_bounds = array<i64: 1, 128>}, {transform_indices = @transform_3, window_bounds = array<i64: 32, 128>}]} {
    %c0 = arith.constant 0 : index
    %c0_0 = arith.constant 0 : index
    %0 = vector.load %arg1[%c0, %c0_0] : memref<32x384xbf16, #tpu.memory_space<vmem>>, vector<32x384xbf16>
    %c0_1 = arith.constant 0 : index
    %c0_2 = arith.constant 0 : index
    %1 = vector.load %arg2[%c0_1, %c0_2] : memref<384x128xbf16, #tpu.memory_space<vmem>>, vector<384x128xbf16>
    %cst = arith.constant dense<0.000000e+00> : vector<32x128xf32>
    %2 = tpu.matmul %0, %1, %cst {dimension_numbers = #tpu.dot_dimension_numbers<[1], [0], [0], [1], [0, 0, 1, 1], [], []>} : vector<32x384xbf16>, vector<384x128xbf16>, vector<32x128xf32> -> vector<32x128xf32>
    %c0_3 = arith.constant 0 : index
    %c0_4 = arith.constant 0 : index
    %3 = vector.load %arg3[%c0_3, %c0_4] : memref<1x128xf32, #tpu.memory_space<vmem>>, vector<1x128xf32>
    %4 = vector.broadcast %3 : vector<1x128xf32> to vector<32x128xf32>
    %5 = arith.addf %2, %4 : vector<32x128xf32>
    %c0_5 = arith.constant 0 : index
    %c0_6 = arith.constant 0 : index
    %6 = vector.load %arg4[%c0_5, %c0_6] : memref<32x128xf32, #tpu.memory_space<vmem>>, vector<32x128xf32>
    tpu.vector_store %arg4[%c0_5, %c0_6], %5 {strides = array<i32>} : memref<32x128xf32, #tpu.memory_space<vmem>>, vector<32x128xf32>,
    return
  }
  func.func @transform_0(%arg0: i32) -> (i32, i32) {
    %c0_i32 = arith.constant 0 : i32
    %c0_i32_0 = arith.constant 0 : i32
    return %arg0, %c0_i32 : i32, i32
  }
  func.func @transform_1(%arg0: i32) -> (i32, i32) {
    %c0_i32 = arith.constant 0 : i32
    %c0_i32_0 = arith.constant 0 : i32
    %c0_i32_1 = arith.constant 0 : i32
    return %c0_i32, %c0_i32_0 : i32, i32
  }
  func.func @transform_2(%arg0: i32) -> (i32, i32) {
    %c0_i32 = arith.constant 0 : i32
    %c0_i32_0 = arith.constant 0 : i32
    %c0_i32_1 = arith.constant 0 : i32
    return %c0_i32, %c0_i32_0 : i32, i32
  }
  func.func @transform_3(%arg0: i32) -> (i32, i32) {
    %c0_i32 = arith.constant 0 : i32
    %c0_i32_0 = arith.constant 0 : i32
    return %arg0, %c0_i32 : i32, i32
  }
}

module attributes {stable_mosaic.version = 11 : i64} {
  func.func @_mm_kernel(%arg0: i32, %arg1: memref<32x384xbf16, #tpu.memory_space<vmem>>, %arg2: memref<384x128xbf16, #tpu.memory_space<vmem>>, %arg3: memref<1x128xf32, #tpu.memory_space<vmem>>, %arg4: memref<32x128xf32, #tpu.memory_space<vmem>>) attributes {dimension_semantics = [#tpu.dimension_semantics<parallel>], iteration_bounds = array<i64: 1>, scalar_prefetch = 0 : i64, scratch_operands = 0 : i64, tpu.core_type = #tpu.core_type<tc>, window_params = [{transform_indices = @transform_0, window_bounds = array<i64: 32, 384>}, {pipeline_mode = #tpu.pipeline_mode<synchronous>, transform_indices = @transform_1, window_bounds = array<i64: 384, 128>}, {pipeline_mode = #tpu.pipeline_mode<synchronous>, transform_indices = @transform_2, window_bounds = array<i64: 1, 128>}, {transform_indices = @transform_3, window_bounds = array<i64: 32, 128>}]} {
    %c0 = arith.constant 0 : index
    %c0_0 = arith.constant 0 : index
    %0 = vector.load %arg1[%c0, %c0_0] : memref<32x384xbf16, #tpu.memory_space<vmem>>, vector<32x384xbf16>
    %c0_1 = arith.constant 0 : index
    %c0_2 = arith.constant 0 : index
    %1 = vector.load %arg2[%c0_1, %c0_2] : memref<384x128xbf16, #tpu.memory_space<vmem>>, vector<384x128xbf16>
    %cst = arith.constant dense<0.000000e+00> : vector<32x128xf32>
    %2 = tpu.matmul %0, %1, %cst {dimension_numbers = #tpu.dot_dimension_numbers<[1], [0], [0], [1], [0, 0, 1, 1], [], []>} : vector<32x384xbf16>, vector<384x128xbf16>, vector<32x128xf32> -> vector<32x128xf32>
    %c0_3 = arith.constant 0 : index
    %c0_4 = arith.constant 0 : index
    %3 = vector.load %arg3[%c0_3, %c0_4] : memref<1x128xf32, #tpu.memory_space<vmem>>, vector<1x128xf32>
    %4 = vector.broadcast %3 : vector<1x128xf32> to vector<32x128xf32>
    %5 = arith.addf %2, %4 : vector<32x128xf32>
    %cst_5 = arith.constant 0.000000e+00 : f32
    %6 = vector.broadcast %cst_5 : f32 to vector<32x128xf32>
    %7 = arith.maximumf %5, %6 : vector<32x128xf32>
    %c0_6 = arith.constant 0 : index
    %c0_7 = arith.constant 0 : index
    %8 = vector.load %arg4[%c0_6, %c0_7] : memref<32x128xf32, #tpu.memory_space<vmem>>, vector<32x128xf32>
    tpu.vector_store %arg4[%c0_6, %c0_7], %7 {strides = array<i32>} : memref<32x128xf32, #tpu.memory_space<vmem>>, vector<32x128xf32>,
    return
  }
  func.func @transform_0(%arg0: i32) -> (i32, i32) {
    %c0_i32 = arith.constant 0 : i32
    %c0_i32_0 = arith.constant 0 : i32
    return %arg0, %c0_i32 : i32, i32
  }
  func.func @transform_1(%arg0: i32) -> (i32, i32) {
    %c0_i32 = arith.constant 0 : i32
    %c0_i32_0 = arith.constant 0 : i32
    %c0_i32_1 = arith.constant 0 : i32
    return %c0_i32, %c0_i32_0 : i32, i32
  }
  func.func @transform_2(%arg0: i32) -> (i32, i32) {
    %c0_i32 = arith.constant 0 : i32
    %c0_i32_0 = arith.constant 0 : i32
    %c0_i32_1 = arith.constant 0 : i32
    return %c0_i32, %c0_i32_0 : i32, i32
  }
  func.func @transform_3(%arg0: i32) -> (i32, i32) {
    %c0_i32 = arith.constant 0 : i32
    %c0_i32_0 = arith.constant 0 : i32
    return %arg0, %c0_i32 : i32, i32
  }
}

module attributes {stable_mosaic.version = 11 : i64} {
  func.func @_mm_kernel(%arg0: i32, %arg1: memref<32x384xbf16, #tpu.memory_space<vmem>>, %arg2: memref<384x256xbf16, #tpu.memory_space<vmem>>, %arg3: memref<1x256xf32, #tpu.memory_space<vmem>>, %arg4: memref<32x256xf32, #tpu.memory_space<vmem>>) attributes {dimension_semantics = [#tpu.dimension_semantics<parallel>], iteration_bounds = array<i64: 1>, scalar_prefetch = 0 : i64, scratch_operands = 0 : i64, tpu.core_type = #tpu.core_type<tc>, window_params = [{transform_indices = @transform_0, window_bounds = array<i64: 32, 384>}, {pipeline_mode = #tpu.pipeline_mode<synchronous>, transform_indices = @transform_1, window_bounds = array<i64: 384, 256>}, {pipeline_mode = #tpu.pipeline_mode<synchronous>, transform_indices = @transform_2, window_bounds = array<i64: 1, 256>}, {transform_indices = @transform_3, window_bounds = array<i64: 32, 256>}]} {
    %c0 = arith.constant 0 : index
    %c0_0 = arith.constant 0 : index
    %0 = vector.load %arg1[%c0, %c0_0] : memref<32x384xbf16, #tpu.memory_space<vmem>>, vector<32x384xbf16>
    %c0_1 = arith.constant 0 : index
    %c0_2 = arith.constant 0 : index
    %1 = vector.load %arg2[%c0_1, %c0_2] : memref<384x256xbf16, #tpu.memory_space<vmem>>, vector<384x256xbf16>
    %cst = arith.constant dense<0.000000e+00> : vector<32x256xf32>
    %2 = tpu.matmul %0, %1, %cst {dimension_numbers = #tpu.dot_dimension_numbers<[1], [0], [0], [1], [0, 0, 1, 1], [], []>} : vector<32x384xbf16>, vector<384x256xbf16>, vector<32x256xf32> -> vector<32x256xf32>
    %c0_3 = arith.constant 0 : index
    %c0_4 = arith.constant 0 : index
    %3 = vector.load %arg3[%c0_3, %c0_4] : memref<1x256xf32, #tpu.memory_space<vmem>>, vector<1x256xf32>
    %4 = vector.broadcast %3 : vector<1x256xf32> to vector<32x256xf32>
    %5 = arith.addf %2, %4 : vector<32x256xf32>
    %c0_5 = arith.constant 0 : index
    %c0_6 = arith.constant 0 : index
    %6 = vector.load %arg4[%c0_5, %c0_6] : memref<32x256xf32, #tpu.memory_space<vmem>>, vector<32x256xf32>
    tpu.vector_store %arg4[%c0_5, %c0_6], %5 {strides = array<i32>} : memref<32x256xf32, #tpu.memory_space<vmem>>, vector<32x256xf32>,
    return
  }
  func.func @transform_0(%arg0: i32) -> (i32, i32) {
    %c0_i32 = arith.constant 0 : i32
    %c0_i32_0 = arith.constant 0 : i32
    return %arg0, %c0_i32 : i32, i32
  }
  func.func @transform_1(%arg0: i32) -> (i32, i32) {
    %c0_i32 = arith.constant 0 : i32
    %c0_i32_0 = arith.constant 0 : i32
    %c0_i32_1 = arith.constant 0 : i32
    return %c0_i32, %c0_i32_0 : i32, i32
  }
  func.func @transform_2(%arg0: i32) -> (i32, i32) {
    %c0_i32 = arith.constant 0 : i32
    %c0_i32_0 = arith.constant 0 : i32
    %c0_i32_1 = arith.constant 0 : i32
    return %c0_i32, %c0_i32_0 : i32, i32
  }
  func.func @transform_3(%arg0: i32) -> (i32, i32) {
    %c0_i32 = arith.constant 0 : i32
    %c0_i32_0 = arith.constant 0 : i32
    return %arg0, %c0_i32 : i32, i32
  }
}

</mosaic_0001>

<bundles_post_ra>
// kernel: human_vqvae_forward.19
= control target key start
LH: loop header
LB: loop body
LE: loop exit
PB: predicated region body
PF: predicated region fallthrough
CT: control target
= control target key end

     0   :  { %s646_s1 = inlined_call_operand.vmem [shape: bf16[512,128], index: 1, kind: input, shape index: {}]   ;;  %s647_s0 = inlined_call_operand.vmem [shape: bf16[16,512], index: 0, kind: input, shape index: {}]   ;;  %s648_s2 = inlined_call_operand.vmem [shape: f32[1,128], index: 2, kind: input, shape index: {}]   ;;  %s649_s3 = inlined_call_operand.vmem [shape: f32[16,128], index: 3, kind: output, shape index: {}]  }
   0x1   :  { %v471_v0 = vld [vmem:[%s646_s1 + $0x78] sm:$0xff]   ;;  %v475_v4 = vld [vmem:[%s646_s1 + $0x70] sm:$0xff]   ;;  %v479_v8 = vld [vmem:[%s646_s1 + $0x68] sm:$0xff]  }
   0x2   :  { %v472_v1 = vld [vmem:[%s646_s1 + $0xf8] sm:$0xff]   ;;  %427 = vmatprep.subr.bf16.mxu0 %v471_v0  ;;  %v476_v5 = vld [vmem:[%s646_s1 + $0xf0] sm:$0xff]   ;;  %v480_v9 = vld [vmem:[%s646_s1 + $0xe8] sm:$0xff]  }
   0x3   :  { %v473_v2 = vld [vmem:[%s646_s1 + $0x38] sm:$0xff]   ;;  %449 = vmatprep.subr.bf16.mxu1 %v472_v1  ;;  %v477_v6 = vld [vmem:[%s646_s1 + $0x30] sm:$0xff]   ;;  %v481_v10 = vld [vmem:[%s646_s1 + $0x28] sm:$0xff]  }
   0x4   :  { %v474_v3 = vld [vmem:[%s646_s1 + $0xb8] sm:$0xff]   ;;  %428 = vmatpush3.bf16.msra.mxu0 %v473_v2  ;;  %v478_v7 = vld [vmem:[%s646_s1 + $0xb0] sm:$0xff]   ;;  %v482_v11 = vld [vmem:[%s646_s1 + $0xa8] sm:$0xff]  }
   0x5   :  { %450 = vmatpush3.bf16.msra.mxu1 %v474_v3  ;;  %429 = vmatprep.subr.bf16.mxu0 %v475_v4  ;;  %v483_v12 = vld [vmem:[%s646_s1 + $0x60] sm:$0xff]   ;;  %v487_v16 = vld [vmem:[%s646_s1 + $0x58] sm:$0xff]   ;;  %v491_v20 = vld [vmem:[%s646_s1 + $0x50] sm:$0xff]  }
   0x6   :  { %451 = vmatprep.subr.bf16.mxu1 %v476_v5  ;;  %v484_v13 = vld [vmem:[%s646_s1 + $0xe0] sm:$0xff]   ;;  %v488_v17 = vld [vmem:[%s646_s1 + $0xd8] sm:$0xff]   ;;  %v492_v21 = vld [vmem:[%s646_s1 + $0xd0] sm:$0xff]  }
   0x7   :  { %v485_v14 = vld [vmem:[%s646_s1 + $0x20] sm:$0xff]   ;;  %v489_v18 = vld [vmem:[%s646_s1 + $0x18] sm:$0xff]   ;;  %v493_v22 = vld [vmem:[%s646_s1 + $0x10] sm:$0xff]  }
   0x8   :  { %430 = vmatpush3.bf16.msra.mxu0 %v477_v6  ;;  %v486_v15 = vld [vmem:[%s646_s1 + $0xa0] sm:$0xff]   ;;  %v490_v19 = vld [vmem:[%s646_s1 + $0x98] sm:$0xff]   ;;  %v494_v23 = vld [vmem:[%s646_s1 + $0x90] sm:$0xff]  }
   0x9   :  { %452 = vmatpush3.bf16.msra.mxu1 %v478_v7  ;;  %431 = vmatprep.subr.bf16.mxu0 %v479_v8  ;;  %v495_v24 = vld [vmem:[%s646_s1 + $0x48] sm:$0xff]   ;;  %v499_v28 = vld [vmem:[%s646_s1 + $0x40] sm:$0xff]  }
   0xa   :  { %453 = vmatprep.subr.bf16.mxu1 %v480_v9  ;;  %v496_v25 = vld [vmem:[%s646_s1 + $0xc8] sm:$0xff]   ;;  %v500_v29 = vld [vmem:[%s646_s1 + $0xc0] sm:$0xff]  }
   0xb   :  { %v497_v26 = vld [vmem:[%s646_s1 + $0x8] sm:$0xff]   ;;  %v501_v30 = vld [vmem:[%s646_s1] sm:$0xff]  }
   0xc   :  { %432 = vmatpush3.bf16.msra.mxu0 %v481_v10  ;;  %v498_v27 = vld [vmem:[%s646_s1 + $0x88] sm:$0xff]   ;;  %v502_v31 = vld [vmem:[%s646_s1 + $0x80] sm:$0xff]  }
   0xd   :  { %454 = vmatpush3.bf16.msra.mxu1 %v482_v11  ;;  %433 = vmatprep.subr.bf16.mxu0 %v483_v12  ;;  %v503_v32 = vld [vmem:[%s647_s0] ss:$16 sps:$4 sm:$0xff]   ;;  %v505_v33 = vld [vmem:[%s647_s0 + $0x4] ss:$16 sps:$4 sm:$0xff]   ;;  %v506_v34 = vld [vmem:[%s647_s0 + $0x8] ss:$16 sps:$4 sm:$0xff]  }
   0xe   :  { %455 = vmatprep.subr.bf16.mxu1 %v484_v13  ;;  %v508_v35 = vld [vmem:[%s647_s0 + $0xc] ss:$16 sps:$4 sm:$0xff]   ;;  %334 = vmatprep.mubr.bf16.mxu0 %v505_v33  ;;  %v390_v38 = vld [vmem:[%s648_s2] ss:$0 sm:$0xff] }
   0xf   :  { %375 = vmatprep.mubr.bf16.mxu1 %v508_v35 }
  0x10   :  { %434 = vmatpush3.bf16.msra.mxu0 %v485_v14 }
  0x11   :  { %456 = vmatpush3.bf16.msra.mxu1 %v486_v15  ;;  %435 = vmatprep.subr.bf16.mxu0 %v487_v16 }
  0x12   :  { %457 = vmatprep.subr.bf16.mxu1 %v488_v17 }
  0x14   :  { %436 = vmatpush3.bf16.msra.mxu0 %v489_v18 }
  0x15   :  { %458 = vmatpush3.bf16.msra.mxu1 %v490_v19  ;;  %437 = vmatprep.subr.bf16.mxu0 %v491_v20 }
  0x16   :  { %459 = vmatprep.subr.bf16.mxu1 %v492_v21 }
  0x18   :  { %438 = vmatpush3.bf16.msra.mxu0 %v493_v22 }
  0x19   :  { %460 = vmatpush3.bf16.msra.mxu1 %v494_v23  ;;  %439 = vmatprep.subr.bf16.mxu0 %v495_v24 }
  0x1a   :  { %461 = vmatprep.subr.bf16.mxu1 %v496_v25 }
  0x1c   :  { %440 = vmatpush3.bf16.msra.mxu0 %v497_v26 }
  0x1d   :  { %462 = vmatpush3.bf16.msra.mxu1 %v498_v27  ;;  %441 = vmatprep.subr.bf16.mxu0 %v499_v28 }
  0x1e   :  { %463 = vmatprep.subr.bf16.mxu1 %v500_v29 }
  0x20   :  { %442 = vmatpush3.bf16.msra.mxu0 %v501_v30 }
  0x21   :  { %464 = vmatpush3.bf16.msra.mxu1 %v502_v31 }
  0x23   :  { %335 = vmatmul.mubr.bf16.vlgmr.msra.gmra.mxu0 %v503_v32 }
  0x24   :  { %376 = vmatmul.mubr.bf16.vlgmr.msra.gmra.mxu1 %v506_v34 }
  0xe3   :  { %v443_v36 = vpop.f32.mrf.mxu0 }
  0xe4   :  { %v465_v37 = vpop.f32.mrf.mxu1 }
  0xe5   :  { %v444_v39 = vpop.f32.mrf.mxu0 }
  0xe6   :  { %v445_v40 = vadd.f32 %v444_v39, %v443_v36  ;;  %v466_v41 = vpop.f32.mrf.mxu1 }
  0xe7   :  { %v446_v42 = vpop.f32.mrf.mxu0  ;;  %v467_v44 = vadd.f32 %v466_v41, %v465_v37 }
  0xe8   :  { %v337_v43 = vadd.f32 %v445_v40, %v390_v38  ;;  %v468_v45 = vpop.f32.mrf.mxu1 }
  0xe9   :  { %v447_v46 = vpop.f32.mrf.mxu0 }
  0xea   :  { %v378_v47 = vadd.f32 %v467_v44, %v337_v43  ;;  %v448_v48 = vadd.f32 %v447_v46, %v446_v42  ;;  %v469_v49 = vpop.f32.mrf.mxu1 }
  0xeb   :  { %v470_v51 = vadd.f32 %v469_v49, %v468_v45 }
  0xec   :  { %384 = vst [vmem:[%s649_s3] sm:$0xff] %v378_v47  ;;  %v340_v50 = vadd.f32 %v448_v48, %v390_v38 }
  0xee   :  { %v381_v52 = vadd.f32 %v470_v51, %v340_v50 }
  0xf0   :  { %385 = vst [vmem:[%s649_s3 + $0x8] sm:$0xff] %v381_v52 }

// kernel: human_vqvae_forward.18
= control target key start
LH: loop header
LB: loop body
LE: loop exit
PB: predicated region body
PF: predicated region fallthrough
CT: control target
= control target key end

     0   :  { %s1079_s1 = inlined_call_operand.vmem [shape: bf16[768,128], index: 1, kind: input, shape index: {}]   ;;  %s1080_s0 = inlined_call_operand.vmem [shape: bf16[32,768], index: 0, kind: input, shape index: {}]   ;;  %s1081_s2 = inlined_call_operand.vmem [shape: f32[1,128], index: 2, kind: input, shape index: {}]   ;;  %s1082_s3 = inlined_call_operand.vmem [shape: f32[32,128], index: 3, kind: output, shape index: {}]  }
   0x1   :  { %v798_v0 = vld [vmem:[%s1079_s1 + $0x78] sm:$0xff]   ;;  %v802_v4 = vld [vmem:[%s1079_s1 + $0x70] sm:$0xff]   ;;  %v806_v8 = vld [vmem:[%s1079_s1 + $0x68] sm:$0xff]  }
   0x2   :  { %v799_v1 = vld [vmem:[%s1079_s1 + $0xf8] sm:$0xff]   ;;  %698 = vmatprep.subr.bf16.mxu0 %v798_v0  ;;  %v803_v5 = vld [vmem:[%s1079_s1 + $0xf0] sm:$0xff]   ;;  %v807_v9 = vld [vmem:[%s1079_s1 + $0xe8] sm:$0xff]  }
   0x3   :  { %v800_v2 = vld [vmem:[%s1079_s1 + $0x38] sm:$0xff]   ;;  %726 = vmatprep.subr.bf16.mxu1 %v799_v1  ;;  %v804_v6 = vld [vmem:[%s1079_s1 + $0x30] sm:$0xff]   ;;  %v808_v10 = vld [vmem:[%s1079_s1 + $0x28] sm:$0xff]  }
   0x4   :  { %v801_v3 = vld [vmem:[%s1079_s1 + $0xb8] sm:$0xff]   ;;  %699 = vmatpush3.bf16.msra.mxu0 %v800_v2  ;;  %v805_v7 = vld [vmem:[%s1079_s1 + $0xb0] sm:$0xff]   ;;  %v809_v11 = vld [vmem:[%s1079_s1 + $0xa8] sm:$0xff]  }
   0x5   :  { %727 = vmatpush3.bf16.msra.mxu1 %v801_v3  ;;  %700 = vmatprep.subr.bf16.mxu0 %v802_v4  ;;  %v810_v12 = vld [vmem:[%s1079_s1 + $0x60] sm:$0xff]   ;;  %v814_v16 = vld [vmem:[%s1079_s1 + $0x58] sm:$0xff]   ;;  %v818_v20 = vld [vmem:[%s1079_s1 + $0x50] sm:$0xff]  }
   0x6   :  { %728 = vmatprep.subr.bf16.mxu1 %v803_v5  ;;  %v811_v13 = vld [vmem:[%s1079_s1 + $0xe0] sm:$0xff]   ;;  %v815_v17 = vld [vmem:[%s1079_s1 + $0xd8] sm:$0xff]   ;;  %v819_v21 = vld [vmem:[%s1079_s1 + $0xd0] sm:$0xff]  }
   0x7   :  { %v812_v14 = vld [vmem:[%s1079_s1 + $0x20] sm:$0xff]   ;;  %v816_v18 = vld [vmem:[%s1079_s1 + $0x18] sm:$0xff]   ;;  %v820_v22 = vld [vmem:[%s1079_s1 + $0x10] sm:$0xff]  }
   0x8   :  { %701 = vmatpush3.bf16.msra.mxu0 %v804_v6  ;;  %v813_v15 = vld [vmem:[%s1079_s1 + $0xa0] sm:$0xff]   ;;  %v817_v19 = vld [vmem:[%s1079_s1 + $0x98] sm:$0xff]   ;;  %v821_v23 = vld [vmem:[%s1079_s1 + $0x90] sm:$0xff]  }
   0x9   :  { %729 = vmatpush3.bf16.msra.mxu1 %v805_v7  ;;  %702 = vmatprep.subr.bf16.mxu0 %v806_v8  ;;  %v822_v24 = vld [vmem:[%s1079_s1 + $0x48] sm:$0xff]   ;;  %v826_v28 = vld [vmem:[%s1079_s1 + $0x40] sm:$0xff]   ;;  %v836_v36 = vld [vmem:[%s1079_s1 + $0x178] sm:$0xff]  }
   0xa   :  { %730 = vmatprep.subr.bf16.mxu1 %v807_v9  ;;  %v823_v25 = vld [vmem:[%s1079_s1 + $0xc8] sm:$0xff]   ;;  %v827_v29 = vld [vmem:[%s1079_s1 + $0xc0] sm:$0xff]   ;;  %v837_v37 = vld [vmem:[%s1079_s1 + $0x138] sm:$0xff]  }
   0xb   :  { %v824_v26 = vld [vmem:[%s1079_s1 + $0x8] sm:$0xff]   ;;  %v828_v30 = vld [vmem:[%s1079_s1] sm:$0xff]   ;;  %v838_v38 = vld [vmem:[%s1079_s1 + $0x170] sm:$0xff]  }
   0xc   :  { %703 = vmatpush3.bf16.msra.mxu0 %v808_v10  ;;  %v825_v27 = vld [vmem:[%s1079_s1 + $0x88] sm:$0xff]   ;;  %v829_v31 = vld [vmem:[%s1079_s1 + $0x80] sm:$0xff]   ;;  %v839_v39 = vld [vmem:[%s1079_s1 + $0x130] sm:$0xff]  }
   0xd   :  { %731 = vmatpush3.bf16.msra.mxu1 %v809_v11  ;;  %704 = vmatprep.subr.bf16.mxu0 %v810_v12  ;;  %v830_v32 = vld [vmem:[%s1080_s0] ss:$24 sps:$4 sm:$0xff]   ;;  %v832_v33 = vld [vmem:[%s1080_s0 + $0x4] ss:$24 sps:$4 sm:$0xff]   ;;  %v840_v40 = vld [vmem:[%s1079_s1 + $0x168] sm:$0xff]  }
   0xe   :  { %732 = vmatprep.subr.bf16.mxu1 %v811_v13  ;;  %v833_v34 = vld [vmem:[%s1080_s0 + $0x8] ss:$24 sps:$4 sm:$0xff]   ;;  %v835_v35 = vld [vmem:[%s1080_s0 + $0xc] ss:$24 sps:$4 sm:$0xff]   ;;  %510 = vmatprep.mubr.bf16.mxu0 %v832_v33  ;;  %v848_v46 = vld [vmem:[%s1080_s0 + $0x3c] ss:$24 sps:$4 sm:$0xff]  }
   0xf   :  { %559 = vmatprep.mubr.bf16.mxu1 %v835_v35  ;;  %v841_v41 = vld [vmem:[%s1079_s1 + $0x128] sm:$0xff]   ;;  %v842_v42 = vld [vmem:[%s1079_s1 + $0x160] sm:$0xff]   ;;  %v847_v47 = vld [vmem:[%s1079_s1 + $0x158] sm:$0xff]  }
  0x10   :  { %705 = vmatpush3.bf16.msra.mxu0 %v812_v14  ;;  %v844_v43 = vld [vmem:[%s1080_s0 + $0x34] ss:$24 sps:$4 sm:$0xff]   ;;  %v843_v44 = vld [vmem:[%s1079_s1 + $0x120] sm:$0xff]   ;;  %v846_v45 = vld [vmem:[%s1080_s0 + $0x30] ss:$24 sps:$4 sm:$0xff]  }
  0x11   :  { %733 = vmatpush3.bf16.msra.mxu1 %v813_v15  ;;  %706 = vmatprep.subr.bf16.mxu0 %v814_v16  ;;  %v851_v48 = vld [vmem:[%s1080_s0 + $0x38] ss:$24 sps:$4 sm:$0xff]   ;;  %v860_v52 = vld [vmem:[%s1080_s0 + $0x14] ss:$24 sps:$4 sm:$0xff]   ;;  %v863_v54 = vld [vmem:[%s1080_s0 + $0x44] ss:$24 sps:$4 sm:$0xff]  }
  0x12   :  { %734 = vmatprep.subr.bf16.mxu1 %v815_v17  ;;  %v850_v49 = vld [vmem:[%s1079_s1 + $0x118] sm:$0xff]   ;;  %v852_v50 = vld [vmem:[%s1079_s1 + $0x150] sm:$0xff]   ;;  %v854_v53 = vld [vmem:[%s1079_s1 + $0x148] sm:$0xff]  }
  0x13   :  { %v853_v51 = vld [vmem:[%s1079_s1 + $0x110] sm:$0xff]   ;;  %v855_v55 = vld [vmem:[%s1079_s1 + $0x108] sm:$0xff]   ;;  %v856_v56 = vld [vmem:[%s1079_s1 + $0x140] sm:$0xff]  }
  0x14   :  { %707 = vmatpush3.bf16.msra.mxu0 %v816_v18  ;;  %v857_v57 = vld [vmem:[%s1079_s1 + $0x100] sm:$0xff]   ;;  %v858_v58 = vld [vmem:[%s1080_s0 + $0x10] ss:$24 sps:$4 sm:$0xff]  }
  0x15   :  { %735 = vmatpush3.bf16.msra.mxu1 %v817_v19  ;;  %708 = vmatprep.subr.bf16.mxu0 %v818_v20  ;;  %v861_v59 = vld [vmem:[%s1080_s0 + $0x40] ss:$24 sps:$4 sm:$0xff]  }
  0x16   :  { %736 = vmatprep.subr.bf16.mxu1 %v819_v21  ;;  %v637_v11 = vld [vmem:[%s1081_s2] ss:$0 sm:$0xff] }
  0x18   :  { %709 = vmatpush3.bf16.msra.mxu0 %v820_v22 }
  0x19   :  { %737 = vmatpush3.bf16.msra.mxu1 %v821_v23  ;;  %710 = vmatprep.subr.bf16.mxu0 %v822_v24 }
  0x1a   :  { %738 = vmatprep.subr.bf16.mxu1 %v823_v25 }
  0x1c   :  { %711 = vmatpush3.bf16.msra.mxu0 %v824_v26 }
  0x1d   :  { %739 = vmatpush3.bf16.msra.mxu1 %v825_v27  ;;  %712 = vmatprep.subr.bf16.mxu0 %v826_v28 }
  0x1e   :  { %740 = vmatprep.subr.bf16.mxu1 %v827_v29 }
  0x20   :  { %713 = vmatpush3.bf16.msra.mxu0 %v828_v30 }
  0x21   :  { %741 = vmatpush3.bf16.msra.mxu1 %v829_v31  ;;  %754 = vmatprep.subr.bf16.mxu0 %v836_v36 }
  0x22   :  { %782 = vmatprep.subr.bf16.mxu1 %v836_v36 }
  0x23   :  { %511 = vmatmul.mubr.bf16.vlgmr.msra.gmra.mxu0 %v830_v32 }
  0x24   :  { %560 = vmatmul.mubr.bf16.vlgmr.msra.gmra.mxu1 %v833_v34  ;;  %755 = vmatpush3.bf16.msra.mxu0 %v837_v37 }
  0x25   :  { %790 = vmatpush3.bf16.msra.mxu1 %v837_v37  ;;  %756 = vmatprep.subr.bf16.mxu0 %v838_v38 }
  0x26   :  { %783 = vmatprep.subr.bf16.mxu1 %v838_v38  ;;  %518 = vmatprep.mubr.bf16.mxu0 %v844_v43 }
  0x27   :  { %567 = vmatprep.mubr.bf16.mxu1 %v848_v46 }
  0x28   :  { %757 = vmatpush3.bf16.msra.mxu0 %v839_v39 }
  0x29   :  { %791 = vmatpush3.bf16.msra.mxu1 %v839_v39  ;;  %758 = vmatprep.subr.bf16.mxu0 %v840_v40 }
  0x2a   :  { %784 = vmatprep.subr.bf16.mxu1 %v840_v40 }
  0x2b   :  { %519 = vmatmul.mubr.bf16.gmra.mxu0 %v846_v45 }
  0x2c   :  { %759 = vmatpush3.bf16.msra.mxu0 %v841_v41  ;;  %568 = vmatmul.mubr.bf16.gmra.mxu1 %v851_v48 }
  0x2d   :  { %792 = vmatpush3.bf16.msra.mxu1 %v841_v41  ;;  %760 = vmatprep.subr.bf16.mxu0 %v842_v42 }
  0x2e   :  { %785 = vmatprep.subr.bf16.mxu1 %v842_v42  ;;  %608 = vmatprep.mubr.bf16.mxu0 %v860_v52 }
  0x2f   :  { %616 = vmatprep.mubr.bf16.mxu1 %v863_v54 }
  0x30   :  { %761 = vmatpush3.bf16.msra.mxu0 %v843_v44 }
  0x31   :  { %793 = vmatpush3.bf16.msra.mxu1 %v843_v44  ;;  %762 = vmatprep.subr.bf16.mxu0 %v847_v47 }
  0x32   :  { %786 = vmatprep.subr.bf16.mxu1 %v847_v47 }
  0x34   :  { %763 = vmatpush3.bf16.msra.mxu0 %v850_v49 }
  0x35   :  { %794 = vmatpush3.bf16.msra.mxu1 %v850_v49  ;;  %764 = vmatprep.subr.bf16.mxu0 %v852_v50 }
  0x36   :  { %787 = vmatprep.subr.bf16.mxu1 %v852_v50 }
  0x38   :  { %765 = vmatpush3.bf16.msra.mxu0 %v853_v51 }
  0x39   :  { %795 = vmatpush3.bf16.msra.mxu1 %v853_v51  ;;  %766 = vmatprep.subr.bf16.mxu0 %v854_v53 }
  0x3a   :  { %788 = vmatprep.subr.bf16.mxu1 %v854_v53 }
  0x3c   :  { %767 = vmatpush3.bf16.msra.mxu0 %v855_v55 }
  0x3d   :  { %796 = vmatpush3.bf16.msra.mxu1 %v855_v55  ;;  %768 = vmatprep.subr.bf16.mxu0 %v856_v56 }
  0x3e   :  { %789 = vmatprep.subr.bf16.mxu1 %v856_v56 }
  0x40   :  { %769 = vmatpush3.bf16.msra.mxu0 %v857_v57 }
  0x41   :  { %797 = vmatpush3.bf16.msra.mxu1 %v857_v57 }
  0x43   :  { %609 = vmatmul.mubr.bf16.vlgmr.msra.gmra.mxu0 %v858_v58 }
  0x44   :  { %617 = vmatmul.mubr.bf16.vlgmr.msra.gmra.mxu1 %v861_v59 }
  0xe3   :  { %v714_v60 = vpop.f32.mrf.mxu0 }
  0xe4   :  { %v742_v61 = vpop.f32.mrf.mxu1 }
  0xe5   :  { %v715_v62 = vpop.f32.mrf.mxu0 }
  0xe6   :  { %v743_v63 = vpop.f32.mrf.mxu1  ;;  %v716_v9 = vadd.f32 %v715_v62, %v714_v60 }
  0xe7   :  { %v717_v0 = vpop.f32.mrf.mxu0  ;;  %v744_v21 = vadd.f32 %v743_v63, %v742_v61 }
  0xe8   :  { %v745_v1 = vpop.f32.mrf.mxu1  ;;  %v513_v14 = vadd.f32 %v716_v9, %v637_v11 }
  0xe9   :  { %v718_v2 = vpop.f32.mrf.mxu0 }
  0xea   :  { %v746_v3 = vpop.f32.mrf.mxu1  ;;  %v719_v15 = vadd.f32 %v718_v2, %v717_v0  ;;  %v562_v24 = vadd.f32 %v744_v21, %v513_v14 }
  0xeb   :  { %v720_v4 = vpop.f32.mrf.mxu0  ;;  %v747_v33 = vadd.f32 %v746_v3, %v745_v1 }
  0xec   :  { %v748_v5 = vpop.f32.mrf.mxu1  ;;  %v516_v25 = vadd.f32 %v719_v15, %v637_v11 }
  0xed   :  { %v721_v6 = vpop.f32.mrf.mxu0 }
  0xee   :  { %v749_v7 = vpop.f32.mrf.mxu1  ;;  %v722_v12 = vadd.f32 %v721_v6, %v720_v4  ;;  %v565_v38 = vadd.f32 %v747_v33, %v516_v25 }
  0xef   :  { %v723_v8 = vpop.f32.mrf.mxu0  ;;  %v750_v18 = vadd.f32 %v749_v7, %v748_v5 }
  0xf0   :  { %v751_v10 = vpop.f32.mrf.mxu1  ;;  %v521_v17 = vadd.f32 %v722_v12, %v637_v11 }
  0xf1   :  { %v724_v13 = vpop.f32.mrf.mxu0 }
  0xf2   :  { %v752_v16 = vpop.f32.mrf.mxu1  ;;  %v725_v19 = vadd.f32 %v724_v13, %v723_v8  ;;  %v570_v28 = vadd.f32 %v750_v18, %v521_v17 }
  0xf3   :  { %v753_v30 = vadd.f32 %v752_v16, %v751_v10 }
  0xf4   :  { %v524_v29 = vadd.f32 %v725_v19, %v637_v11 }
  0xf6   :  { %v573_v42 = vadd.f32 %v753_v30, %v524_v29 }
 0x103   :  { %v770_v20 = vpop.f32.mrf.mxu0 }
 0x104   :  { %v776_v22 = vpop.f32.mrf.mxu1 }
 0x105   :  { %v771_v23 = vpop.f32.mrf.mxu0 }
 0x106   :  { %v772_v26 = vadd.f32 %v771_v23, %v770_v20  ;;  %v777_v27 = vpop.f32.mrf.mxu1 }
 0x107   :  { %v778_v31 = vadd.f32 %v777_v27, %v776_v22  ;;  %v773_v32 = vpop.f32.mrf.mxu0 }
 0x108   :  { %v611_v34 = vadd.f32 %v772_v26, %v562_v24  ;;  %v779_v35 = vpop.f32.mrf.mxu1 }
 0x109   :  { %v619_v36 = vadd.f32 %v778_v31, %v570_v28  ;;  %v774_v37 = vpop.f32.mrf.mxu0 }
 0x10a   :  { %v625_v39 = vmax.f32 %v611_v34, 0.0  ;;  %v775_v40 = vadd.f32 %v774_v37, %v773_v32  ;;  %v780_v41 = vpop.f32.mrf.mxu1 }
 0x10b   :  { %v627_v43 = vmax.f32 %v619_v36, 0.0  ;;  %v781_v44 = vadd.f32 %v780_v41, %v779_v35 }
 0x10c   :  { %629 = vst [vmem:[%s1082_s3] sm:$0xff] %v625_v39  ;;  %v614_v45 = vadd.f32 %v775_v40, %v565_v38 }
 0x10d   :  { %631 = vst [vmem:[%s1082_s3 + $0x10] sm:$0xff] %v627_v43  ;;  %v622_v46 = vadd.f32 %v781_v44, %v573_v42 }
 0x10e   :  { %v626_v47 = vmax.f32 %v614_v45, 0.0 }
 0x10f   :  { %v628_v48 = vmax.f32 %v622_v46, 0.0 }
 0x110   :  { %630 = vst [vmem:[%s1082_s3 + $0x8] sm:$0xff] %v626_v47 }
 0x111   :  { %632 = vst [vmem:[%s1082_s3 + $0x18] sm:$0xff] %v628_v48 }

// kernel: human_vqvae_forward.20
= control target key start
LH: loop header
LB: loop body
LE: loop exit
PB: predicated region body
PF: predicated region fallthrough
CT: control target
= control target key end

     0   :  { %v606_v1 = vmov 0.0   ;;  %vm607_vm0 = vmmov 0   ;;  %v608_v26 = vmov 0   ;;  %s790_s1 = inlined_call_operand.vmem [shape: bf16[384,128], index: 1, kind: input, shape index: {}]   ;;  %s791_s0 = inlined_call_operand.vmem [shape: bf16[16,384], index: 0, kind: input, shape index: {}]   ;;  %s792_s3 = inlined_call_operand.vmem [shape: bf16[128,128], index: 3, kind: input, shape index: {}]   ;;  %s793_s2 = inlined_call_operand.vmem [shape: f32[1,128], index: 2, kind: input, shape index: {}]   ;;  %s794_s4 = inlined_call_operand.vmem [shape: f32[1,128], index: 4, kind: input, shape index: {}]   ;;  %s795_s5 = inlined_call_operand.vmem [shape: f32[16,128], index: 5, kind: input, shape index: {}]   ;;  %s796_s6 = inlined_call_operand.vmem [shape: f32[16,128], index: 6, kind: output, shape index: {}]  }
   0x1   :  { %v574_v0 = vld [vmem:[%s790_s1 + $0x78] sm:$0xff]   ;;  %531 = vmatprep.subr.bf16.mxu1 %v606_v1  ;;  %547 = vmatprep.mubr.msk.bf16.mxu1 %vm607_vm0, %v606_v1  ;;  %v577_v4 = vld [vmem:[%s790_s1 + $0x70] sm:$0xff]   ;;  %v580_v7 = vld [vmem:[%s790_s1 + $0x68] sm:$0xff]  }
   0x2   :  { %v575_v2 = vld [vmem:[%s790_s1 + $0x38] sm:$0xff]   ;;  %491 = vmatprep.subr.bf16.mxu0 %v574_v0  ;;  %v578_v5 = vld [vmem:[%s790_s1 + $0x30] sm:$0xff]   ;;  %v581_v8 = vld [vmem:[%s790_s1 + $0x28] sm:$0xff]  }
   0x3   :  { %v576_v3 = vld [vmem:[%s790_s1 + $0xb8] sm:$0xff]   ;;  %492 = vmatpush3.bf16.msra.mxu0 %v575_v2  ;;  %v579_v6 = vld [vmem:[%s790_s1 + $0xb0] sm:$0xff]   ;;  %v582_v9 = vld [vmem:[%s790_s1 + $0xa8] sm:$0xff]  }
   0x4   :  { %532 = vmatpush3.bf16.msra.mxu1 %v576_v3  ;;  %493 = vmatprep.subr.bf16.mxu0 %v577_v4  ;;  %v583_v10 = vld [vmem:[%s790_s1 + $0x60] sm:$0xff]   ;;  %v586_v13 = vld [vmem:[%s790_s1 + $0x58] sm:$0xff]   ;;  %v589_v16 = vld [vmem:[%s790_s1 + $0x50] sm:$0xff]  }
   0x5   :  { %533 = vmatprep.subr.bf16.mxu1 %v606_v1  ;;  %v584_v11 = vld [vmem:[%s790_s1 + $0x20] sm:$0xff]   ;;  %v587_v14 = vld [vmem:[%s790_s1 + $0x18] sm:$0xff]   ;;  %v590_v17 = vld [vmem:[%s790_s1 + $0x10] sm:$0xff]  }
   0x6   :  { %v585_v12 = vld [vmem:[%s790_s1 + $0xa0] sm:$0xff]   ;;  %v588_v15 = vld [vmem:[%s790_s1 + $0x98] sm:$0xff]   ;;  %v591_v18 = vld [vmem:[%s790_s1 + $0x90] sm:$0xff]  }
   0x7   :  { %494 = vmatpush3.bf16.msra.mxu0 %v578_v5  ;;  %v592_v19 = vld [vmem:[%s790_s1 + $0x48] sm:$0xff]   ;;  %v595_v22 = vld [vmem:[%s790_s1 + $0x40] sm:$0xff]   ;;  %v27_v29 = vld [vmem:[%s791_s0 + $0x14] sm:$0xf] }
   0x8   :  { %534 = vmatpush3.bf16.msra.mxu1 %v579_v6  ;;  %495 = vmatprep.subr.bf16.mxu0 %v580_v7  ;;  %v593_v20 = vld [vmem:[%s790_s1 + $0x8] sm:$0xff]   ;;  %v24_v23 = vld [vmem:[%s791_s0] sm:$0xff]  ;;  %v31_v33 = vmax.bf16 %v608_v26, %v27_v29  ;;  %v598_v35 = vld [vmem:[%s792_s3 + $0x38] sm:$0xff]  }
   0x9   :  { %535 = vmatprep.subr.bf16.mxu1 %v606_v1  ;;  %v594_v21 = vld [vmem:[%s790_s1 + $0x88] sm:$0xff]   ;;  %v28_v27 = vmax.bf16 %v608_v26, %v24_v23  ;;  %v596_v30 = vld [vmem:[%s790_s1] sm:$0xff]   ;;  %v599_v38 = vld [vmem:[%s792_s3 + $0x30] sm:$0xff]  }
   0xa   :  { %v26_v24 = vld [vmem:[%s791_s0 + $0xc] sm:$0xff]  ;;  %v25_v25 = vld [vmem:[%s791_s0 + $0x8] sm:$0xf]  ;;  %v597_v34 = vld [vmem:[%s790_s1 + $0x80] sm:$0xff]  }
   0xb   :  { %496 = vmatpush3.bf16.msra.mxu0 %v581_v8  ;;  %v30_v28 = vmax.bf16 %v608_v26, %v26_v24  ;;  %v29_v32 = vmax.bf16 %v608_v26, %v25_v25  ;;  %v600_v39 = vld [vmem:[%s792_s3 + $0x28] sm:$0xff]   ;;  %v601_v40 = vld [vmem:[%s792_s3 + $0x20] sm:$0xff]   ;;  %v602_v41 = vld [vmem:[%s792_s3 + $0x18] sm:$0xff]  }
   0xc   :  { %536 = vmatpush3.bf16.msra.mxu1 %v582_v9  ;;  %497 = vmatprep.subr.bf16.mxu0 %v583_v10  ;;  %v603_v42 = vld [vmem:[%s792_s3 + $0x10] sm:$0xff]   ;;  %v604_v43 = vld [vmem:[%s792_s3 + $0x8] sm:$0xff]   ;;  %v605_v44 = vld [vmem:[%s792_s3] sm:$0xff]  }
   0xd   :  { %537 = vmatprep.subr.bf16.mxu1 %v606_v1  ;;  %v456_v31 = vcombine.high %v28_v27, %v30_v28  ;;  %v455_v36 = vcombine.low %v28_v27, %v30_v28  ;;  %v457_v37 = vcombine.low %v29_v32, %v31_v33  ;;  %v454_v47 = vld [vmem:[%s793_s2] ss:$0 sm:$0xff]  ;;  %v445_v6 = vld [vmem:[%s795_s5 + $0x8] sm:$0xff] }
   0xe   :  { %v482_v63 = vld [vmem:[%s794_s4] ss:$0 sm:$0xff] }
   0xf   :  { %498 = vmatpush3.bf16.msra.mxu0 %v584_v11  ;;  %279 = vmatprep.mubr.bf16.mxu0 %v456_v31 }
  0x10   :  { %538 = vmatpush3.bf16.msra.mxu1 %v585_v12  ;;  %499 = vmatprep.subr.bf16.mxu0 %v586_v13 }
  0x11   :  { %539 = vmatprep.subr.bf16.mxu1 %v606_v1 }
  0x13   :  { %500 = vmatpush3.bf16.msra.mxu0 %v587_v14 }
  0x14   :  { %540 = vmatpush3.bf16.msra.mxu1 %v588_v15  ;;  %501 = vmatprep.subr.bf16.mxu0 %v589_v16 }
  0x15   :  { %541 = vmatprep.subr.bf16.mxu1 %v606_v1 }
  0x17   :  { %502 = vmatpush3.bf16.msra.mxu0 %v590_v17 }
  0x18   :  { %542 = vmatpush3.bf16.msra.mxu1 %v591_v18  ;;  %503 = vmatprep.subr.bf16.mxu0 %v592_v19 }
  0x19   :  { %543 = vmatprep.subr.bf16.mxu1 %v606_v1 }
  0x1b   :  { %504 = vmatpush3.bf16.msra.mxu0 %v593_v20 }
  0x1c   :  { %544 = vmatpush3.bf16.msra.mxu1 %v594_v21  ;;  %505 = vmatprep.subr.bf16.mxu0 %v595_v22 }
  0x1d   :  { %545 = vmatprep.subr.bf16.mxu1 %v606_v1 }
  0x1f   :  { %506 = vmatpush3.bf16.msra.mxu0 %v596_v30 }
  0x20   :  { %546 = vmatpush3.bf16.msra.mxu1 %v597_v34  ;;  %551 = vmatprep.subr.bf16.mxu0 %v606_v1 }
  0x22   :  { %280 = vmatmul.mubr.bf16.vlgmr.msra.gmra.mxu0 %v455_v36 }
  0x23   :  { %548 = vmatmul.mubr.bf16.vlgmr.msra.gmra.mxu1 %v457_v37  ;;  %552 = vmatpush3.bf16.msra.mxu0 %v598_v35 }
  0x24   :  { %553 = vmatprep.subr.bf16.mxu0 %v606_v1  ;;  %567 = vmatprep.mubr.msk.bf16.mxu0 %vm607_vm0, %v606_v1 }
  0x27   :  { %554 = vmatpush3.bf16.msra.mxu0 %v599_v38 }
  0x28   :  { %555 = vmatprep.subr.bf16.mxu0 %v606_v1 }
  0x2b   :  { %556 = vmatpush3.bf16.msra.mxu0 %v600_v39 }
  0x2c   :  { %557 = vmatprep.subr.bf16.mxu0 %v606_v1 }
  0x2f   :  { %558 = vmatpush3.bf16.msra.mxu0 %v601_v40 }
  0x30   :  { %559 = vmatprep.subr.bf16.mxu0 %v606_v1 }
  0x33   :  { %560 = vmatpush3.bf16.msra.mxu0 %v602_v41 }
  0x34   :  { %561 = vmatprep.subr.bf16.mxu0 %v606_v1 }
  0x37   :  { %562 = vmatpush3.bf16.msra.mxu0 %v603_v42 }
  0x38   :  { %563 = vmatprep.subr.bf16.mxu0 %v606_v1 }
  0x3b   :  { %564 = vmatpush3.bf16.msra.mxu0 %v604_v43 }
  0x3c   :  { %565 = vmatprep.subr.bf16.mxu0 %v606_v1  ;;  %v444_v1 = vld [vmem:[%s795_s5] sm:$0xff] }
  0x3f   :  { %566 = vmatpush3.bf16.msra.mxu0 %v605_v44 }
  0xe2   :  { %v507_v45 = vpop.f32.mrf.mxu0 }
  0xe3   :  { %v322_v46 = vpop.f32.mrf.mxu1 }
  0xe4   :  { %v508_v48 = vpop.f32.mrf.mxu0 }
  0xe5   :  { %v509_v49 = vadd.f32 %v508_v48, %v507_v45  ;;  %v549_v50 = vpop.f32.mrf.mxu1 }
  0xe6   :  { %v510_v51 = vpop.f32.mrf.mxu0 }
  0xe7   :  { %v282_v52 = vadd.f32 %v509_v49, %v454_v47  ;;  %v325_v53 = vpop.f32.mrf.mxu1 }
  0xe8   :  { %v511_v54 = vpop.f32.mrf.mxu0 }
  0xe9   :  { %v512_v55 = vadd.f32 %v511_v54, %v510_v51  ;;  %v550_v56 = vpop.f32.mrf.mxu1  ;;  %v323_v57 = vadd.f32 %v322_v46, %v282_v52 }
  0xeb   :  { %v285_v58 = vadd.f32 %v512_v55, %v454_v47  ;;  %v329_v60 = vmax.f32 %v323_v57, 0.0 }
  0xed   :  { %v326_v59 = vadd.f32 %v325_v53, %v285_v58 }
  0xef   :  { %v330_v61 = vmax.f32 %v326_v59, 0.0 }
  0xf1   :  { %v331_v62 = vpack.c.bf16 %v330_v61, %v329_v60 }
  0xf3   :  { %568 = vmatmul.mubr.bf16.vlgmr.msra.gmra.mxu0 %v331_v62 }
 0x1b3   :  { %v437_v0 = vpop.f32.mrf.mxu0 }
 0x1b4   :  { %v438_v2 = vadd.f32 %v482_v63, %v437_v0 }
 0x1b5   :  { %v569_v3 = vpop.f32.mrf.mxu0 }
 0x1b6   :  { %v446_v4 = vadd.f32 %v444_v1, %v438_v2 }
 0x1b7   :  { %v440_v5 = vpop.f32.mrf.mxu0 }
 0x1b8   :  { %448 = vst [vmem:[%s796_s6] sm:$0xff] %v446_v4  ;;  %v441_v7 = vadd.f32 %v482_v63, %v440_v5 }
 0x1b9   :  { %v570_v8 = vpop.f32.mrf.mxu0 }
 0x1ba   :  { %v447_v9 = vadd.f32 %v445_v6, %v441_v7 }
 0x1bc   :  { %449 = vst [vmem:[%s796_s6 + $0x8] sm:$0xff] %v447_v9 }

// kernel: human_vqvae_forward.22
= control target key start
LH: loop header
LB: loop body
LE: loop exit
PB: predicated region body
PF: predicated region fallthrough
CT: control target
= control target key end

     0   :  { %s624_s1 = inlined_call_operand.vmem [shape: bf16[512,128], index: 1, kind: input, shape index: {}]   ;;  %s625_s0 = inlined_call_operand.vmem [shape: bf16[8,512], index: 0, kind: input, shape index: {}]   ;;  %s626_s2 = inlined_call_operand.vmem [shape: f32[1,128], index: 2, kind: input, shape index: {}]   ;;  %s627_s3 = inlined_call_operand.vmem [shape: f32[8,128], index: 3, kind: output, shape index: {}]  }
   0x1   :  { %v460_v0 = vld [vmem:[%s624_s1 + $0x78] sm:$0xff]   ;;  %v464_v4 = vld [vmem:[%s624_s1 + $0x70] sm:$0xff]   ;;  %v468_v8 = vld [vmem:[%s624_s1 + $0x68] sm:$0xff]  }
   0x2   :  { %v461_v1 = vld [vmem:[%s624_s1 + $0xf8] sm:$0xff]   ;;  %416 = vmatprep.subr.bf16.mxu0 %v460_v0  ;;  %v465_v5 = vld [vmem:[%s624_s1 + $0xf0] sm:$0xff]   ;;  %v469_v9 = vld [vmem:[%s624_s1 + $0xe8] sm:$0xff]  }
   0x3   :  { %v462_v2 = vld [vmem:[%s624_s1 + $0x38] sm:$0xff]   ;;  %438 = vmatprep.subr.bf16.mxu1 %v461_v1  ;;  %v466_v6 = vld [vmem:[%s624_s1 + $0x30] sm:$0xff]   ;;  %v470_v10 = vld [vmem:[%s624_s1 + $0x28] sm:$0xff]  }
   0x4   :  { %v463_v3 = vld [vmem:[%s624_s1 + $0xb8] sm:$0xff]   ;;  %417 = vmatpush3.bf16.msra.mxu0 %v462_v2  ;;  %v467_v7 = vld [vmem:[%s624_s1 + $0xb0] sm:$0xff]   ;;  %v471_v11 = vld [vmem:[%s624_s1 + $0xa8] sm:$0xff]  }
   0x5   :  { %439 = vmatpush3.bf16.msra.mxu1 %v463_v3  ;;  %418 = vmatprep.subr.bf16.mxu0 %v464_v4  ;;  %v472_v12 = vld [vmem:[%s624_s1 + $0x60] sm:$0xff]   ;;  %v476_v16 = vld [vmem:[%s624_s1 + $0x58] sm:$0xff]   ;;  %v480_v20 = vld [vmem:[%s624_s1 + $0x50] sm:$0xff]  }
   0x6   :  { %440 = vmatprep.subr.bf16.mxu1 %v465_v5  ;;  %v473_v13 = vld [vmem:[%s624_s1 + $0xe0] sm:$0xff]   ;;  %v477_v17 = vld [vmem:[%s624_s1 + $0xd8] sm:$0xff]   ;;  %v481_v21 = vld [vmem:[%s624_s1 + $0xd0] sm:$0xff]  }
   0x7   :  { %v474_v14 = vld [vmem:[%s624_s1 + $0x20] sm:$0xff]   ;;  %v478_v18 = vld [vmem:[%s624_s1 + $0x18] sm:$0xff]   ;;  %v482_v22 = vld [vmem:[%s624_s1 + $0x10] sm:$0xff]  }
   0x8   :  { %419 = vmatpush3.bf16.msra.mxu0 %v466_v6  ;;  %v475_v15 = vld [vmem:[%s624_s1 + $0xa0] sm:$0xff]   ;;  %v479_v19 = vld [vmem:[%s624_s1 + $0x98] sm:$0xff]   ;;  %v483_v23 = vld [vmem:[%s624_s1 + $0x90] sm:$0xff]  }
   0x9   :  { %441 = vmatpush3.bf16.msra.mxu1 %v467_v7  ;;  %420 = vmatprep.subr.bf16.mxu0 %v468_v8  ;;  %v484_v24 = vld [vmem:[%s624_s1 + $0x48] sm:$0xff]   ;;  %v488_v28 = vld [vmem:[%s624_s1 + $0x40] sm:$0xff]  }
   0xa   :  { %442 = vmatprep.subr.bf16.mxu1 %v469_v9  ;;  %v485_v25 = vld [vmem:[%s624_s1 + $0xc8] sm:$0xff]   ;;  %v489_v29 = vld [vmem:[%s624_s1 + $0xc0] sm:$0xff]  }
   0xb   :  { %v486_v26 = vld [vmem:[%s624_s1 + $0x8] sm:$0xff]   ;;  %v490_v30 = vld [vmem:[%s624_s1] sm:$0xff]  }
   0xc   :  { %421 = vmatpush3.bf16.msra.mxu0 %v470_v10  ;;  %v487_v27 = vld [vmem:[%s624_s1 + $0x88] sm:$0xff]   ;;  %v491_v31 = vld [vmem:[%s624_s1 + $0x80] sm:$0xff]  }
   0xd   :  { %443 = vmatpush3.bf16.msra.mxu1 %v471_v11  ;;  %422 = vmatprep.subr.bf16.mxu0 %v472_v12  ;;  %v15_v32 = vld [vmem:[%s625_s0] sm:$0xff]  ;;  %v16_v33 = vld [vmem:[%s625_s0 + $0x8] sm:$0xff] }
   0xe   :  { %444 = vmatprep.subr.bf16.mxu1 %v473_v13  ;;  %v380_v34 = vcombine.low %v15_v32, %v15_v32  ;;  %v381_v35 = vcombine.high %v15_v32, %v15_v32  ;;  %v382_v36 = vcombine.low %v16_v33, %v16_v33  ;;  %v383_v37 = vcombine.high %v16_v33, %v16_v33  ;;  %v379_v40 = vld [vmem:[%s626_s2] ss:$0 sm:$0xff] }
  0x10   :  { %423 = vmatpush3.bf16.msra.mxu0 %v474_v14  ;;  %326 = vmatprep.mubr.bf16.mxu0 %v381_v35 }
  0x11   :  { %445 = vmatpush3.bf16.msra.mxu1 %v475_v15  ;;  %424 = vmatprep.subr.bf16.mxu0 %v476_v16 }
  0x12   :  { %446 = vmatprep.subr.bf16.mxu1 %v477_v17  ;;  %366 = vmatprep.mubr.bf16.mxu1 %v383_v37 }
  0x14   :  { %425 = vmatpush3.bf16.msra.mxu0 %v478_v18 }
  0x15   :  { %447 = vmatpush3.bf16.msra.mxu1 %v479_v19  ;;  %426 = vmatprep.subr.bf16.mxu0 %v480_v20 }
  0x16   :  { %448 = vmatprep.subr.bf16.mxu1 %v481_v21 }
  0x18   :  { %427 = vmatpush3.bf16.msra.mxu0 %v482_v22 }
  0x19   :  { %449 = vmatpush3.bf16.msra.mxu1 %v483_v23  ;;  %428 = vmatprep.subr.bf16.mxu0 %v484_v24 }
  0x1a   :  { %450 = vmatprep.subr.bf16.mxu1 %v485_v25 }
  0x1c   :  { %429 = vmatpush3.bf16.msra.mxu0 %v486_v26 }
  0x1d   :  { %451 = vmatpush3.bf16.msra.mxu1 %v487_v27  ;;  %430 = vmatprep.subr.bf16.mxu0 %v488_v28 }
  0x1e   :  { %452 = vmatprep.subr.bf16.mxu1 %v489_v29 }
  0x20   :  { %431 = vmatpush3.bf16.msra.mxu0 %v490_v30 }
  0x21   :  { %453 = vmatpush3.bf16.msra.mxu1 %v491_v31 }
  0x23   :  { %327 = vmatmul.mubr.bf16.vlgmr.msra.gmra.mxu0 %v380_v34 }
  0x24   :  { %367 = vmatmul.mubr.bf16.vlgmr.msra.gmra.mxu1 %v382_v36 }
  0xe3   :  { %v432_v38 = vpop.f32.mrf.mxu0 }
  0xe4   :  { %v454_v39 = vpop.f32.mrf.mxu1 }
  0xe5   :  { %v433_v41 = vpop.f32.mrf.mxu0 }
  0xe6   :  { %v455_v42 = vpop.f32.mrf.mxu1  ;;  %v434_v43 = vadd.f32 %v433_v41, %v432_v38 }
  0xe7   :  { %v435_v44 = vpop.f32.mrf.mxu0  ;;  %v456_v47 = vadd.f32 %v455_v42, %v454_v39 }
  0xe8   :  { %v457_v45 = vpop.f32.mrf.mxu1  ;;  %v329_v46 = vadd.f32 %v434_v43, %v379_v40 }
  0xe9   :  { %v436_v48 = vpop.f32.mrf.mxu0 }
  0xea   :  { %v458_v49 = vpop.f32.mrf.mxu1  ;;  %v369_v50 = vadd.f32 %v456_v47, %v329_v46 }
  0xec   :  { %374 = vst [vmem:[%s627_s3] sm:$0xff] %v369_v50 }

// kernel: human_vqvae_forward.25
= control target key start
LH: loop header
LB: loop body
LE: loop exit
PB: predicated region body
PF: predicated region fallthrough
CT: control target
= control target key end

     0   :  { %v420_v0 = vmov 0.0   ;;  %vm421_vm0 = vmmov 0   ;;  %s526_s1 = inlined_call_operand.vmem [shape: bf16[384,128], index: 1, kind: input, shape index: {}]   ;;  %s527_s0 = inlined_call_operand.vmem [shape: bf16[8,384], index: 0, kind: input, shape index: {}]   ;;  %s528_s2 = inlined_call_operand.vmem [shape: f32[1,128], index: 2, kind: input, shape index: {}]   ;;  %s529_s3 = inlined_call_operand.vmem [shape: f32[8,128], index: 3, kind: output, shape index: {}]  }
   0x1   :  { %371 = vmatprep.subr.bf16.mxu1 %v420_v0  ;;  %v393_v1 = vld [vmem:[%s526_s1 + $0x78] sm:$0xff]   ;;  %387 = vmatprep.mubr.msk.bf16.mxu1 %vm421_vm0, %v420_v0  ;;  %v396_v4 = vld [vmem:[%s526_s1 + $0x70] sm:$0xff]   ;;  %v399_v7 = vld [vmem:[%s526_s1 + $0x68] sm:$0xff]  }
   0x2   :  { %v394_v2 = vld [vmem:[%s526_s1 + $0xb8] sm:$0xff]   ;;  %340 = vmatprep.subr.bf16.mxu0 %v393_v1  ;;  %v397_v5 = vld [vmem:[%s526_s1 + $0xb0] sm:$0xff]   ;;  %v400_v8 = vld [vmem:[%s526_s1 + $0xa8] sm:$0xff]  }
   0x3   :  { %v395_v3 = vld [vmem:[%s526_s1 + $0x38] sm:$0xff]   ;;  %372 = vmatpush3.bf16.msra.mxu1 %v394_v2  ;;  %v398_v6 = vld [vmem:[%s526_s1 + $0x30] sm:$0xff]   ;;  %v401_v9 = vld [vmem:[%s526_s1 + $0x28] sm:$0xff]  }
   0x4   :  { %341 = vmatpush3.bf16.msra.mxu0 %v395_v3  ;;  %373 = vmatprep.subr.bf16.mxu1 %v420_v0  ;;  %v402_v10 = vld [vmem:[%s526_s1 + $0x60] sm:$0xff]   ;;  %v405_v13 = vld [vmem:[%s526_s1 + $0x58] sm:$0xff]   ;;  %v408_v16 = vld [vmem:[%s526_s1 + $0x50] sm:$0xff]  }
   0x5   :  { %342 = vmatprep.subr.bf16.mxu0 %v396_v4  ;;  %v403_v11 = vld [vmem:[%s526_s1 + $0xa0] sm:$0xff]   ;;  %v406_v14 = vld [vmem:[%s526_s1 + $0x98] sm:$0xff]   ;;  %v409_v17 = vld [vmem:[%s526_s1 + $0x90] sm:$0xff]  }
   0x6   :  { %v404_v12 = vld [vmem:[%s526_s1 + $0x20] sm:$0xff]   ;;  %v407_v15 = vld [vmem:[%s526_s1 + $0x18] sm:$0xff]   ;;  %v410_v18 = vld [vmem:[%s526_s1 + $0x10] sm:$0xff]  }
   0x7   :  { %374 = vmatpush3.bf16.msra.mxu1 %v397_v5  ;;  %v411_v19 = vld [vmem:[%s526_s1 + $0x48] sm:$0xff]   ;;  %v15_v22 = vld [vmem:[%s527_s0] sm:$0xff] }
   0x8   :  { %343 = vmatpush3.bf16.msra.mxu0 %v398_v6  ;;  %375 = vmatprep.subr.bf16.mxu1 %v420_v0  ;;  %v412_v20 = vld [vmem:[%s526_s1 + $0x88] sm:$0xff]   ;;  %v414_v23 = vld [vmem:[%s526_s1 + $0x40] sm:$0xff]   ;;  %v314_v24 = vcombine.high %v15_v22, %v15_v22  ;;  %v313_v28 = vcombine.low %v15_v22, %v15_v22 }
   0x9   :  { %344 = vmatprep.subr.bf16.mxu0 %v399_v7  ;;  %v413_v21 = vld [vmem:[%s526_s1 + $0x8] sm:$0xff]   ;;  %v415_v25 = vld [vmem:[%s526_s1 + $0x80] sm:$0xff]  }
   0xa   :  { %259 = vmatprep.mubr.bf16.mxu0 %v314_v24  ;;  %v416_v26 = vld [vmem:[%s526_s1] sm:$0xff]   ;;  %v419_v27 = vld [vmem:[%s527_s0 + $0x8] ss:$0 sps:$4 sm:$0xff]  }
   0xb   :  { %376 = vmatpush3.bf16.msra.mxu1 %v400_v8  ;;  %v312_v32 = vld [vmem:[%s528_s2] ss:$0 sm:$0xff] }
   0xc   :  { %345 = vmatpush3.bf16.msra.mxu0 %v401_v9  ;;  %377 = vmatprep.subr.bf16.mxu1 %v420_v0 }
   0xd   :  { %346 = vmatprep.subr.bf16.mxu0 %v402_v10 }
   0xf   :  { %378 = vmatpush3.bf16.msra.mxu1 %v403_v11 }
  0x10   :  { %347 = vmatpush3.bf16.msra.mxu0 %v404_v12  ;;  %379 = vmatprep.subr.bf16.mxu1 %v420_v0 }
  0x11   :  { %348 = vmatprep.subr.bf16.mxu0 %v405_v13 }
  0x13   :  { %380 = vmatpush3.bf16.msra.mxu1 %v406_v14 }
  0x14   :  { %349 = vmatpush3.bf16.msra.mxu0 %v407_v15  ;;  %381 = vmatprep.subr.bf16.mxu1 %v420_v0 }
  0x15   :  { %350 = vmatprep.subr.bf16.mxu0 %v408_v16 }
  0x17   :  { %382 = vmatpush3.bf16.msra.mxu1 %v409_v17 }
  0x18   :  { %351 = vmatpush3.bf16.msra.mxu0 %v410_v18  ;;  %383 = vmatprep.subr.bf16.mxu1 %v420_v0 }
  0x19   :  { %352 = vmatprep.subr.bf16.mxu0 %v411_v19 }
  0x1b   :  { %384 = vmatpush3.bf16.msra.mxu1 %v412_v20 }
  0x1c   :  { %353 = vmatpush3.bf16.msra.mxu0 %v413_v21  ;;  %385 = vmatprep.subr.bf16.mxu1 %v420_v0 }
  0x1d   :  { %354 = vmatprep.subr.bf16.mxu0 %v414_v23 }
  0x1f   :  { %386 = vmatpush3.bf16.msra.mxu1 %v415_v25 }
  0x20   :  { %355 = vmatpush3.bf16.msra.mxu0 %v416_v26 }
  0x22   :  { %388 = vmatmul.mubr.bf16.vlgmr.msra.gmra.mxu1 %v419_v27 }
  0x23   :  { %260 = vmatmul.mubr.bf16.vlgmr.msra.gmra.mxu0 %v313_v28 }
  0xe2   :  { %v301_v29 = vpop.f32.mrf.mxu1 }
  0xe3   :  { %v356_v30 = vpop.f32.mrf.mxu0 }
  0xe4   :  { %v389_v31 = vpop.f32.mrf.mxu1 }
  0xe5   :  { %v357_v33 = vpop.f32.mrf.mxu0 }
  0xe6   :  { %v358_v34 = vadd.f32 %v357_v33, %v356_v30  ;;  %v304_v35 = vpop.f32.mrf.mxu1 }
  0xe7   :  { %v359_v36 = vpop.f32.mrf.mxu0 }
  0xe8   :  { %v262_v37 = vadd.f32 %v358_v34, %v312_v32  ;;  %v390_v38 = vpop.f32.mrf.mxu1 }
  0xe9   :  { %v360_v39 = vpop.f32.mrf.mxu0 }
  0xea   :  { %v302_v40 = vadd.f32 %v301_v29, %v262_v37 }
  0xec   :  { %307 = vst [vmem:[%s529_s3] sm:$0xff] %v302_v40 }

// kernel: human_vqvae_forward.23
= control target key start
LH: loop header
LB: loop body
LE: loop exit
PB: predicated region body
PF: predicated region fallthrough
CT: control target
= control target key end

     0   :  { %v590_v1 = vmov 0.0   ;;  %vm591_vm0 = vmmov 0   ;;  %v592_v25 = vmov 0   ;;  %s762_s1 = inlined_call_operand.vmem [shape: bf16[384,128], index: 1, kind: input, shape index: {}]   ;;  %s763_s0 = inlined_call_operand.vmem [shape: bf16[8,384], index: 0, kind: input, shape index: {}]   ;;  %s764_s3 = inlined_call_operand.vmem [shape: bf16[128,128], index: 3, kind: input, shape index: {}]   ;;  %s765_s2 = inlined_call_operand.vmem [shape: f32[1,128], index: 2, kind: input, shape index: {}]   ;;  %s766_s4 = inlined_call_operand.vmem [shape: f32[1,128], index: 4, kind: input, shape index: {}]   ;;  %s767_s5 = inlined_call_operand.vmem [shape: f32[8,128], index: 5, kind: input, shape index: {}]   ;;  %s768_s6 = inlined_call_operand.vmem [shape: f32[8,128], index: 6, kind: output, shape index: {}]  }
   0x1   :  { %v558_v0 = vld [vmem:[%s762_s1 + $0x78] sm:$0xff]   ;;  %515 = vmatprep.subr.bf16.mxu1 %v590_v1  ;;  %531 = vmatprep.mubr.msk.bf16.mxu1 %vm591_vm0, %v590_v1  ;;  %v561_v4 = vld [vmem:[%s762_s1 + $0x70] sm:$0xff]   ;;  %v564_v7 = vld [vmem:[%s762_s1 + $0x68] sm:$0xff]  }
   0x2   :  { %v559_v2 = vld [vmem:[%s762_s1 + $0x38] sm:$0xff]   ;;  %475 = vmatprep.subr.bf16.mxu0 %v558_v0  ;;  %v562_v5 = vld [vmem:[%s762_s1 + $0x30] sm:$0xff]   ;;  %v565_v8 = vld [vmem:[%s762_s1 + $0x28] sm:$0xff]  }
   0x3   :  { %v560_v3 = vld [vmem:[%s762_s1 + $0xb8] sm:$0xff]   ;;  %476 = vmatpush3.bf16.msra.mxu0 %v559_v2  ;;  %v563_v6 = vld [vmem:[%s762_s1 + $0xb0] sm:$0xff]   ;;  %v566_v9 = vld [vmem:[%s762_s1 + $0xa8] sm:$0xff]  }
   0x4   :  { %516 = vmatpush3.bf16.msra.mxu1 %v560_v3  ;;  %477 = vmatprep.subr.bf16.mxu0 %v561_v4  ;;  %v567_v10 = vld [vmem:[%s762_s1 + $0x60] sm:$0xff]   ;;  %v570_v13 = vld [vmem:[%s762_s1 + $0x58] sm:$0xff]   ;;  %v573_v16 = vld [vmem:[%s762_s1 + $0x50] sm:$0xff]  }
   0x5   :  { %517 = vmatprep.subr.bf16.mxu1 %v590_v1  ;;  %v568_v11 = vld [vmem:[%s762_s1 + $0x20] sm:$0xff]   ;;  %v571_v14 = vld [vmem:[%s762_s1 + $0x18] sm:$0xff]   ;;  %v574_v17 = vld [vmem:[%s762_s1 + $0x10] sm:$0xff]  }
   0x6   :  { %v569_v12 = vld [vmem:[%s762_s1 + $0xa0] sm:$0xff]   ;;  %v572_v15 = vld [vmem:[%s762_s1 + $0x98] sm:$0xff]   ;;  %v575_v18 = vld [vmem:[%s762_s1 + $0x90] sm:$0xff]  }
   0x7   :  { %478 = vmatpush3.bf16.msra.mxu0 %v562_v5  ;;  %v576_v19 = vld [vmem:[%s762_s1 + $0x48] sm:$0xff]   ;;  %v579_v22 = vld [vmem:[%s762_s1 + $0x40] sm:$0xff]   ;;  %v582_v33 = vld [vmem:[%s764_s3 + $0x38] sm:$0xff]  }
   0x8   :  { %518 = vmatpush3.bf16.msra.mxu1 %v563_v6  ;;  %479 = vmatprep.subr.bf16.mxu0 %v564_v7  ;;  %v577_v20 = vld [vmem:[%s762_s1 + $0x8] sm:$0xff]   ;;  %v24_v23 = vld [vmem:[%s763_s0] sm:$0xff]  ;;  %v583_v34 = vld [vmem:[%s764_s3 + $0x30] sm:$0xff]  }
   0x9   :  { %519 = vmatprep.subr.bf16.mxu1 %v590_v1  ;;  %v578_v21 = vld [vmem:[%s762_s1 + $0x88] sm:$0xff]   ;;  %v26_v26 = vmax.bf16 %v592_v25, %v24_v23  ;;  %v580_v27 = vld [vmem:[%s762_s1] sm:$0xff]   ;;  %v586_v37 = vld [vmem:[%s764_s3 + $0x18] sm:$0xff]  }
   0xa   :  { %v25_v24 = vld [vmem:[%s763_s0 + $0x8] sm:$0xf]  ;;  %v581_v30 = vld [vmem:[%s762_s1 + $0x80] sm:$0xff]   ;;  %v587_v38 = vld [vmem:[%s764_s3 + $0x10] sm:$0xff]  }
   0xb   :  { %480 = vmatpush3.bf16.msra.mxu0 %v565_v8  ;;  %v27_v28 = vmax.bf16 %v592_v25, %v25_v24  ;;  %v440_v29 = vcombine.high %v26_v26, %v26_v26  ;;  %v439_v31 = vcombine.low %v26_v26, %v26_v26  ;;  %v584_v35 = vld [vmem:[%s764_s3 + $0x28] sm:$0xff]   ;;  %v585_v36 = vld [vmem:[%s764_s3 + $0x20] sm:$0xff]  }
   0xc   :  { %520 = vmatpush3.bf16.msra.mxu1 %v566_v9  ;;  %481 = vmatprep.subr.bf16.mxu0 %v567_v10  ;;  %v588_v39 = vld [vmem:[%s764_s3 + $0x8] sm:$0xff]   ;;  %v589_v40 = vld [vmem:[%s764_s3] sm:$0xff]  }
   0xd   :  { %521 = vmatprep.subr.bf16.mxu1 %v590_v1  ;;  %270 = vmatprep.mubr.bf16.mxu0 %v440_v29  ;;  %v441_v32 = vcombine.low %v27_v28, %v27_v28  ;;  %v438_v43 = vld [vmem:[%s765_s2] ss:$0 sm:$0xff] }
   0xe   :  { %v466_v55 = vld [vmem:[%s766_s4] ss:$0 sm:$0xff] }
   0xf   :  { %482 = vmatpush3.bf16.msra.mxu0 %v568_v11  ;;  %v431_v57 = vld [vmem:[%s767_s5] sm:$0xff] }
  0x10   :  { %522 = vmatpush3.bf16.msra.mxu1 %v569_v12  ;;  %483 = vmatprep.subr.bf16.mxu0 %v570_v13 }
  0x11   :  { %523 = vmatprep.subr.bf16.mxu1 %v590_v1 }
  0x13   :  { %484 = vmatpush3.bf16.msra.mxu0 %v571_v14 }
  0x14   :  { %524 = vmatpush3.bf16.msra.mxu1 %v572_v15  ;;  %485 = vmatprep.subr.bf16.mxu0 %v573_v16 }
  0x15   :  { %525 = vmatprep.subr.bf16.mxu1 %v590_v1 }
  0x17   :  { %486 = vmatpush3.bf16.msra.mxu0 %v574_v17 }
  0x18   :  { %526 = vmatpush3.bf16.msra.mxu1 %v575_v18  ;;  %487 = vmatprep.subr.bf16.mxu0 %v576_v19 }
  0x19   :  { %527 = vmatprep.subr.bf16.mxu1 %v590_v1 }
  0x1b   :  { %488 = vmatpush3.bf16.msra.mxu0 %v577_v20 }
  0x1c   :  { %528 = vmatpush3.bf16.msra.mxu1 %v578_v21  ;;  %489 = vmatprep.subr.bf16.mxu0 %v579_v22 }
  0x1d   :  { %529 = vmatprep.subr.bf16.mxu1 %v590_v1 }
  0x1f   :  { %490 = vmatpush3.bf16.msra.mxu0 %v580_v27 }
  0x20   :  { %530 = vmatpush3.bf16.msra.mxu1 %v581_v30  ;;  %535 = vmatprep.subr.bf16.mxu0 %v590_v1 }
  0x22   :  { %271 = vmatmul.mubr.bf16.vlgmr.msra.gmra.mxu0 %v439_v31 }
  0x23   :  { %532 = vmatmul.mubr.bf16.vlgmr.msra.gmra.mxu1 %v441_v32  ;;  %536 = vmatpush3.bf16.msra.mxu0 %v582_v33 }
  0x24   :  { %537 = vmatprep.subr.bf16.mxu0 %v590_v1  ;;  %551 = vmatprep.mubr.msk.bf16.mxu0 %vm591_vm0, %v590_v1 }
  0x27   :  { %538 = vmatpush3.bf16.msra.mxu0 %v583_v34 }
  0x28   :  { %539 = vmatprep.subr.bf16.mxu0 %v590_v1 }
  0x2b   :  { %540 = vmatpush3.bf16.msra.mxu0 %v584_v35 }
  0x2c   :  { %541 = vmatprep.subr.bf16.mxu0 %v590_v1 }
  0x2f   :  { %542 = vmatpush3.bf16.msra.mxu0 %v585_v36 }
  0x30   :  { %543 = vmatprep.subr.bf16.mxu0 %v590_v1 }
  0x33   :  { %544 = vmatpush3.bf16.msra.mxu0 %v586_v37 }
  0x34   :  { %545 = vmatprep.subr.bf16.mxu0 %v590_v1 }
  0x37   :  { %546 = vmatpush3.bf16.msra.mxu0 %v587_v38 }
  0x38   :  { %547 = vmatprep.subr.bf16.mxu0 %v590_v1 }
  0x3b   :  { %548 = vmatpush3.bf16.msra.mxu0 %v588_v39 }
  0x3c   :  { %549 = vmatprep.subr.bf16.mxu0 %v590_v1 }
  0x3f   :  { %550 = vmatpush3.bf16.msra.mxu0 %v589_v40 }
  0xe2   :  { %v491_v41 = vpop.f32.mrf.mxu0 }
  0xe3   :  { %v312_v42 = vpop.f32.mrf.mxu1 }
  0xe4   :  { %v492_v44 = vpop.f32.mrf.mxu0 }
  0xe5   :  { %v493_v45 = vadd.f32 %v492_v44, %v491_v41  ;;  %v533_v46 = vpop.f32.mrf.mxu1 }
  0xe6   :  { %v494_v47 = vpop.f32.mrf.mxu0 }
  0xe7   :  { %v273_v48 = vadd.f32 %v493_v45, %v438_v43  ;;  %v315_v49 = vpop.f32.mrf.mxu1 }
  0xe8   :  { %v495_v50 = vpop.f32.mrf.mxu0 }
  0xe9   :  { %v313_v51 = vadd.f32 %v312_v42, %v273_v48  ;;  %v534_v52 = vpop.f32.mrf.mxu1 }
  0xeb   :  { %v318_v53 = vmax.f32 %v313_v51, 0.0 }
  0xed   :  { %v319_v54 = vpack.c.bf16 %v318_v53, %v318_v53 }
  0xef   :  { %552 = vmatmul.mubr.bf16.vlgmr.msra.gmra.mxu0 %v319_v54 }
 0x1af   :  { %v425_v56 = vpop.f32.mrf.mxu0 }
 0x1b0   :  { %v426_v58 = vadd.f32 %v466_v55, %v425_v56 }
 0x1b1   :  { %v553_v59 = vpop.f32.mrf.mxu0 }
 0x1b2   :  { %v432_v60 = vadd.f32 %v431_v57, %v426_v58 }
 0x1b3   :  { %v428_v61 = vpop.f32.mrf.mxu0 }
 0x1b4   :  { %433 = vst [vmem:[%s768_s6] sm:$0xff] %v432_v60 }
 0x1b5   :  { %v554_v62 = vpop.f32.mrf.mxu0 }

// kernel: human_vqvae_forward.26
= control target key start
LH: loop header
LB: loop body
LE: loop exit
PB: predicated region body
PF: predicated region fallthrough
CT: control target
= control target key end

     0   :  { %11 = vsyncpa [#allocation5], 0  ;;  %v470_v1 = vmov 0.0   ;;  %vm471_vm0 = vmmov 0   ;;  %s615_s0 = inlined_call_operand.vmem [shape: f32[8,128], index: 0, kind: input, shape index: {}]   ;;  %s616_s1 = inlined_call_operand.vmem [shape: f32[128,128], index: 1, kind: input, shape index: {}]   ;;  %s617_s2 = inlined_call_operand.vmem [shape: f32[1,128], index: 2, kind: input, shape index: {}]   ;;  %s618_s3 = inlined_call_operand.vmem [shape: f32[8,128], index: 3, kind: output, shape index: {0}]   ;;  %s619_s4 = inlined_call_operand.hbm [shape: f32[1,1], index: 4, kind: output, shape index: {1}]   ;;  %s620_s5 = inlined_call_operand.hbm [shape: f32[1,1], index: 5, kind: output, shape index: {2}]  }
   0x1   :  { %v42_v0 = vld [vmem:[%s616_s1 + $0x78] sm:$0xff]  ;;  %347 = vmatprep.subr.mxu0 %v470_v1  ;;  %23 = vst [vmem:[#allocation2] sm:$0x1] %v470_v1  ;;  %379 = vmatprep.mubr.msk.f32.mxu0 %vm471_vm0, %v470_v1  ;;  %v41_v2 = vld [vmem:[%s616_s1 + $0x70] sm:$0xff]  ;;  %v521_v3 = vld [vmem:[%s615_s0] sm:$0xff] }
   0x2   :  { %348 = vmatpush3.xpose.msra.mxu0 %v42_v0  ;;  %382 = vmatprep.subr.mxu1 %v470_v1  ;;  %v40_v4 = vld [vmem:[%s616_s1 + $0x68] sm:$0xff]  ;;  %v43_v5 = vmul.f32 %v521_v3, %v521_v3 }
   0x3   :  { %349 = vmatprep.subr.mxu0 %v470_v1  ;;  %383 = vmatpush3.msra.mxu1 %v42_v0 }
   0x4   :  { %384 = vmatprep.subr.mxu1 %v470_v1  ;;  %414 = vmatprep.mubr.msk.f32.mxu1 %vm471_vm0, %v470_v1 }
   0x5   :  { %385 = vmatpush3.msra.mxu1 %v41_v2 }
   0x6   :  { %350 = vmatpush3.xpose.msra.mxu0 %v41_v2  ;;  %386 = vmatprep.subr.mxu1 %v470_v1 }
   0x7   :  { %12 = vsyncpa [#allocation7], 0  ;;  %351 = vmatprep.subr.mxu0 %v470_v1  ;;  %387 = vmatpush3.msra.mxu1 %v40_v4  ;;  %v39_v6 = vld [vmem:[%s616_s1 + $0x60] sm:$0xff]  ;;  %v38_v7 = vld [vmem:[%s616_s1 + $0x58] sm:$0xff]  ;;  %v126_v26 = vlaneseq  ;;  %v472_v42 = vmov 1.0   ;;  %vm270_vm4 = vcmask 1040384  }
   0x8   :  { %44 = vadd.xlane.f32.xlu0 %v43_v5  ;;  %388 = vmatprep.subr.mxu1 %v470_v1  ;;  %v37_v8 = vld [vmem:[%s616_s1 + $0x50] sm:$0xff]  ;;  %v36_v9 = vld [vmem:[%s616_s1 + $0x48] sm:$0xff]  ;;  %v35_v10 = vld [vmem:[%s616_s1 + $0x40] sm:$0xff]  ;;  %vm24_vm5 = vcmask 0   ;;  %s473_s0 = smov [#allocation6]  }
   0x9   :  { %389 = vmatpush3.msra.mxu1 %v39_v6  ;;  %v34_v11 = vld [vmem:[%s616_s1 + $0x38] sm:$0xff]  ;;  %v33_v12 = vld [vmem:[%s616_s1 + $0x30] sm:$0xff]  ;;  %v32_v13 = vld [vmem:[%s616_s1 + $0x28] sm:$0xff]  ;;  %v127_v27 = vand.u32 127, %v126_v26  ;;  %25 = vst.msk [vmem:[#allocation3] sm:$0x1] %vm24_vm5, %v470_v1 }
   0xa   :  { %352 = vmatpush3.xpose.msra.mxu0 %v40_v4  ;;  %390 = vmatprep.subr.mxu1 %v470_v1  ;;  %v31_v14 = vld [vmem:[%s616_s1 + $0x20] sm:$0xff]  ;;  %v30_v15 = vld [vmem:[%s616_s1 + $0x18] sm:$0xff]  ;;  %v29_v16 = vld [vmem:[%s616_s1 + $0x10] sm:$0xff]  ;;  %s296_s28 = sshll.u32 %s473_s0, 4  ;;  %s297_s28 = int_to_ptr.vmem [resolvable:$true] %s296_s28 }
   0xb   :  { %353 = vmatprep.subr.mxu0 %v470_v1  ;;  %391 = vmatpush3.msra.mxu1 %v38_v7  ;;  %v28_v17 = vld [vmem:[%s616_s1 + $0x8] sm:$0xff]  ;;  %v27_v18 = vld [vmem:[%s616_s1] sm:$0xff]  ;;  %s426_s29 = scalar_lea.vmem %s297_s28, 16  ;;  %s430_s30 = scalar_lea.vmem %s297_s28, 32 }
   0xc   :  { %392 = vmatprep.subr.mxu1 %v470_v1  ;;  %v310_v19 = vld [vmem:[%s617_s2] ss:$0 sm:$0xff]  ;;  %p427_p0 = scmp.ne.s32.totalorder %s297_s28, %s426_s29  ;;  %p431_p1 = scmp.lt.s32.totalorder %s297_s28, %s297_s28 }
   0xd   :  { %393 = vmatpush3.msra.mxu1 %v37_v8  ;;  %v245_v48 = vld [vmem:[#allocation2] sm:$0x1]  ;;  %p432_p2 = scmp.lt.s32.totalorder %s430_s30, %s426_s29 }
   0xe   :  { %354 = vmatpush3.xpose.msra.mxu0 %v39_v6  ;;  %394 = vmatprep.subr.mxu1 %v470_v1 }
   0xf   :  { %355 = vmatprep.subr.mxu0 %v470_v1  ;;  %395 = vmatpush3.msra.mxu1 %v36_v9  ;;  %p433_p3 = por %p432_p2, %p431_p1 }
  0x10   :  { %396 = vmatprep.subr.mxu1 %v470_v1 }
  0x11   :  { %397 = vmatpush3.msra.mxu1 %v35_v10  ;;  %p434_p4 = pnand %p433_p3, %p427_p0 }
  0x12   :  { %356 = vmatpush3.xpose.msra.mxu0 %v38_v7  ;;  %398 = vmatprep.subr.mxu1 %v470_v1 }
  0x13   :  { %357 = vmatprep.subr.mxu0 %v470_v1  ;;  %399 = vmatpush3.msra.mxu1 %v34_v11 }
  0x14   :  { %400 = vmatprep.subr.mxu1 %v470_v1 }
  0x15   :  { %401 = vmatpush3.msra.mxu1 %v33_v12 }
  0x16   :  { %358 = vmatpush3.xpose.msra.mxu0 %v37_v8  ;;  %402 = vmatprep.subr.mxu1 %v470_v1 }
  0x17   :  { %359 = vmatprep.subr.mxu0 %v470_v1  ;;  %403 = vmatpush3.msra.mxu1 %v32_v13 }
  0x18   :  { %404 = vmatprep.subr.mxu1 %v470_v1 }
  0x19   :  { %405 = vmatpush3.msra.mxu1 %v31_v14 }
  0x1a   :  { %360 = vmatpush3.xpose.msra.mxu0 %v36_v9  ;;  %406 = vmatprep.subr.mxu1 %v470_v1 }
  0x1b   :  { %361 = vmatprep.subr.mxu0 %v470_v1  ;;  %407 = vmatpush3.msra.mxu1 %v30_v15 }
  0x1c   :  { %408 = vmatprep.subr.mxu1 %v470_v1 }
  0x1d   :  { %409 = vmatpush3.msra.mxu1 %v29_v16 }
  0x1e   :  { %362 = vmatpush3.xpose.msra.mxu0 %v35_v10  ;;  %410 = vmatprep.subr.mxu1 %v470_v1 }
  0x1f   :  { %363 = vmatprep.subr.mxu0 %v470_v1  ;;  %411 = vmatpush3.msra.mxu1 %v28_v17 }
  0x20   :  { %412 = vmatprep.subr.mxu1 %v470_v1 }
  0x21   :  { %413 = vmatpush3.msra.mxu1 %v27_v18 }
  0x22   :  { %364 = vmatpush3.xpose.msra.mxu0 %v34_v11 }
  0x23   :  { %365 = vmatprep.subr.mxu0 %v470_v1 }
  0x26   :  { %366 = vmatpush3.xpose.msra.mxu0 %v33_v12 }
  0x27   :  { %367 = vmatprep.subr.mxu0 %v470_v1 }
  0x2a   :  { %368 = vmatpush3.xpose.msra.mxu0 %v32_v13 }
  0x2b   :  { %369 = vmatprep.subr.mxu0 %v470_v1 }
  0x2e   :  { %370 = vmatpush3.xpose.msra.mxu0 %v31_v14 }
  0x2f   :  { %371 = vmatprep.subr.mxu0 %v470_v1 }
  0x32   :  { %372 = vmatpush3.xpose.msra.mxu0 %v30_v15 }
  0x33   :  { %373 = vmatprep.subr.mxu0 %v470_v1 }
  0x36   :  { %374 = vmatpush3.xpose.msra.mxu0 %v29_v16 }
  0x37   :  { %375 = vmatprep.subr.mxu0 %v470_v1 }
  0x3a   :  { %376 = vmatpush3.xpose.msra.mxu0 %v28_v17 }
  0x3b   :  { %377 = vmatprep.subr.mxu0 %v470_v1 }
  0x3e   :  { %378 = vmatpush3.xpose.msra.mxu0 %v27_v18 }
  0x41   :  { %380 = vmatmul.mubr.f32.vlgmr.msra.gmra.mxu0 %v521_v3 }
  0x91   :  { %v45_v20 = vpop.xlane.xlu0 %44 }
  0x92   :  { %v123_v21 = vadd.f32 %v310_v19, %v45_v20 }
 0x101   :  { %v112_v22 = vpop.f32.mrf.mxu0 }
 0x102   :  { %v124_v23 = vmul.f32 2.0, %v112_v22 }
 0x103   :  { %v381_v24 = vpop.f32.mrf.mxu0 }
 0x104   :  { %v125_v25 = vsub.f32 %v123_v21, %v124_v23 }
 0x106   :  { %130 = vmin.xlane.f32.xlu0 %v125_v25 }
 0x18f   :  { %v131_v28 = vpop.xlane.xlu0 %130 }
 0x190   :  { %vm132_vm1 = vcmp.eq.f32.partialorder %v125_v25, %v131_v28 }
 0x191   :  { %v133_v29 = vsel %vm132_vm1, %v127_v27, 128 }
 0x192   :  { %v135_v30 = vshra.s32 %v133_v29, 16  ;;  %v134_v32 = vand.u32 65535, %v133_v29 }
 0x194   :  { %v137_v31 = vcvt.s32.f32 %v135_v30  ;;  %v136_v34 = vcvt.s32.f32 %v134_v32 }
 0x196   :  { %138 = vmin.xlane.f32.xlu1 %v137_v31 }
 0x21f   :  { %v139_v33 = vpop.xlane.xlu1 %138 }
 0x220   :  { %vm140_vm2 = vcmp.eq.f32.partialorder %v137_v31, %v139_v33  ;;  %v145_v36 = vcvt.f32.s32 %v139_v33 }
 0x221   :  { %v141_v35 = vsel %vm140_vm2, %v136_v34, inf }
 0x222   :  { %142 = vmin.xlane.f32.xlu1 %v141_v35  ;;  %v146_v38 = vshll.u32 %v145_v36, 16 }
 0x2ab   :  { %v143_v37 = vpop.xlane.xlu1 %142 }
 0x2ac   :  { %v144_v39 = vcvt.f32.s32 %v143_v37 }
 0x2ae   :  { %v147_v40 = vadd.s32 %v146_v38, %v144_v39 }
 0x2b0   :  { %vm148_vm3 = vcmp.eq.s32.totalorder %v127_v27, %v147_v40 }
 0x2b1   :  { %v311_v41 = vsel %vm148_vm3, 1.0, %v470_v1  ;;  %415 = vmatmul.mubr.msk.f32.vlgmr.msra.gmra.mxu1 %vm148_vm3, %v472_v42 }
 0x2b2   :  { %v247_v43 = vrot.slane %v311_v41, 4 }
 0x2b4   :  { %v248_v44 = vadd.f32 %v311_v41, %v247_v43 }
 0x2b6   :  { %v249_v45 = vrot.slane %v248_v44, 2 }
 0x2b8   :  { %v250_v46 = vadd.f32 %v249_v45, %v248_v44 }
 0x2ba   :  { %v251_v47 = vrot.slane %v250_v46, 1 }
 0x2bc   :  { %v252_v49 = vadd.f32 %v251_v47, %v250_v46 }
 0x2be   :  { %v253_v50 = vadd.f32 %v252_v49, %v245_v48 }
 0x2c0   :  { %254 = vst [vmem:[#allocation2] sm:$0x1] %v253_v50 }
 0x2c7   :  { %v263_v51 = vld [vmem:[#allocation2] sm:$0x1] }
 0x2c8   :  { %v265_v52 = vmul.f32 0.125, %v263_v51 }
 0x2ca   :  { %v266_v53 = vadd.f32 1e-10, %v265_v52 }
 0x2cc   :  { %422 = vlog2.f32 %v266_v53 }
 0x2d9   :  { %v423_v54 = vpop.eup %422 }
 0x2da   :  { %v268_v55 = vmul.f32 0.6931472, %v423_v54 }
 0x2dc   :  { %v269_v56 = vmul.f32 %v268_v55, %v265_v52 }
 0x2de   :  { %v271_v57 = vsel %vm270_vm4, %v269_v56, 0.0 }
 0x2df   :  { %272 = vadd.xlane.f32.xlu1 %v271_v57 }
 0x368   :  { %v273_v58 = vpop.xlane.xlu1 %272 }
 0x369   :  { %v274_v59 = vsub.f32 0.0, %v273_v58 }
 0x36b   :  { %v275_v60 = vmul.f32 1.442695, %v274_v59 }
 0x36d   :  { %424 = vpow2.f32 %v275_v60 }
 0x371   :  { %v217_v61 = vpop.f32.mrf.mxu1 }
 0x372   :  { %221 = vst [vmem:[%s618_s3] sm:$0xff] %v217_v61  ;;  %v230_v62 = vsub.f32 %v217_v61, %v521_v3 }
 0x373   :  { %v416_v63 = vpop.f32.mrf.mxu1 }
 0x374   :  { %v232_v0 = vmul.f32 %v230_v62, %v230_v62 }
 0x376   :  { %233 = vadd.xlane.f32.xlu0 %v232_v0 }
 0x37a   :  { %v425_v2 = vpop.eup %424 }
 0x37b   :  { %277 = vst.msk [vmem:[#allocation6] sm:$0x1] %vm24_vm5, %v425_v2 }
 0x37c   :  { %437 = shalt.err (!%p434_p4)
}
 0x37d   :  { %299 = dma.vmem_to_hbm [thread:$0]  %s297_s28, 16, %s620_s5, [#allocation7]   ;;  %v231_v8 = vld [vmem:[#allocation3] sm:$0x1] }
 0x37e   :  { %s474_s7 = smov [#allocation4]  }
 0x37f   :  { %s286_s8 = sshll.u32 %s474_s7, 4  ;;  %s287_s8 = int_to_ptr.vmem [resolvable:$true] %s286_s8 }
 0x380   :  { %s446_s5 = scalar_lea.vmem %s287_s8, 16  ;;  %s450_s9 = scalar_lea.vmem %s287_s8, 32 }
 0x381   :  { %p447_p5 = scmp.ne.s32.totalorder %s287_s8, %s446_s5  ;;  %p451_p6 = scmp.lt.s32.totalorder %s287_s8, %s287_s8 }
 0x382   :  { %p452_p7 = scmp.lt.s32.totalorder %s450_s9, %s446_s5 }
 0x384   :  { %p453_p8 = por %p452_p7, %p451_p6 }
 0x386   :  { %p454_p9 = pnand %p453_p8, %p447_p5 }
 0x3ff   :  { %v234_v1 = vpop.xlane.xlu0 %233 }
 0x400   :  { %v236_v3 = vrot.slane %v234_v1, 4 }
 0x402   :  { %v237_v4 = vadd.f32 %v236_v3, %v234_v1 }
 0x404   :  { %v238_v5 = vrot.slane %v237_v4, 2 }
 0x406   :  { %v239_v6 = vadd.f32 %v238_v5, %v237_v4 }
 0x408   :  { %v240_v7 = vrot.slane %v239_v6, 1 }
 0x40a   :  { %v241_v9 = vadd.f32 %v240_v7, %v239_v6 }
 0x40c   :  { %v242_v10 = vadd.f32 %v241_v9, %v231_v8 }
 0x40e   :  { %244 = vst.msk [vmem:[#allocation3] sm:$0x1] %vm24_vm5, %v242_v10 }
 0x415   :  { %v258_v11 = vld [vmem:[#allocation3] sm:$0x1] }
 0x416   :  { %v260_v12 = vmul.f32 0.0009765625, %v258_v11 }
 0x418   :  { %v261_v13 = vmul.f32 2.0, %v260_v12 }
 0x41a   :  { %262 = vst.msk [vmem:[#allocation4] sm:$0x1] %vm24_vm5, %v261_v13 }
 0x41b   :  { %457 = shalt.err (!%p454_p9)
}
 0x41c   :  { %289 = dma.vmem_to_hbm [thread:$0]  %s287_s8, 16, %s619_s4, [#allocation5]  }
 0x41d   :  { %466 = dma.done.wait [#allocation5], 16  }
 0x41e   :  { %467 = vsyncadd [#allocation5], 4294967280 }
 0x41f   :  { %468 = dma.done.wait [#allocation7], 16  }
 0x420   :  { %469 = vsyncadd [#allocation7], 4294967280 }
 0x421   :  { %308 = vsyncpa [#allocation5], 1 }
 0x422   :  { %309 = vsyncpa [#allocation7], 1 }

// kernel: human_vqvae_forward.27
= control target key start
LH: loop header
LB: loop body
LE: loop exit
PB: predicated region body
PF: predicated region fallthrough
CT: control target
= control target key end

     0   :  { %v421_v0 = vmov 0.0   ;;  %vm422_vm0 = vmmov 0   ;;  %s527_s1 = inlined_call_operand.vmem [shape: bf16[384,128], index: 1, kind: input, shape index: {}]   ;;  %s528_s0 = inlined_call_operand.vmem [shape: bf16[8,384], index: 0, kind: input, shape index: {}]   ;;  %s529_s2 = inlined_call_operand.vmem [shape: f32[1,128], index: 2, kind: input, shape index: {}]   ;;  %s530_s3 = inlined_call_operand.vmem [shape: f32[8,128], index: 3, kind: output, shape index: {}]  }
   0x1   :  { %372 = vmatprep.subr.bf16.mxu1 %v421_v0  ;;  %v394_v1 = vld [vmem:[%s527_s1 + $0x78] sm:$0xff]   ;;  %388 = vmatprep.mubr.msk.bf16.mxu1 %vm422_vm0, %v421_v0  ;;  %v397_v4 = vld [vmem:[%s527_s1 + $0x70] sm:$0xff]   ;;  %v400_v7 = vld [vmem:[%s527_s1 + $0x68] sm:$0xff]  }
   0x2   :  { %v395_v2 = vld [vmem:[%s527_s1 + $0xb8] sm:$0xff]   ;;  %341 = vmatprep.subr.bf16.mxu0 %v394_v1  ;;  %v398_v5 = vld [vmem:[%s527_s1 + $0xb0] sm:$0xff]   ;;  %v401_v8 = vld [vmem:[%s527_s1 + $0xa8] sm:$0xff]  }
   0x3   :  { %v396_v3 = vld [vmem:[%s527_s1 + $0x38] sm:$0xff]   ;;  %373 = vmatpush3.bf16.msra.mxu1 %v395_v2  ;;  %v399_v6 = vld [vmem:[%s527_s1 + $0x30] sm:$0xff]   ;;  %v402_v9 = vld [vmem:[%s527_s1 + $0x28] sm:$0xff]  }
   0x4   :  { %342 = vmatpush3.bf16.msra.mxu0 %v396_v3  ;;  %374 = vmatprep.subr.bf16.mxu1 %v421_v0  ;;  %v403_v10 = vld [vmem:[%s527_s1 + $0x60] sm:$0xff]   ;;  %v406_v13 = vld [vmem:[%s527_s1 + $0x58] sm:$0xff]   ;;  %v409_v16 = vld [vmem:[%s527_s1 + $0x50] sm:$0xff]  }
   0x5   :  { %343 = vmatprep.subr.bf16.mxu0 %v397_v4  ;;  %v404_v11 = vld [vmem:[%s527_s1 + $0xa0] sm:$0xff]   ;;  %v407_v14 = vld [vmem:[%s527_s1 + $0x98] sm:$0xff]   ;;  %v410_v17 = vld [vmem:[%s527_s1 + $0x90] sm:$0xff]  }
   0x6   :  { %v405_v12 = vld [vmem:[%s527_s1 + $0x20] sm:$0xff]   ;;  %v408_v15 = vld [vmem:[%s527_s1 + $0x18] sm:$0xff]   ;;  %v411_v18 = vld [vmem:[%s527_s1 + $0x10] sm:$0xff]  }
   0x7   :  { %375 = vmatpush3.bf16.msra.mxu1 %v398_v5  ;;  %v412_v19 = vld [vmem:[%s527_s1 + $0x48] sm:$0xff]   ;;  %v15_v22 = vld [vmem:[%s528_s0] sm:$0xff] }
   0x8   :  { %344 = vmatpush3.bf16.msra.mxu0 %v399_v6  ;;  %376 = vmatprep.subr.bf16.mxu1 %v421_v0  ;;  %v413_v20 = vld [vmem:[%s527_s1 + $0x88] sm:$0xff]   ;;  %v415_v23 = vld [vmem:[%s527_s1 + $0x40] sm:$0xff]   ;;  %v315_v24 = vcombine.high %v15_v22, %v15_v22  ;;  %v314_v28 = vcombine.low %v15_v22, %v15_v22 }
   0x9   :  { %345 = vmatprep.subr.bf16.mxu0 %v400_v7  ;;  %v414_v21 = vld [vmem:[%s527_s1 + $0x8] sm:$0xff]   ;;  %v416_v25 = vld [vmem:[%s527_s1 + $0x80] sm:$0xff]  }
   0xa   :  { %259 = vmatprep.mubr.bf16.mxu0 %v315_v24  ;;  %v417_v26 = vld [vmem:[%s527_s1] sm:$0xff]   ;;  %v420_v27 = vld [vmem:[%s528_s0 + $0x8] ss:$0 sps:$4 sm:$0xff]  }
   0xb   :  { %377 = vmatpush3.bf16.msra.mxu1 %v401_v8  ;;  %v313_v32 = vld [vmem:[%s529_s2] ss:$0 sm:$0xff] }
   0xc   :  { %346 = vmatpush3.bf16.msra.mxu0 %v402_v9  ;;  %378 = vmatprep.subr.bf16.mxu1 %v421_v0 }
   0xd   :  { %347 = vmatprep.subr.bf16.mxu0 %v403_v10 }
   0xf   :  { %379 = vmatpush3.bf16.msra.mxu1 %v404_v11 }
  0x10   :  { %348 = vmatpush3.bf16.msra.mxu0 %v405_v12  ;;  %380 = vmatprep.subr.bf16.mxu1 %v421_v0 }
  0x11   :  { %349 = vmatprep.subr.bf16.mxu0 %v406_v13 }
  0x13   :  { %381 = vmatpush3.bf16.msra.mxu1 %v407_v14 }
  0x14   :  { %350 = vmatpush3.bf16.msra.mxu0 %v408_v15  ;;  %382 = vmatprep.subr.bf16.mxu1 %v421_v0 }
  0x15   :  { %351 = vmatprep.subr.bf16.mxu0 %v409_v16 }
  0x17   :  { %383 = vmatpush3.bf16.msra.mxu1 %v410_v17 }
  0x18   :  { %352 = vmatpush3.bf16.msra.mxu0 %v411_v18  ;;  %384 = vmatprep.subr.bf16.mxu1 %v421_v0 }
  0x19   :  { %353 = vmatprep.subr.bf16.mxu0 %v412_v19 }
  0x1b   :  { %385 = vmatpush3.bf16.msra.mxu1 %v413_v20 }
  0x1c   :  { %354 = vmatpush3.bf16.msra.mxu0 %v414_v21  ;;  %386 = vmatprep.subr.bf16.mxu1 %v421_v0 }
  0x1d   :  { %355 = vmatprep.subr.bf16.mxu0 %v415_v23 }
  0x1f   :  { %387 = vmatpush3.bf16.msra.mxu1 %v416_v25 }
  0x20   :  { %356 = vmatpush3.bf16.msra.mxu0 %v417_v26 }
  0x22   :  { %389 = vmatmul.mubr.bf16.vlgmr.msra.gmra.mxu1 %v420_v27 }
  0x23   :  { %260 = vmatmul.mubr.bf16.vlgmr.msra.gmra.mxu0 %v314_v28 }
  0xe2   :  { %v301_v29 = vpop.f32.mrf.mxu1 }
  0xe3   :  { %v357_v30 = vpop.f32.mrf.mxu0 }
  0xe4   :  { %v390_v31 = vpop.f32.mrf.mxu1 }
  0xe5   :  { %v358_v33 = vpop.f32.mrf.mxu0 }
  0xe6   :  { %v359_v34 = vadd.f32 %v358_v33, %v357_v30  ;;  %v304_v35 = vpop.f32.mrf.mxu1 }
  0xe7   :  { %v360_v36 = vpop.f32.mrf.mxu0 }
  0xe8   :  { %v262_v37 = vadd.f32 %v359_v34, %v313_v32  ;;  %v391_v38 = vpop.f32.mrf.mxu1 }
  0xe9   :  { %v361_v39 = vpop.f32.mrf.mxu0 }
  0xea   :  { %v302_v40 = vadd.f32 %v301_v29, %v262_v37 }
  0xec   :  { %v307_v41 = vmax.f32 %v302_v40, 0.0 }
  0xee   :  { %308 = vst [vmem:[%s530_s3] sm:$0xff] %v307_v41 }

// kernel: human_vqvae_forward.30
= control target key start
LH: loop header
LB: loop body
LE: loop exit
PB: predicated region body
PF: predicated region fallthrough
CT: control target
= control target key end

     0   :  { %v431_v1 = vmov 0.0   ;;  %vm432_vm0 = vmmov 0   ;;  %s543_s1 = inlined_call_operand.vmem [shape: bf16[384,128], index: 1, kind: input, shape index: {}]   ;;  %s544_s0 = inlined_call_operand.vmem [shape: bf16[16,384], index: 0, kind: input, shape index: {}]   ;;  %s545_s2 = inlined_call_operand.vmem [shape: f32[1,128], index: 2, kind: input, shape index: {}]   ;;  %s546_s3 = inlined_call_operand.vmem [shape: f32[16,128], index: 3, kind: output, shape index: {}]  }
   0x1   :  { %v403_v0 = vld [vmem:[%s543_s1 + $0x78] sm:$0xff]   ;;  %381 = vmatprep.subr.bf16.mxu1 %v431_v1  ;;  %397 = vmatprep.mubr.msk.bf16.mxu1 %vm432_vm0, %v431_v1  ;;  %v406_v4 = vld [vmem:[%s543_s1 + $0x70] sm:$0xff]   ;;  %v409_v7 = vld [vmem:[%s543_s1 + $0x68] sm:$0xff]  }
   0x2   :  { %v404_v2 = vld [vmem:[%s543_s1 + $0x38] sm:$0xff]   ;;  %350 = vmatprep.subr.bf16.mxu0 %v403_v0  ;;  %v407_v5 = vld [vmem:[%s543_s1 + $0x30] sm:$0xff]   ;;  %v410_v8 = vld [vmem:[%s543_s1 + $0x28] sm:$0xff]  }
   0x3   :  { %v405_v3 = vld [vmem:[%s543_s1 + $0xb8] sm:$0xff]   ;;  %351 = vmatpush3.bf16.msra.mxu0 %v404_v2  ;;  %v408_v6 = vld [vmem:[%s543_s1 + $0xb0] sm:$0xff]   ;;  %v411_v9 = vld [vmem:[%s543_s1 + $0xa8] sm:$0xff]  }
   0x4   :  { %382 = vmatpush3.bf16.msra.mxu1 %v405_v3  ;;  %352 = vmatprep.subr.bf16.mxu0 %v406_v4  ;;  %v412_v10 = vld [vmem:[%s543_s1 + $0x60] sm:$0xff]   ;;  %v415_v13 = vld [vmem:[%s543_s1 + $0x58] sm:$0xff]   ;;  %v418_v16 = vld [vmem:[%s543_s1 + $0x50] sm:$0xff]  }
   0x5   :  { %383 = vmatprep.subr.bf16.mxu1 %v431_v1  ;;  %v413_v11 = vld [vmem:[%s543_s1 + $0x20] sm:$0xff]   ;;  %v416_v14 = vld [vmem:[%s543_s1 + $0x18] sm:$0xff]   ;;  %v419_v17 = vld [vmem:[%s543_s1 + $0x10] sm:$0xff]  }
   0x6   :  { %v414_v12 = vld [vmem:[%s543_s1 + $0xa0] sm:$0xff]   ;;  %v417_v15 = vld [vmem:[%s543_s1 + $0x98] sm:$0xff]   ;;  %v420_v18 = vld [vmem:[%s543_s1 + $0x90] sm:$0xff]  }
   0x7   :  { %353 = vmatpush3.bf16.msra.mxu0 %v407_v5  ;;  %v421_v19 = vld [vmem:[%s543_s1 + $0x48] sm:$0xff]   ;;  %v424_v22 = vld [vmem:[%s543_s1 + $0x40] sm:$0xff]  }
   0x8   :  { %384 = vmatpush3.bf16.msra.mxu1 %v408_v6  ;;  %354 = vmatprep.subr.bf16.mxu0 %v409_v7  ;;  %v422_v20 = vld [vmem:[%s543_s1 + $0x8] sm:$0xff]   ;;  %v429_v23 = vld [vmem:[%s544_s0 + $0x4] ss:$12 sps:$4 sm:$0xff]   ;;  %v322_v30 = vld [vmem:[%s545_s2] ss:$0 sm:$0xff] }
   0x9   :  { %385 = vmatprep.subr.bf16.mxu1 %v431_v1  ;;  %v423_v21 = vld [vmem:[%s543_s1 + $0x88] sm:$0xff]   ;;  %v425_v24 = vld [vmem:[%s543_s1] sm:$0xff]   ;;  %266 = vmatprep.mubr.bf16.mxu0 %v429_v23 }
   0xa   :  { %v426_v25 = vld [vmem:[%s543_s1 + $0x80] sm:$0xff]   ;;  %v430_v27 = vld [vmem:[%s544_s0 + $0x8] ss:$12 sps:$4 sm:$0xff]  }
   0xb   :  { %355 = vmatpush3.bf16.msra.mxu0 %v410_v8  ;;  %v427_v26 = vld [vmem:[%s544_s0] ss:$12 sps:$4 sm:$0xff]  }
   0xc   :  { %386 = vmatpush3.bf16.msra.mxu1 %v411_v9  ;;  %356 = vmatprep.subr.bf16.mxu0 %v412_v10 }
   0xd   :  { %387 = vmatprep.subr.bf16.mxu1 %v431_v1 }
   0xf   :  { %357 = vmatpush3.bf16.msra.mxu0 %v413_v11 }
  0x10   :  { %388 = vmatpush3.bf16.msra.mxu1 %v414_v12  ;;  %358 = vmatprep.subr.bf16.mxu0 %v415_v13 }
  0x11   :  { %389 = vmatprep.subr.bf16.mxu1 %v431_v1 }
  0x13   :  { %359 = vmatpush3.bf16.msra.mxu0 %v416_v14 }
  0x14   :  { %390 = vmatpush3.bf16.msra.mxu1 %v417_v15  ;;  %360 = vmatprep.subr.bf16.mxu0 %v418_v16 }
  0x15   :  { %391 = vmatprep.subr.bf16.mxu1 %v431_v1 }
  0x17   :  { %361 = vmatpush3.bf16.msra.mxu0 %v419_v17 }
  0x18   :  { %392 = vmatpush3.bf16.msra.mxu1 %v420_v18  ;;  %362 = vmatprep.subr.bf16.mxu0 %v421_v19 }
  0x19   :  { %393 = vmatprep.subr.bf16.mxu1 %v431_v1 }
  0x1b   :  { %363 = vmatpush3.bf16.msra.mxu0 %v422_v20 }
  0x1c   :  { %394 = vmatpush3.bf16.msra.mxu1 %v423_v21  ;;  %364 = vmatprep.subr.bf16.mxu0 %v424_v22 }
  0x1d   :  { %395 = vmatprep.subr.bf16.mxu1 %v431_v1 }
  0x1f   :  { %365 = vmatpush3.bf16.msra.mxu0 %v425_v24 }
  0x20   :  { %396 = vmatpush3.bf16.msra.mxu1 %v426_v25 }
  0x22   :  { %267 = vmatmul.mubr.bf16.vlgmr.msra.gmra.mxu0 %v427_v26 }
  0x23   :  { %398 = vmatmul.mubr.bf16.vlgmr.msra.gmra.mxu1 %v430_v27 }
  0xe2   :  { %v366_v28 = vpop.f32.mrf.mxu0 }
  0xe3   :  { %v309_v29 = vpop.f32.mrf.mxu1 }
  0xe4   :  { %v367_v31 = vpop.f32.mrf.mxu0 }
  0xe5   :  { %v368_v32 = vadd.f32 %v367_v31, %v366_v28  ;;  %v399_v33 = vpop.f32.mrf.mxu1 }
  0xe6   :  { %v369_v34 = vpop.f32.mrf.mxu0 }
  0xe7   :  { %v269_v35 = vadd.f32 %v368_v32, %v322_v30  ;;  %v312_v36 = vpop.f32.mrf.mxu1 }
  0xe8   :  { %v370_v37 = vpop.f32.mrf.mxu0 }
  0xe9   :  { %v310_v38 = vadd.f32 %v309_v29, %v269_v35  ;;  %v371_v39 = vadd.f32 %v370_v37, %v369_v34  ;;  %v400_v40 = vpop.f32.mrf.mxu1 }
  0xeb   :  { %316 = vst [vmem:[%s546_s3] sm:$0xff] %v310_v38  ;;  %v272_v41 = vadd.f32 %v371_v39, %v322_v30 }
  0xed   :  { %v313_v42 = vadd.f32 %v312_v36, %v272_v41 }
  0xef   :  { %317 = vst [vmem:[%s546_s3 + $0x8] sm:$0xff] %v313_v42 }

// kernel: human_vqvae_forward.33
= control target key start
LH: loop header
LB: loop body
LE: loop exit
PB: predicated region body
PF: predicated region fallthrough
CT: control target
= control target key end

     0   :  { %s606_s1 = inlined_call_operand.vmem [shape: bf16[384,128], index: 1, kind: input, shape index: {}]   ;;  %s607_s0 = inlined_call_operand.vmem [shape: bf16[32,384], index: 0, kind: input, shape index: {}]   ;;  %s608_s2 = inlined_call_operand.vmem [shape: f32[1,128], index: 2, kind: input, shape index: {}]   ;;  %s609_s3 = inlined_call_operand.vmem [shape: f32[32,128], index: 3, kind: output, shape index: {}]  }
   0x1   :  { %v449_v0 = vld [vmem:[%s606_s1 + $0x78] sm:$0xff]   ;;  %v451_v2 = vld [vmem:[%s606_s1 + $0x70] sm:$0xff]   ;;  %v454_v5 = vld [vmem:[%s606_s1 + $0x68] sm:$0xff]  }
   0x2   :  { %v450_v1 = vld [vmem:[%s606_s1 + $0x38] sm:$0xff]   ;;  %391 = vmatprep.subr.bf16.mxu0 %v449_v0  ;;  %v453_v4 = vld [vmem:[%s606_s1 + $0x30] sm:$0xff]   ;;  %v456_v7 = vld [vmem:[%s606_s1 + $0x28] sm:$0xff]  }
   0x3   :  { %392 = vmatpush3.bf16.msra.mxu0 %v450_v1  ;;  %v452_v3 = vld [vmem:[%s606_s1 + $0xb8] sm:$0xff]   ;;  %v455_v6 = vld [vmem:[%s606_s1 + $0xb0] sm:$0xff]   ;;  %v457_v8 = vld [vmem:[%s606_s1 + $0x60] sm:$0xff]  }
   0x4   :  { %393 = vmatprep.subr.bf16.mxu0 %v451_v2  ;;  %429 = vmatprep.subr.bf16.mxu1 %v452_v3  ;;  %v458_v9 = vld [vmem:[%s606_s1 + $0xa8] sm:$0xff]   ;;  %v459_v10 = vld [vmem:[%s606_s1 + $0x20] sm:$0xff]   ;;  %v460_v11 = vld [vmem:[%s606_s1 + $0x58] sm:$0xff]  }
   0x5   :  { %430 = vmatpush3.bf16.msra.mxu1 %v452_v3  ;;  %v461_v12 = vld [vmem:[%s606_s1 + $0xa0] sm:$0xff]   ;;  %v462_v13 = vld [vmem:[%s606_s1 + $0x18] sm:$0xff]   ;;  %v463_v15 = vld [vmem:[%s606_s1 + $0x50] sm:$0xff]  }
   0x6   :  { %431 = vmatprep.subr.bf16.mxu1 %v455_v6  ;;  %v464_v14 = vld [vmem:[%s606_s1 + $0x98] sm:$0xff]   ;;  %v465_v16 = vld [vmem:[%s606_s1 + $0x10] sm:$0xff]   ;;  %v466_v18 = vld [vmem:[%s606_s1 + $0x48] sm:$0xff]  }
   0x7   :  { %394 = vmatpush3.bf16.msra.mxu0 %v453_v4  ;;  %v467_v17 = vld [vmem:[%s606_s1 + $0x90] sm:$0xff]   ;;  %v468_v19 = vld [vmem:[%s606_s1 + $0x8] sm:$0xff]   ;;  %v469_v20 = vld [vmem:[%s606_s1 + $0x40] sm:$0xff]  }
   0x8   :  { %395 = vmatprep.subr.bf16.mxu0 %v454_v5  ;;  %v470_v21 = vld [vmem:[%s606_s1 + $0x88] sm:$0xff]   ;;  %v474_v22 = vld [vmem:[%s607_s0 + $0x4] ss:$12 sps:$4 sm:$0xff]   ;;  %v360_v32 = vld [vmem:[%s608_s2] ss:$0 sm:$0xff] }
   0x9   :  { %432 = vmatpush3.bf16.msra.mxu1 %v455_v6  ;;  %v471_v23 = vld [vmem:[%s606_s1] sm:$0xff]   ;;  %286 = vmatprep.mubr.bf16.mxu0 %v474_v22  ;;  %v476_v24 = vld [vmem:[%s607_s0 + $0x8] ss:$12 sps:$4 sm:$0xff]  }
   0xa   :  { %433 = vmatprep.subr.bf16.mxu1 %v458_v9  ;;  %v475_v25 = vld [vmem:[%s606_s1 + $0x80] sm:$0xff]   ;;  %445 = vmatprep.mubr.bf16.mxu1 %v476_v24  ;;  %v478_v27 = vld [vmem:[%s607_s0 + $0x1c] ss:$12 sps:$4 sm:$0xff]  }
   0xb   :  { %396 = vmatpush3.bf16.msra.mxu0 %v456_v7  ;;  %v472_v26 = vld [vmem:[%s607_s0] ss:$12 sps:$4 sm:$0xff]   ;;  %v480_v29 = vld [vmem:[%s607_s0 + $0x18] ss:$12 sps:$4 sm:$0xff]  }
   0xc   :  { %397 = vmatprep.subr.bf16.mxu0 %v457_v8  ;;  %v477_v28 = vld [vmem:[%s607_s0 + $0x20] ss:$12 sps:$4 sm:$0xff]  }
   0xd   :  { %434 = vmatpush3.bf16.msra.mxu1 %v458_v9 }
   0xe   :  { %435 = vmatprep.subr.bf16.mxu1 %v461_v12 }
   0xf   :  { %398 = vmatpush3.bf16.msra.mxu0 %v459_v10 }
  0x10   :  { %399 = vmatprep.subr.bf16.mxu0 %v460_v11 }
  0x11   :  { %436 = vmatpush3.bf16.msra.mxu1 %v461_v12 }
  0x12   :  { %437 = vmatprep.subr.bf16.mxu1 %v464_v14 }
  0x13   :  { %400 = vmatpush3.bf16.msra.mxu0 %v462_v13 }
  0x14   :  { %401 = vmatprep.subr.bf16.mxu0 %v463_v15 }
  0x15   :  { %438 = vmatpush3.bf16.msra.mxu1 %v464_v14 }
  0x16   :  { %439 = vmatprep.subr.bf16.mxu1 %v467_v17 }
  0x17   :  { %402 = vmatpush3.bf16.msra.mxu0 %v465_v16 }
  0x18   :  { %403 = vmatprep.subr.bf16.mxu0 %v466_v18 }
  0x19   :  { %440 = vmatpush3.bf16.msra.mxu1 %v467_v17 }
  0x1a   :  { %441 = vmatprep.subr.bf16.mxu1 %v470_v21 }
  0x1b   :  { %404 = vmatpush3.bf16.msra.mxu0 %v468_v19 }
  0x1c   :  { %405 = vmatprep.subr.bf16.mxu0 %v469_v20 }
  0x1d   :  { %442 = vmatpush3.bf16.msra.mxu1 %v470_v21 }
  0x1e   :  { %443 = vmatprep.subr.bf16.mxu1 %v475_v25 }
  0x1f   :  { %406 = vmatpush3.bf16.msra.mxu0 %v471_v23 }
  0x21   :  { %444 = vmatpush3.bf16.msra.mxu1 %v475_v25 }
  0x22   :  { %287 = vmatmul.mubr.bf16.vlgmr.msra.gmra.mxu0 %v472_v26 }
  0x23   :  { %294 = vmatprep.mubr.bf16.mxu0 %v478_v27 }
  0x24   :  { %446 = vmatmul.mubr.bf16.vlgmr.msra.gmra.mxu1 %v477_v28 }
  0x2a   :  { %295 = vmatmul.mubr.bf16.gmra.mxu0 %v480_v29 }
  0xe2   :  { %v407_v30 = vpop.f32.mrf.mxu0 }
  0xe4   :  { %v408_v31 = vpop.f32.mrf.mxu0  ;;  %v447_v34 = vpop.f32.mrf.mxu1 }
  0xe5   :  { %v409_v33 = vadd.f32 %v408_v31, %v407_v30 }
  0xe6   :  { %v410_v35 = vpop.f32.mrf.mxu0  ;;  %v337_v37 = vpop.f32.mrf.mxu1 }
  0xe7   :  { %v289_v36 = vadd.f32 %v409_v33, %v360_v32 }
  0xe8   :  { %v411_v38 = vpop.f32.mrf.mxu0  ;;  %v448_v41 = vpop.f32.mrf.mxu1 }
  0xe9   :  { %v412_v39 = vadd.f32 %v411_v38, %v410_v35  ;;  %v338_v40 = vadd.f32 %v337_v37, %v289_v36 }
  0xea   :  { %v413_v42 = vpop.f32.mrf.mxu0  ;;  %v340_v44 = vpop.f32.mrf.mxu1 }
  0xeb   :  { %352 = vst [vmem:[%s609_s3] sm:$0xff] %v338_v40  ;;  %v292_v43 = vadd.f32 %v412_v39, %v360_v32 }
  0xec   :  { %v414_v45 = vpop.f32.mrf.mxu0 }
  0xed   :  { %v415_v46 = vadd.f32 %v414_v45, %v413_v42  ;;  %v341_v47 = vadd.f32 %v340_v44, %v292_v43 }
  0xee   :  { %v416_v48 = vpop.f32.mrf.mxu0 }
  0xef   :  { %v297_v49 = vadd.f32 %v415_v46, %v360_v32  ;;  %353 = vst [vmem:[%s609_s3 + $0x8] sm:$0xff] %v341_v47 }
  0xf0   :  { %v417_v50 = vpop.f32.mrf.mxu0 }
  0xf1   :  { %v346_v51 = vadd.f32 %v447_v34, %v297_v49  ;;  %v418_v52 = vadd.f32 %v417_v50, %v416_v48 }
  0xf3   :  { %354 = vst [vmem:[%s609_s3 + $0x10] sm:$0xff] %v346_v51  ;;  %v300_v53 = vadd.f32 %v418_v52, %v360_v32 }
  0xf5   :  { %v349_v54 = vadd.f32 %v448_v41, %v300_v53 }
  0xf7   :  { %355 = vst [vmem:[%s609_s3 + $0x18] sm:$0xff] %v349_v54 }

// kernel: human_vqvae_forward.34
= control target key start
LH: loop header
LB: loop body
LE: loop exit
PB: predicated region body
PF: predicated region fallthrough
CT: control target
= control target key end

     0   :  { %s610_s1 = inlined_call_operand.vmem [shape: bf16[384,128], index: 1, kind: input, shape index: {}]   ;;  %s611_s0 = inlined_call_operand.vmem [shape: bf16[32,384], index: 0, kind: input, shape index: {}]   ;;  %s612_s2 = inlined_call_operand.vmem [shape: f32[1,128], index: 2, kind: input, shape index: {}]   ;;  %s613_s3 = inlined_call_operand.vmem [shape: f32[32,128], index: 3, kind: output, shape index: {}]  }
   0x1   :  { %v453_v0 = vld [vmem:[%s610_s1 + $0x78] sm:$0xff]   ;;  %v455_v2 = vld [vmem:[%s610_s1 + $0x70] sm:$0xff]   ;;  %v458_v5 = vld [vmem:[%s610_s1 + $0x68] sm:$0xff]  }
   0x2   :  { %v454_v1 = vld [vmem:[%s610_s1 + $0x38] sm:$0xff]   ;;  %395 = vmatprep.subr.bf16.mxu0 %v453_v0  ;;  %v457_v4 = vld [vmem:[%s610_s1 + $0x30] sm:$0xff]   ;;  %v460_v7 = vld [vmem:[%s610_s1 + $0x28] sm:$0xff]  }
   0x3   :  { %396 = vmatpush3.bf16.msra.mxu0 %v454_v1  ;;  %v456_v3 = vld [vmem:[%s610_s1 + $0xb8] sm:$0xff]   ;;  %v459_v6 = vld [vmem:[%s610_s1 + $0xb0] sm:$0xff]   ;;  %v461_v8 = vld [vmem:[%s610_s1 + $0x60] sm:$0xff]  }
   0x4   :  { %397 = vmatprep.subr.bf16.mxu0 %v455_v2  ;;  %433 = vmatprep.subr.bf16.mxu1 %v456_v3  ;;  %v462_v9 = vld [vmem:[%s610_s1 + $0xa8] sm:$0xff]   ;;  %v463_v10 = vld [vmem:[%s610_s1 + $0x20] sm:$0xff]   ;;  %v464_v11 = vld [vmem:[%s610_s1 + $0x58] sm:$0xff]  }
   0x5   :  { %434 = vmatpush3.bf16.msra.mxu1 %v456_v3  ;;  %v465_v12 = vld [vmem:[%s610_s1 + $0xa0] sm:$0xff]   ;;  %v466_v13 = vld [vmem:[%s610_s1 + $0x18] sm:$0xff]   ;;  %v467_v15 = vld [vmem:[%s610_s1 + $0x50] sm:$0xff]  }
   0x6   :  { %435 = vmatprep.subr.bf16.mxu1 %v459_v6  ;;  %v468_v14 = vld [vmem:[%s610_s1 + $0x98] sm:$0xff]   ;;  %v469_v16 = vld [vmem:[%s610_s1 + $0x10] sm:$0xff]   ;;  %v470_v18 = vld [vmem:[%s610_s1 + $0x48] sm:$0xff]  }
   0x7   :  { %398 = vmatpush3.bf16.msra.mxu0 %v457_v4  ;;  %v471_v17 = vld [vmem:[%s610_s1 + $0x90] sm:$0xff]   ;;  %v472_v19 = vld [vmem:[%s610_s1 + $0x8] sm:$0xff]   ;;  %v473_v20 = vld [vmem:[%s610_s1 + $0x40] sm:$0xff]  }
   0x8   :  { %399 = vmatprep.subr.bf16.mxu0 %v458_v5  ;;  %v474_v21 = vld [vmem:[%s610_s1 + $0x88] sm:$0xff]   ;;  %v478_v22 = vld [vmem:[%s611_s0 + $0x4] ss:$12 sps:$4 sm:$0xff]   ;;  %v364_v32 = vld [vmem:[%s612_s2] ss:$0 sm:$0xff] }
   0x9   :  { %436 = vmatpush3.bf16.msra.mxu1 %v459_v6  ;;  %v475_v23 = vld [vmem:[%s610_s1] sm:$0xff]   ;;  %286 = vmatprep.mubr.bf16.mxu0 %v478_v22  ;;  %v480_v24 = vld [vmem:[%s611_s0 + $0x8] ss:$12 sps:$4 sm:$0xff]  }
   0xa   :  { %437 = vmatprep.subr.bf16.mxu1 %v462_v9  ;;  %v479_v25 = vld [vmem:[%s610_s1 + $0x80] sm:$0xff]   ;;  %449 = vmatprep.mubr.bf16.mxu1 %v480_v24  ;;  %v482_v27 = vld [vmem:[%s611_s0 + $0x1c] ss:$12 sps:$4 sm:$0xff]  }
   0xb   :  { %400 = vmatpush3.bf16.msra.mxu0 %v460_v7  ;;  %v476_v26 = vld [vmem:[%s611_s0] ss:$12 sps:$4 sm:$0xff]   ;;  %v484_v29 = vld [vmem:[%s611_s0 + $0x18] ss:$12 sps:$4 sm:$0xff]  }
   0xc   :  { %401 = vmatprep.subr.bf16.mxu0 %v461_v8  ;;  %v481_v28 = vld [vmem:[%s611_s0 + $0x20] ss:$12 sps:$4 sm:$0xff]  }
   0xd   :  { %438 = vmatpush3.bf16.msra.mxu1 %v462_v9 }
   0xe   :  { %439 = vmatprep.subr.bf16.mxu1 %v465_v12 }
   0xf   :  { %402 = vmatpush3.bf16.msra.mxu0 %v463_v10 }
  0x10   :  { %403 = vmatprep.subr.bf16.mxu0 %v464_v11 }
  0x11   :  { %440 = vmatpush3.bf16.msra.mxu1 %v465_v12 }
  0x12   :  { %441 = vmatprep.subr.bf16.mxu1 %v468_v14 }
  0x13   :  { %404 = vmatpush3.bf16.msra.mxu0 %v466_v13 }
  0x14   :  { %405 = vmatprep.subr.bf16.mxu0 %v467_v15 }
  0x15   :  { %442 = vmatpush3.bf16.msra.mxu1 %v468_v14 }
  0x16   :  { %443 = vmatprep.subr.bf16.mxu1 %v471_v17 }
  0x17   :  { %406 = vmatpush3.bf16.msra.mxu0 %v469_v16 }
  0x18   :  { %407 = vmatprep.subr.bf16.mxu0 %v470_v18 }
  0x19   :  { %444 = vmatpush3.bf16.msra.mxu1 %v471_v17 }
  0x1a   :  { %445 = vmatprep.subr.bf16.mxu1 %v474_v21 }
  0x1b   :  { %408 = vmatpush3.bf16.msra.mxu0 %v472_v19 }
  0x1c   :  { %409 = vmatprep.subr.bf16.mxu0 %v473_v20 }
  0x1d   :  { %446 = vmatpush3.bf16.msra.mxu1 %v474_v21 }
  0x1e   :  { %447 = vmatprep.subr.bf16.mxu1 %v479_v25 }
  0x1f   :  { %410 = vmatpush3.bf16.msra.mxu0 %v475_v23 }
  0x21   :  { %448 = vmatpush3.bf16.msra.mxu1 %v479_v25 }
  0x22   :  { %287 = vmatmul.mubr.bf16.vlgmr.msra.gmra.mxu0 %v476_v26 }
  0x23   :  { %294 = vmatprep.mubr.bf16.mxu0 %v482_v27 }
  0x24   :  { %450 = vmatmul.mubr.bf16.vlgmr.msra.gmra.mxu1 %v481_v28 }
  0x2a   :  { %295 = vmatmul.mubr.bf16.gmra.mxu0 %v484_v29 }
  0xe2   :  { %v411_v30 = vpop.f32.mrf.mxu0 }
  0xe4   :  { %v412_v31 = vpop.f32.mrf.mxu0  ;;  %v451_v34 = vpop.f32.mrf.mxu1 }
  0xe5   :  { %v413_v33 = vadd.f32 %v412_v31, %v411_v30 }
  0xe6   :  { %v414_v35 = vpop.f32.mrf.mxu0  ;;  %v337_v37 = vpop.f32.mrf.mxu1 }
  0xe7   :  { %v289_v36 = vadd.f32 %v413_v33, %v364_v32 }
  0xe8   :  { %v415_v38 = vpop.f32.mrf.mxu0  ;;  %v452_v41 = vpop.f32.mrf.mxu1 }
  0xe9   :  { %v416_v39 = vadd.f32 %v415_v38, %v414_v35  ;;  %v338_v40 = vadd.f32 %v337_v37, %v289_v36 }
  0xea   :  { %v417_v42 = vpop.f32.mrf.mxu0  ;;  %v340_v45 = vpop.f32.mrf.mxu1 }
  0xeb   :  { %v352_v43 = vmax.f32 %v338_v40, 0.0  ;;  %v292_v44 = vadd.f32 %v416_v39, %v364_v32 }
  0xec   :  { %v418_v46 = vpop.f32.mrf.mxu0 }
  0xed   :  { %356 = vst [vmem:[%s613_s3] sm:$0xff] %v352_v43  ;;  %v419_v47 = vadd.f32 %v418_v46, %v417_v42  ;;  %v341_v48 = vadd.f32 %v340_v45, %v292_v44 }
  0xee   :  { %v420_v49 = vpop.f32.mrf.mxu0 }
  0xef   :  { %v297_v50 = vadd.f32 %v419_v47, %v364_v32  ;;  %v353_v51 = vmax.f32 %v341_v48, 0.0 }
  0xf0   :  { %v421_v52 = vpop.f32.mrf.mxu0 }
  0xf1   :  { %v346_v53 = vadd.f32 %v451_v34, %v297_v50  ;;  %357 = vst [vmem:[%s613_s3 + $0x8] sm:$0xff] %v353_v51  ;;  %v422_v54 = vadd.f32 %v421_v52, %v420_v49 }
  0xf3   :  { %v354_v55 = vmax.f32 %v346_v53, 0.0  ;;  %v300_v56 = vadd.f32 %v422_v54, %v364_v32 }
  0xf5   :  { %358 = vst [vmem:[%s613_s3 + $0x10] sm:$0xff] %v354_v55  ;;  %v349_v57 = vadd.f32 %v452_v41, %v300_v56 }
  0xf7   :  { %v355_v58 = vmax.f32 %v349_v57, 0.0 }
  0xf9   :  { %359 = vst [vmem:[%s613_s3 + $0x18] sm:$0xff] %v355_v58 }

// kernel: human_vqvae_forward.35
= control target key start
LH: loop header
LB: loop body
LE: loop exit
PB: predicated region body
PF: predicated region fallthrough
CT: control target
= control target key end

     0   :  { %v646_v2 = vmov 0   ;;  %s840_s0 = inlined_call_operand.vmem [shape: bf16[32,384], index: 0, kind: input, shape index: {}]   ;;  %s841_s1 = inlined_call_operand.vmem [shape: bf16[384,256], index: 1, kind: input, shape index: {}]   ;;  %s842_s2 = inlined_call_operand.vmem [shape: f32[1,256], index: 2, kind: input, shape index: {}]   ;;  %s843_s3 = inlined_call_operand.hbm [shape: f32[32,256], index: 3, kind: output, shape index: {}]  }
   0x1   :  { %v544_v0 = vld [vmem:[%s841_s1 + $0x74] ss:$8 sps:$4 sm:$0xff]   ;;  %v546_v1 = vld [vmem:[%s841_s1 + $0x70] ss:$8 sps:$4 sm:$0xff]   ;;  %441 = vmatprep.mubr.bf16.mxu1 %v646_v2  ;;  %v547_v3 = vld [vmem:[%s841_s1 + $0x64] ss:$8 sps:$4 sm:$0xff]  }
   0x2   :  { %356 = vmatprep.subr.bf16.mxu0 %v544_v0  ;;  %v549_v4 = vld [vmem:[%s841_s1 + $0x60] ss:$8 sps:$4 sm:$0xff]   ;;  %v550_v5 = vld [vmem:[%s841_s1 + $0x54] ss:$8 sps:$4 sm:$0xff]   ;;  %v552_v6 = vld [vmem:[%s841_s1 + $0x50] ss:$8 sps:$4 sm:$0xff]  }
   0x3   :  { %357 = vmatpush1.bf16.msra.mxu0 %v546_v1  ;;  %v553_v7 = vld [vmem:[%s841_s1 + $0x44] ss:$8 sps:$4 sm:$0xff]   ;;  %v555_v8 = vld [vmem:[%s841_s1 + $0x40] ss:$8 sps:$4 sm:$0xff]   ;;  %v567_v9 = vld [vmem:[%s841_s1 + $0x174] ss:$8 sps:$4 sm:$0xff]  }
   0x4   :  { %358 = vmatprep.subr.bf16.mxu0 %v547_v3  ;;  %v570_v10 = vld [vmem:[%s841_s1 + $0x170] ss:$8 sps:$4 sm:$0xff]   ;;  %v556_v11 = vld [vmem:[%s841_s1 + $0x34] ss:$8 sps:$4 sm:$0xff]   ;;  %409 = vmatprep.subr.bf16.mxu1 %v567_v9  ;;  %v573_v12 = vld [vmem:[%s841_s1 + $0x164] ss:$8 sps:$4 sm:$0xff]  }
   0x5   :  { %410 = vmatpush1.bf16.msra.mxu1 %v570_v10  ;;  %v576_v13 = vld [vmem:[%s841_s1 + $0x160] ss:$8 sps:$4 sm:$0xff]   ;;  %v558_v14 = vld [vmem:[%s841_s1 + $0x30] ss:$8 sps:$4 sm:$0xff]   ;;  %v559_v15 = vld [vmem:[%s841_s1 + $0x24] ss:$8 sps:$4 sm:$0xff]  }
   0x6   :  { %411 = vmatprep.subr.bf16.mxu1 %v573_v12  ;;  %v579_v16 = vld [vmem:[%s841_s1 + $0x154] ss:$8 sps:$4 sm:$0xff]   ;;  %v582_v17 = vld [vmem:[%s841_s1 + $0x150] ss:$8 sps:$4 sm:$0xff]   ;;  %v561_v18 = vld [vmem:[%s841_s1 + $0x20] ss:$8 sps:$4 sm:$0xff]  }
   0x7   :  { %359 = vmatpush1.bf16.msra.mxu0 %v549_v4  ;;  %v585_v19 = vld [vmem:[%s841_s1 + $0x144] ss:$8 sps:$4 sm:$0xff]   ;;  %v562_v20 = vld [vmem:[%s841_s1 + $0x14] ss:$8 sps:$4 sm:$0xff]   ;;  %v564_v21 = vld [vmem:[%s841_s1 + $0x10] ss:$8 sps:$4 sm:$0xff]  }
   0x8   :  { %360 = vmatprep.subr.bf16.mxu0 %v550_v5  ;;  %v588_v22 = vld [vmem:[%s841_s1 + $0x140] ss:$8 sps:$4 sm:$0xff]   ;;  %v591_v23 = vld [vmem:[%s841_s1 + $0x134] ss:$8 sps:$4 sm:$0xff]   ;;  %v565_v24 = vld [vmem:[%s841_s1 + $0x4] ss:$8 sps:$4 sm:$0xff]  }
   0x9   :  { %412 = vmatpush1.bf16.msra.mxu1 %v576_v13  ;;  %v594_v25 = vld [vmem:[%s841_s1 + $0x130] ss:$8 sps:$4 sm:$0xff]   ;;  %v569_v26 = vld [vmem:[%s841_s1] ss:$8 sps:$4 sm:$0xff]   ;;  %v597_v27 = vld [vmem:[%s841_s1 + $0x124] ss:$8 sps:$4 sm:$0xff]  }
   0xa   :  { %413 = vmatprep.subr.bf16.mxu1 %v579_v16  ;;  %v571_v28 = vld [vmem:[%s841_s1 + $0xf4] ss:$8 sps:$4 sm:$0xff]   ;;  %v575_v29 = vld [vmem:[%s841_s1 + $0xf0] ss:$8 sps:$4 sm:$0xff]   ;;  %v600_v30 = vld [vmem:[%s841_s1 + $0x120] ss:$8 sps:$4 sm:$0xff]  }
   0xb   :  { %361 = vmatpush1.bf16.msra.mxu0 %v552_v6  ;;  %v603_v31 = vld [vmem:[%s841_s1 + $0x114] ss:$8 sps:$4 sm:$0xff]   ;;  %v577_v32 = vld [vmem:[%s841_s1 + $0xe4] ss:$8 sps:$4 sm:$0xff]   ;;  %v581_v33 = vld [vmem:[%s841_s1 + $0xe0] ss:$8 sps:$4 sm:$0xff]  }
   0xc   :  { %362 = vmatprep.subr.bf16.mxu0 %v553_v7  ;;  %v606_v34 = vld [vmem:[%s841_s1 + $0x110] ss:$8 sps:$4 sm:$0xff]   ;;  %v609_v36 = vld [vmem:[%s841_s1 + $0x104] ss:$8 sps:$4 sm:$0xff]   ;;  %v583_v37 = vld [vmem:[%s841_s1 + $0xd4] ss:$8 sps:$4 sm:$0xff]  }
   0xd   :  { %414 = vmatpush1.bf16.msra.mxu1 %v582_v17  ;;  %v619_v35 = vld [vmem:[%s840_s0 + $0x4] ss:$12 sps:$4 sm:$0xff]  }
   0xe   :  { %415 = vmatprep.subr.bf16.mxu1 %v585_v19  ;;  %388 = vmatprep.mubr.bf16.mxu0 %v619_v35 }
   0xf   :  { %363 = vmatpush1.bf16.msra.mxu0 %v555_v8 }
  0x10   :  { %364 = vmatprep.subr.bf16.mxu0 %v556_v11 }
  0x11   :  { %416 = vmatpush1.bf16.msra.mxu1 %v588_v22 }
  0x12   :  { %417 = vmatprep.subr.bf16.mxu1 %v591_v23 }
  0x13   :  { %365 = vmatpush1.bf16.msra.mxu0 %v558_v14 }
  0x14   :  { %366 = vmatprep.subr.bf16.mxu0 %v559_v15 }
  0x15   :  { %418 = vmatpush1.bf16.msra.mxu1 %v594_v25 }
  0x16   :  { %419 = vmatprep.subr.bf16.mxu1 %v597_v27 }
  0x17   :  { %367 = vmatpush1.bf16.msra.mxu0 %v561_v18 }
  0x18   :  { %368 = vmatprep.subr.bf16.mxu0 %v562_v20 }
  0x19   :  { %420 = vmatpush1.bf16.msra.mxu1 %v600_v30 }
  0x1a   :  { %421 = vmatprep.subr.bf16.mxu1 %v603_v31 }
  0x1b   :  { %369 = vmatpush1.bf16.msra.mxu0 %v564_v21 }
  0x1c   :  { %370 = vmatprep.subr.bf16.mxu0 %v565_v24 }
  0x1f   :  { %371 = vmatpush1.bf16.msra.mxu0 %v569_v26 }
  0x20   :  { %372 = vmatprep.subr.bf16.mxu0 %v571_v28 }
  0x23   :  { %373 = vmatpush2.bf16.msra.mxu0 %v575_v29 }
  0x24   :  { %374 = vmatprep.subr.bf16.mxu0 %v577_v32 }
  0x25   :  { %8 = vsyncpa [#allocation3], 0  ;;  %422 = vmatpush1.bf16.msra.mxu1 %v606_v34  ;;  %v612_v38 = vld [vmem:[%s841_s1 + $0x100] ss:$8 sps:$4 sm:$0xff]   ;;  %v587_v39 = vld [vmem:[%s841_s1 + $0xd0] ss:$8 sps:$4 sm:$0xff]   ;;  %v74_v55 = vlaneseq }
  0x26   :  { %423 = vmatprep.subr.bf16.mxu1 %v609_v36  ;;  %v589_v40 = vld [vmem:[%s841_s1 + $0xc4] ss:$8 sps:$4 sm:$0xff]   ;;  %v615_v41 = vld [vmem:[%s840_s0 + $0x8] ss:$12 sps:$4 sm:$0xff]   ;;  %v599_v44 = vld [vmem:[%s841_s1 + $0xb0] ss:$8 sps:$4 sm:$0xff]  }
  0x27   :  { %375 = vmatpush2.bf16.msra.mxu0 %v581_v33  ;;  %v593_v42 = vld [vmem:[%s841_s1 + $0xc0] ss:$8 sps:$4 sm:$0xff]   ;;  %v595_v43 = vld [vmem:[%s841_s1 + $0xb4] ss:$8 sps:$4 sm:$0xff]   ;;  %v601_v45 = vld [vmem:[%s841_s1 + $0xa4] ss:$8 sps:$4 sm:$0xff]  }
  0x28   :  { %376 = vmatprep.subr.bf16.mxu0 %v583_v37  ;;  %v620_v46 = vld [vmem:[%s840_s0 + $0x20] ss:$12 sps:$4 sm:$0xff]   ;;  %v607_v48 = vld [vmem:[%s841_s1 + $0x94] ss:$8 sps:$4 sm:$0xff]   ;;  %v611_v49 = vld [vmem:[%s841_s1 + $0x90] ss:$8 sps:$4 sm:$0xff]  }
  0x29   :  { %424 = vmatpush1.bf16.msra.mxu1 %v612_v38  ;;  %v605_v47 = vld [vmem:[%s841_s1 + $0xa0] ss:$8 sps:$4 sm:$0xff]   ;;  %v613_v50 = vld [vmem:[%s841_s1 + $0x84] ss:$8 sps:$4 sm:$0xff]   ;;  %v75_v57 = vshrl.u32 %v74_v55, 7 }
  0x2a   :  { %v616_v51 = vld [vmem:[%s841_s1 + $0x80] ss:$8 sps:$4 sm:$0xff]   ;;  %v623_v54 = vld [vmem:[%s840_s0 + $0x18] ss:$12 sps:$4 sm:$0xff]  }
  0x2b   :  { %377 = vmatpush2.bf16.msra.mxu0 %v587_v39  ;;  %v617_v52 = vld [vmem:[%s840_s0] ss:$12 sps:$4 sm:$0xff]   ;;  %v621_v53 = vld [vmem:[%s840_s0 + $0x1c] ss:$12 sps:$4 sm:$0xff]   ;;  %v76_v59 = vsub.s32 0, %v75_v57  ;;  %v80_v61 = vsub.s32 1, %v75_v57 }
  0x2c   :  { %378 = vmatprep.subr.bf16.mxu0 %v589_v40  ;;  %442 = vmatmul.mubr.bf16.vlgmr.msra.gmra.mxu1 %v615_v41  ;;  %v72_v60 = vld [vmem:[%s842_s2] sm:$0x3]  ;;  %s647_s0 = smov [#allocation2]  }
  0x2d   :  { %451 = vmatprep.mubr.bf16.mxu1 %v646_v2  ;;  %v77_v63 = vrot.slane %v72_v60, %v76_v59  ;;  %v81_v0 = vrot.slane %v72_v60, %v80_v61  ;;  %s475_s2 = sshll.u32 %s647_s0, 4  ;;  %s476_s2 = int_to_ptr.vmem [resolvable:$true] %s475_s2 }
  0x2e   :  { %s624_s13 = scalar_lea.vmem %s476_s2, 1024  ;;  %p629_p1 = scmp.lt.s32.totalorder %s476_s2, %s476_s2 }
  0x2f   :  { %379 = vmatpush2.bf16.msra.mxu0 %v593_v42  ;;  %p625_p0 = scmp.ne.s32.totalorder %s476_s2, %s624_s13  ;;  %p630_p2 = scmp.lt.s32.totalorder %s624_s13, %s624_s13 }
  0x30   :  { %380 = vmatprep.subr.bf16.mxu0 %v595_v43 }
  0x31   :  { %p631_p3 = por %p630_p2, %p629_p1 }
  0x33   :  { %381 = vmatpush2.bf16.msra.mxu0 %v599_v44  ;;  %p632_p4 = pnand %p631_p3, %p625_p0 }
  0x34   :  { %382 = vmatprep.subr.bf16.mxu0 %v601_v45  ;;  %452 = vmatmul.mubr.bf16.gmra.mxu1 %v620_v46 }
  0x37   :  { %383 = vmatpush2.bf16.msra.mxu0 %v605_v47 }
  0x38   :  { %384 = vmatprep.subr.bf16.mxu0 %v607_v48 }
  0x3b   :  { %385 = vmatpush2.bf16.msra.mxu0 %v611_v49 }
  0x3c   :  { %386 = vmatprep.subr.bf16.mxu0 %v613_v50 }
  0x3f   :  { %387 = vmatpush2.bf16.msra.mxu0 %v616_v51 }
  0x42   :  { %389 = vmatmul.mubr.bf16.vlgmr.msra.gmra.mxu0 %v617_v52 }
  0x43   :  { %398 = vmatprep.mubr.bf16.mxu0 %v621_v53 }
  0x4a   :  { %399 = vmatmul.mubr.bf16.gmra.mxu0 %v623_v54 }
  0xec   :  { %v443_v56 = vpop.f32.mrf.mxu1 }
  0xee   :  { %v445_v58 = vpop.f32.mrf.mxu1 }
  0xf0   :  { %v447_v62 = vpop.f32.mrf.mxu1 }
  0xf2   :  { %v449_v2 = vpop.f32.mrf.mxu1 }
  0xf4   :  { %v453_v8 = vpop.f32.mrf.mxu1 }
  0xf6   :  { %v455_v14 = vpop.f32.mrf.mxu1 }
  0xf8   :  { %v457_v21 = vpop.f32.mrf.mxu1 }
  0xfa   :  { %v459_v28 = vpop.f32.mrf.mxu1 }
 0x102   :  { %v390_v1 = vpop.f32.mrf.mxu0 }
 0x103   :  { %v391_v3 = vadd.f32 %v390_v1, %v77_v63 }
 0x104   :  { %v392_v4 = vpop.f32.mrf.mxu0 }
 0x105   :  { %v444_v5 = vadd.f32 %v443_v56, %v391_v3  ;;  %v393_v6 = vadd.f32 %v392_v4, %v81_v0 }
 0x106   :  { %v394_v7 = vpop.f32.mrf.mxu0 }
 0x107   :  { %462 = vst [vmem:[#allocation2] sm:$0xff] %v444_v5  ;;  %v446_v9 = vadd.f32 %v445_v58, %v393_v6  ;;  %v395_v10 = vadd.f32 %v394_v7, %v77_v63 }
 0x108   :  { %v396_v11 = vpop.f32.mrf.mxu0 }
 0x109   :  { %463 = vst [vmem:[#allocation2 + $0x8] sm:$0xff] %v446_v9  ;;  %v448_v12 = vadd.f32 %v447_v62, %v395_v10  ;;  %v397_v13 = vadd.f32 %v396_v11, %v81_v0 }
 0x10a   :  { %v400_v15 = vpop.f32.mrf.mxu0 }
 0x10b   :  { %464 = vst [vmem:[#allocation2 + $0x10] sm:$0xff] %v448_v12  ;;  %v450_v16 = vadd.f32 %v449_v2, %v397_v13  ;;  %v401_v17 = vadd.f32 %v400_v15, %v77_v63 }
 0x10c   :  { %v402_v18 = vpop.f32.mrf.mxu0 }
 0x10d   :  { %465 = vst [vmem:[#allocation2 + $0x18] sm:$0xff] %v450_v16  ;;  %v454_v19 = vadd.f32 %v453_v8, %v401_v17  ;;  %v403_v20 = vadd.f32 %v402_v18, %v81_v0 }
 0x10e   :  { %v404_v22 = vpop.f32.mrf.mxu0 }
 0x10f   :  { %466 = vst [vmem:[#allocation2 + $0x20] sm:$0xff] %v454_v19  ;;  %v456_v23 = vadd.f32 %v455_v14, %v403_v20  ;;  %v405_v24 = vadd.f32 %v404_v22, %v77_v63 }
 0x110   :  { %v406_v25 = vpop.f32.mrf.mxu0 }
 0x111   :  { %467 = vst [vmem:[#allocation2 + $0x28] sm:$0xff] %v456_v23  ;;  %v458_v26 = vadd.f32 %v457_v21, %v405_v24  ;;  %v407_v27 = vadd.f32 %v406_v25, %v81_v0 }
 0x113   :  { %468 = vst [vmem:[#allocation2 + $0x30] sm:$0xff] %v458_v26  ;;  %v460_v29 = vadd.f32 %v459_v28, %v407_v27 }
 0x115   :  { %469 = vst [vmem:[#allocation2 + $0x38] sm:$0xff] %v460_v29 }
 0x116   :  { %635 = shalt.err (!%p632_p4)
}
 0x117   :  { %s648_s14 = smov 256   ;;  %s649_s15 = smov 16  }
 0x118   :  { %481 = dma.vmem_to_hbm [thread:$0]  %s476_s2, 1024, %s843_s3, [#allocation3], %s648_s14, %s648_s14, %s649_s15  }
 0x119   :  { %644 = dma.done.wait [#allocation3], 1024  }
 0x11a   :  { %645 = vsyncadd [#allocation3], 4294966272 }
 0x11b   :  { %485 = vsyncpa [#allocation3], 1 }

</bundles_post_ra>
